<compile_context>
chip_gen: v6e
topology: v6e:2x2x1
jax: 0.10.0
libtpu: 0.0.40
codegen_flags: <defaults>
</compile_context>

<pallas_src>
import functools

import numpy as np
import jax
import jax.numpy as jnp
from jax.experimental import pallas as pl
from jax.experimental.pallas import tpu as pltpu


# ----------------------------------------------------------------------------- #
# Pallas kernel: full window attention for a block of `bw` windows per grid step.
# ----------------------------------------------------------------------------- #
def _window_attention_kernel(x_ref, wq_ref, wk_ref, wv_ref, qb_ref, vb_ref,
                             scale_ref, bias_ref, wproj_ref, pb_ref,
                             o_ref,
                             q_scr, k_scr, v_scr, ctx_scr,
                             *, num_heads, head_dim, approx_recip):
    bw, n, c = x_ref.shape
    nh, hd = num_heads, head_dim
    m = bw * n
    cdt = wq_ref.dtype                      # MXU operand dtype (bf16 fast / f32 exact)

    # ---- large-M q/k/v projections on the flattened (bw*N, C) slab (MXU) ----
    x = x_ref[...].reshape(m, c).astype(cdt)
    q = jnp.dot(x, wq_ref[...], preferred_element_type=jnp.float32) + qb_ref[...]
    k = jnp.dot(x, wk_ref[...], preferred_element_type=jnp.float32)
    v = jnp.dot(x, wv_ref[...], preferred_element_type=jnp.float32) + vb_ref[...]

    # ---- split heads into VMEM scratch (lane-offset copies only; no per-head
    #      matmuls, no concatenate — contractions below are batched) ----
    for h in range(nh):                                     # static, data movement only
        sl = slice(h * hd, (h + 1) * hd)
        q_scr[h] = q[:, sl]
        k_scr[h] = k[:, sl]
        v_scr[h] = v[:, sl]

    qh = q_scr[...]                                         # (nh, bw*N, hd)
    kh = k_scr[...]
    vh = v_scr[...]

    # ---- cosine attention: L2-normalise q/k (F.normalize, eps=1e-12); fold the
    #      per-head logit scale into the normalised q rows (cheaper than
    #      scaling the (N, N) score matrix) ----
    qh = qh * jax.lax.rsqrt(jnp.maximum(jnp.sum(qh * qh, axis=-1, keepdims=True), 1e-24))
    kh = kh * jax.lax.rsqrt(jnp.maximum(jnp.sum(kh * kh, axis=-1, keepdims=True), 1e-24))
    qh = qh * scale_ref[...]                                # (nh, 1, 1) broadcast

    # (nh, bw*N, hd) -> (nh*bw, N, hd): regroup of major dims only (free)
    qh = qh.reshape(nh * bw, n, hd)
    kh = kh.reshape(nh * bw, n, hd)
    vh = vh.reshape(nh * bw, n, hd)

    # ---- batched attention scores over all (head, window) pairs ----
    attn = jnp.einsum("bqd,bkd->bqk", qh, kh,
                      preferred_element_type=jnp.float32)   # (nh*bw, N, N)
    attn = attn.reshape(nh, bw, n, n) + bias_ref[...]       # resident bias (+ mask)

    # stable softmax; divide on the EUP (approx reciprocal) in the fast path
    attn = attn - jnp.max(attn, axis=-1, keepdims=True)
    attn = jnp.exp(attn)
    attn = attn * pl.reciprocal(jnp.sum(attn, axis=-1, keepdims=True),
                                approx=approx_recip)
    attn = attn.reshape(nh * bw, n, n)

    # ---- attn @ v, batched over (head, window) ----
    ctx = jnp.einsum("bqk,bkd->bqd", attn.astype(cdt), vh.astype(cdt),
                     preferred_element_type=jnp.float32)    # (nh*bw, N, hd)
    ctx = ctx.reshape(nh, m, hd)

    # write head outputs directly at their column offsets (no concatenate)
    for h in range(nh):
        ctx_scr[:, h * hd:(h + 1) * hd] = ctx[h]

    # ---- output projection on the flattened slab ----
    out = jnp.dot(ctx_scr[...].astype(cdt), wproj_ref[...],
                  preferred_element_type=jnp.float32) + pb_ref[...]
    o_ref[...] = out.reshape(bw, n, c).astype(o_ref.dtype)


# ----------------------------------------------------------------------------- #
# Glue: continuous relative position bias (cpb MLP + gather), exactly as PyTorch.
# ----------------------------------------------------------------------------- #
def compute_relative_position_bias(cpb_w1, cpb_b1, cpb_w2, window_size, num_heads,
                                   pretrained_window_size=(0, 0)):
    Wh, Ww = window_size

    # relative_coords_table  (1, 2Wh-1, 2Ww-1, 2)
    rch = np.arange(-(Wh - 1), Wh, dtype=np.float32)
    rcw = np.arange(-(Ww - 1), Ww, dtype=np.float32)
    table = np.stack(np.meshgrid(rch, rcw, indexing="ij"))
    table = np.transpose(table, (1, 2, 0))[None].copy()
    if pretrained_window_size[0] > 0:
        table[..., 0] /= (pretrained_window_size[0] - 1)
        table[..., 1] /= (pretrained_window_size[1] - 1)
    else:
        table[..., 0] /= (Wh - 1)
        table[..., 1] /= (Ww - 1)
    table *= 8.0
    table = np.sign(table) * np.log2(np.abs(table) + 1.0) / np.log2(8.0)

    # relative_position_index  (N, N)
    coords = np.stack(np.meshgrid(np.arange(Wh), np.arange(Ww), indexing="ij"))
    cf = coords.reshape(2, -1)
    rel = cf[:, :, None] - cf[:, None, :]
    rel = np.transpose(rel, (1, 2, 0)).copy()
    rel[..., 0] += Wh - 1
    rel[..., 1] += Ww - 1
    rel[..., 0] *= 2 * Ww - 1
    rpi = rel.sum(-1)

    # cpb_mlp: Linear(2,512,bias) -> ReLU -> Linear(512,num_heads,no bias)
    t = jnp.asarray(table, jnp.float32)
    h1 = jax.nn.relu(jnp.einsum("...i,oi->...o", t, cpb_w1) + cpb_b1)
    tab = jnp.einsum("...i,oi->...o", h1, cpb_w2).reshape(-1, num_heads)

    N = Wh * Ww
    bias = tab[jnp.asarray(rpi.reshape(-1))].reshape(N, N, num_heads)
    bias = jnp.transpose(bias, (2, 0, 1))                   # (nh, N, N)
    bias = 16.0 * jax.nn.sigmoid(bias)
    return bias


# ----------------------------------------------------------------------------- #
# Helpers / wrapper
# ----------------------------------------------------------------------------- #
def _pick_block_windows(total_windows, multiple, target=64):
    """Largest window-block size dividing total_windows, multiple of `multiple`
    (mask periodicity) and <= max(target, multiple); prefers leaving >= 2 grid
    steps so the 'parallel' grid axis can shard across TensorCores."""
    assert total_windows % multiple == 0
    reps = total_windows // multiple
    cap = max(target // multiple, 1)
    divs = [g for g in range(1, reps + 1) if reps % g == 0]
    good = [g for g in divs if g <= cap] or [1]
    g = max(good)
    if g == reps and reps > 1:          # keep at least 2 grid steps when possible
        smaller = [d for d in good if d < reps]
        if smaller:
            g = max(smaller)
    return multiple * g


def window_attention_pallas(x, params, window_size, num_heads, mask=None, *,
                            block_windows=None,
                            mxu_dtype=jnp.bfloat16,
                            approx_softmax=True):
    B_, N, C = x.shape
    nh = num_heads
    hd = C // nh

    rel_bias = compute_relative_position_bias(
        params["cpb_w1"], params["cpb_b1"], params["cpb_w2"],
        window_size, nh).astype(jnp.float32)                # (nh, N, N)

    if mask is not None:
        nW = mask.shape[0]
        assert B_ % nW == 0
        bw = block_windows or _pick_block_windows(B_, nW)
        assert bw % nW == 0 and B_ % bw == 0
        mask_tiled = jnp.tile(mask.astype(jnp.float32), (bw // nW, 1, 1))  # (bw, N, N)
        bias_all = rel_bias[:, None, :, :] + mask_tiled[None, :, :, :]     # (nh, bw, N, N)
    else:
        bw = block_windows or _pick_block_windows(B_, 1)
        assert B_ % bw == 0
        bias_all = rel_bias[:, None, :, :]                                 # (nh, 1, N, N)

    num_blocks = B_ // bw

    # weights pre-transposed for x @ W^T and pre-cast for the MXU
    w_qkv = params["w_qkv"]                                 # (3C, C): [q; k; v]
    wq_t = w_qkv[0 * C:1 * C, :].T.astype(mxu_dtype)        # (C, C)
    wk_t = w_qkv[1 * C:2 * C, :].T.astype(mxu_dtype)
    wv_t = w_qkv[2 * C:3 * C, :].T.astype(mxu_dtype)
    wp_t = params["w_proj"].T.astype(mxu_dtype)             # (C, C)
    qb = params["q_bias"].astype(jnp.float32)[None, :]      # (1, C)
    vb = params["v_bias"].astype(jnp.float32)[None, :]
    pb = params["b_proj"].astype(jnp.float32)[None, :]
    scale = jnp.exp(jnp.minimum(params["logit_scale"], jnp.log(1.0 / 0.01)))
    scale = scale.reshape(nh, 1, 1).astype(jnp.float32)

    kernel = functools.partial(_window_attention_kernel,
                               num_heads=nh, head_dim=hd,
                               approx_recip=bool(approx_softmax))

    # rough VMEM budget: double-buffered x/out blocks + resident operands +
    # scratch + live intermediates, with headroom; clamp for v7x's smaller VMEM.
    w_isz = jnp.dtype(mxu_dtype).itemsize
    est = (4 * bw * N * C * 4
           + 4 * C * C * w_isz
           + int(np.prod(bias_all.shape)) * 4
           + (3 * nh * bw * N * hd + bw * N * C) * 4
           + (3 * bw * N * C + 3 * nh * bw * N * N + nh * bw * N * hd) * 4)
    vmem_limit = int(min(max(2 * est, 32 * 1024 * 1024), 96 * 1024 * 1024))

    out = pl.pallas_call(
        kernel,
        out_shape=jax.ShapeDtypeStruct((B_, N, C), x.dtype),
        grid_spec=pltpu.PrefetchScalarGridSpec(
            num_scalar_prefetch=0,
            grid=(num_blocks,),
            in_specs=[
                pl.BlockSpec((bw, N, C), lambda i: (i, 0, 0)),          # x block
                pl.BlockSpec((C, C), lambda i: (0, 0)),                 # Wq^T  (resident)
                pl.BlockSpec((C, C), lambda i: (0, 0)),                 # Wk^T  (resident)
                pl.BlockSpec((C, C), lambda i: (0, 0)),                 # Wv^T  (resident)
                pl.BlockSpec((1, C), lambda i: (0, 0)),                 # q bias
                pl.BlockSpec((1, C), lambda i: (0, 0)),                 # v bias
                pl.BlockSpec((nh, 1, 1), lambda i: (0, 0, 0)),          # logit scale
                pl.BlockSpec(bias_all.shape, lambda i: (0, 0, 0, 0)),   # rel-pos bias (+mask)
                pl.BlockSpec((C, C), lambda i: (0, 0)),                 # Wproj^T (resident)
                pl.BlockSpec((1, C), lambda i: (0, 0)),                 # proj bias
            ],
            out_specs=pl.BlockSpec((bw, N, C), lambda i: (i, 0, 0)),
            scratch_shapes=[
                pltpu.VMEM((nh, bw * N, hd), jnp.float32),   # q heads
                pltpu.VMEM((nh, bw * N, hd), jnp.float32),   # k heads
                pltpu.VMEM((nh, bw * N, hd), jnp.float32),   # v heads
                pltpu.VMEM((bw * N, C), jnp.float32),        # context assembly
            ],
        ),
        compiler_params=pltpu.CompilerParams(
            dimension_semantics=("parallel",),
            vmem_limit_bytes=vmem_limit),
    )(x, wq_t, wk_t, wv_t, qb, vb, scale, bias_all, wp_t, pb)
    # TODO(synk): attn_drop / proj_drop are identity at eval (p=0.0) and are omitted.
    return out


# ----------------------------------------------------------------------------- #
# Pure-JAX reference (mirrors the PyTorch forward) for validation.
# ----------------------------------------------------------------------------- #
def window_attention_ref(x, params, window_size, num_heads, mask=None):
    B_, N, C = x.shape
    hd = C // num_heads
    qkv_bias = jnp.concatenate(
        [params["q_bias"], jnp.zeros_like(params["v_bias"]), params["v_bias"]])
    qkv = x @ params["w_qkv"].T + qkv_bias
    qkv = qkv.reshape(B_, N, 3, num_heads, hd).transpose(2, 0, 3, 1, 4)
    q, k, v = qkv[0], qkv[1], qkv[2]                        # (B_, nh, N, hd)

    qn = q / jnp.maximum(jnp.linalg.norm(q, axis=-1, keepdims=True), 1e-12)
    kn = k / jnp.maximum(jnp.linalg.norm(k, axis=-1, keepdims=True), 1e-12)
    attn = jnp.einsum("bhnd,bhmd->bhnm", qn, kn)

    scale = jnp.exp(jnp.minimum(params["logit_scale"], jnp.log(1.0 / 0.01)))
    attn = attn * scale[None]

    rel_bias = compute_relative_position_bias(
        params["cpb_w1"], params["cpb_b1"], params["cpb_w2"], window_size, num_heads)
    attn = attn + rel_bias[None]
    if mask is not None:
        nW = mask.shape[0]
        attn = attn.reshape(B_ // nW, nW, num_heads, N, N) + mask[None, :, None]
        attn = attn.reshape(-1, num_heads, N, N)
    attn = jax.nn.softmax(attn, axis=-1)
    out = jnp.einsum("bhnm,bhmd->bhnd", attn, v).transpose(0, 2, 1, 3).reshape(B_, N, C)
    out = out @ params["w_proj"].T + params["b_proj"]
    return out


# ----------------------------------------------------------------------------- #
if __name__ == "__main__":
    dim = 32
    window_size = (4, 4)              # N = Wh*Ww = 16 tokens per window
    num_heads = 4
    batch, n_windows = 2, 4
    B_ = batch * n_windows            # 8 windows total
    N = window_size[0] * window_size[1]

    key = jax.random.PRNGKey(0)
    ks = jax.random.split(key, 10)

    params = {
        "w_qkv": 0.1 * jax.random.normal(ks[0], (3 * dim, dim), jnp.float32),
        "q_bias": 0.1 * jax.random.normal(ks[1], (dim,), jnp.float32),
        "v_bias": 0.1 * jax.random.normal(ks[2], (dim,), jnp.float32),
        "w_proj": 0.1 * jax.random.normal(ks[3], (dim, dim), jnp.float32),
        "b_proj": 0.1 * jax.random.normal(ks[4], (dim,), jnp.float32),
        "logit_scale": jnp.log(10.0 * jnp.ones((num_heads, 1, 1), jnp.float32)),
        "cpb_w1": 0.1 * jax.random.normal(ks[5], (512, 2), jnp.float32),
        "cpb_b1": 0.1 * jax.random.normal(ks[6], (512,), jnp.float32),
        "cpb_w2": 0.1 * jax.random.normal(ks[7], (num_heads, 512), jnp.float32),
    }

    x = jax.random.normal(ks[8], (B_, N, dim), jnp.float32)
    mask = jnp.where(jax.random.uniform(ks[9], (n_windows, N, N)) < 0.85,
                     0.0, -100.0).astype(jnp.float32)

    # ---- exact-precision path (f32 MXU operands, exact softmax divide) ----
    out = window_attention_pallas(x, params, window_size, num_heads, mask=None,
                                  mxu_dtype=jnp.float32, approx_softmax=False)
    out = jax.block_until_ready(out)
    ref = window_attention_ref(x, params, window_size, num_heads, mask=None)
    np.testing.assert_allclose(np.asarray(out), np.asarray(ref), rtol=2e-4, atol=2e-4)

    out_m = window_attention_pallas(x, params, window_size, num_heads, mask=mask,
                                    mxu_dtype=jnp.float32, approx_softmax=False)
    out_m = jax.block_until_ready(out_m)
    ref_m = window_attention_ref(x, params, window_size, num_heads, mask=mask)
    np.testing.assert_allclose(np.asarray(out_m), np.asarray(ref_m), rtol=2e-4, atol=2e-4)

    # ---- default fast path (bf16 MXU operands, EUP approx reciprocal) ----
    out_fast = window_attention_pallas(x, params, window_size, num_heads, mask=mask)
    out_fast = jax.block_until_ready(out_fast)
    np.testing.assert_allclose(np.asarray(out_fast), np.asarray(ref_m),
                               rtol=1e-1, atol=1e-1)

    assert out.shape == (B_, N, dim)
    print("KERNEL_OK")
</pallas_src>

<mosaic_0001>
module attributes {stable_mosaic.version = 11 : i64} {
  func.func @_window_attention_kernel(%arg0: i32, %arg1: memref<4x16x32xf32, #tpu.memory_space<vmem>>, %arg2: memref<32x32xf32, #tpu.memory_space<vmem>>, %arg3: memref<32x32xf32, #tpu.memory_space<vmem>>, %arg4: memref<32x32xf32, #tpu.memory_space<vmem>>, %arg5: memref<1x32xf32, #tpu.memory_space<vmem>>, %arg6: memref<1x32xf32, #tpu.memory_space<vmem>>, %arg7: memref<4x1x1xf32, #tpu.memory_space<vmem>>, %arg8: memref<4x1x16x16xf32, #tpu.memory_space<vmem>>, %arg9: memref<32x32xf32, #tpu.memory_space<vmem>>, %arg10: memref<1x32xf32, #tpu.memory_space<vmem>>, %arg11: memref<4x16x32xf32, #tpu.memory_space<vmem>>, %arg12: memref<4x64x8xf32, #tpu.memory_space<vmem>>, %arg13: memref<4x64x8xf32, #tpu.memory_space<vmem>>, %arg14: memref<4x64x8xf32, #tpu.memory_space<vmem>>, %arg15: memref<64x32xf32, #tpu.memory_space<vmem>>) attributes {dimension_semantics = [#tpu.dimension_semantics<parallel>], iteration_bounds = array<i64: 2>, scalar_prefetch = 0 : i64, scratch_operands = 4 : i64, tpu.core_type = #tpu.core_type<tc>, window_params = [{transform_indices = @transform_0, window_bounds = array<i64: 4, 16, 32>}, {pipeline_mode = #tpu.pipeline_mode<synchronous>, transform_indices = @transform_1, window_bounds = array<i64: 32, 32>}, {pipeline_mode = #tpu.pipeline_mode<synchronous>, transform_indices = @transform_2, window_bounds = array<i64: 32, 32>}, {pipeline_mode = #tpu.pipeline_mode<synchronous>, transform_indices = @transform_3, window_bounds = array<i64: 32, 32>}, {pipeline_mode = #tpu.pipeline_mode<synchronous>, transform_indices = @transform_4, window_bounds = array<i64: 1, 32>}, {pipeline_mode = #tpu.pipeline_mode<synchronous>, transform_indices = @transform_5, window_bounds = array<i64: 1, 32>}, {pipeline_mode = #tpu.pipeline_mode<synchronous>, transform_indices = @transform_6, window_bounds = array<i64: 4, 1, 1>}, {pipeline_mode = #tpu.pipeline_mode<synchronous>, transform_indices = @transform_7, window_bounds = array<i64: 4, 1, 16, 16>}, {pipeline_mode = #tpu.pipeline_mode<synchronous>, transform_indices = @transform_8, window_bounds = array<i64: 32, 32>}, {pipeline_mode = #tpu.pipeline_mode<synchronous>, transform_indices = @transform_9, window_bounds = array<i64: 1, 32>}, {transform_indices = @transform_10, window_bounds = array<i64: 4, 16, 32>}]} {
    %c0 = arith.constant 0 : index
    %c0_0 = arith.constant 0 : index
    %c0_1 = arith.constant 0 : index
    %0 = vector.load %arg1[%c0, %c0_0, %c0_1] : memref<4x16x32xf32, #tpu.memory_space<vmem>>, vector<4x16x32xf32>
    %1 = vector.shape_cast %0 : vector<4x16x32xf32> to vector<64x32xf32>
    %c0_2 = arith.constant 0 : index
    %c0_3 = arith.constant 0 : index
    %2 = vector.load %arg2[%c0_2, %c0_3] : memref<32x32xf32, #tpu.memory_space<vmem>>, vector<32x32xf32>
    %cst = arith.constant dense<0.000000e+00> : vector<64x32xf32>
    %3 = tpu.matmul %1, %2, %cst {dimension_numbers = #tpu.dot_dimension_numbers<[1], [0], [0], [1], [0, 0, 1, 1], [], []>} : vector<64x32xf32>, vector<32x32xf32>, vector<64x32xf32> -> vector<64x32xf32>
    %c0_4 = arith.constant 0 : index
    %c0_5 = arith.constant 0 : index
    %4 = vector.load %arg5[%c0_4, %c0_5] : memref<1x32xf32, #tpu.memory_space<vmem>>, vector<1x32xf32>
    %5 = vector.broadcast %4 : vector<1x32xf32> to vector<64x32xf32>
    %6 = arith.addf %3, %5 : vector<64x32xf32>
    %c0_6 = arith.constant 0 : index
    %c0_7 = arith.constant 0 : index
    %7 = vector.load %arg3[%c0_6, %c0_7] : memref<32x32xf32, #tpu.memory_space<vmem>>, vector<32x32xf32>
    %cst_8 = arith.constant dense<0.000000e+00> : vector<64x32xf32>
    %8 = tpu.matmul %1, %7, %cst_8 {dimension_numbers = #tpu.dot_dimension_numbers<[1], [0], [0], [1], [0, 0, 1, 1], [], []>} : vector<64x32xf32>, vector<32x32xf32>, vector<64x32xf32> -> vector<64x32xf32>
    %c0_9 = arith.constant 0 : index
    %c0_10 = arith.constant 0 : index
    %9 = vector.load %arg4[%c0_9, %c0_10] : memref<32x32xf32, #tpu.memory_space<vmem>>, vector<32x32xf32>
    %cst_11 = arith.constant dense<0.000000e+00> : vector<64x32xf32>
    %10 = tpu.matmul %1, %9, %cst_11 {dimension_numbers = #tpu.dot_dimension_numbers<[1], [0], [0], [1], [0, 0, 1, 1], [], []>} : vector<64x32xf32>, vector<32x32xf32>, vector<64x32xf32> -> vector<64x32xf32>
    %c0_12 = arith.constant 0 : index
    %c0_13 = arith.constant 0 : index
    %11 = vector.load %arg6[%c0_12, %c0_13] : memref<1x32xf32, #tpu.memory_space<vmem>>, vector<1x32xf32>
    %12 = vector.broadcast %11 : vector<1x32xf32> to vector<64x32xf32>
    %13 = arith.addf %10, %12 : vector<64x32xf32>
    %14 = vector.extract_strided_slice %6 {offsets = [0, 0], sizes = [64, 8], strides = [1, 1]} : vector<64x32xf32> to vector<64x8xf32>
    %c0_14 = arith.constant 0 : index
    %c0_15 = arith.constant 0 : index
    %c0_16 = arith.constant 0 : index
    %15 = vector.load %arg12[%c0_14, %c0_15, %c0_16] : memref<4x64x8xf32, #tpu.memory_space<vmem>>, vector<1x64x8xf32>
    %16 = vector.shape_cast %15 : vector<1x64x8xf32> to vector<64x8xf32>
    %17 = vector.shape_cast %14 : vector<64x8xf32> to vector<1x64x8xf32>
    tpu.vector_store %arg12[%c0_14, %c0_15, %c0_16], %17 {strides = array<i32>} : memref<4x64x8xf32, #tpu.memory_space<vmem>>, vector<1x64x8xf32>,
    %18 = vector.extract_strided_slice %8 {offsets = [0, 0], sizes = [64, 8], strides = [1, 1]} : vector<64x32xf32> to vector<64x8xf32>
    %c0_17 = arith.constant 0 : index
    %c0_18 = arith.constant 0 : index
    %c0_19 = arith.constant 0 : index
    %19 = vector.load %arg13[%c0_17, %c0_18, %c0_19] : memref<4x64x8xf32, #tpu.memory_space<vmem>>, vector<1x64x8xf32>
    %20 = vector.shape_cast %19 : vector<1x64x8xf32> to vector<64x8xf32>
    %21 = vector.shape_cast %18 : vector<64x8xf32> to vector<1x64x8xf32>
    tpu.vector_store %arg13[%c0_17, %c0_18, %c0_19], %21 {strides = array<i32>} : memref<4x64x8xf32, #tpu.memory_space<vmem>>, vector<1x64x8xf32>,
    %22 = vector.extract_strided_slice %13 {offsets = [0, 0], sizes = [64, 8], strides = [1, 1]} : vector<64x32xf32> to vector<64x8xf32>
    %c0_20 = arith.constant 0 : index
    %c0_21 = arith.constant 0 : index
    %c0_22 = arith.constant 0 : index
    %23 = vector.load %arg14[%c0_20, %c0_21, %c0_22] : memref<4x64x8xf32, #tpu.memory_space<vmem>>, vector<1x64x8xf32>
    %24 = vector.shape_cast %23 : vector<1x64x8xf32> to vector<64x8xf32>
    %25 = vector.shape_cast %22 : vector<64x8xf32> to vector<1x64x8xf32>
    tpu.vector_store %arg14[%c0_20, %c0_21, %c0_22], %25 {strides = array<i32>} : memref<4x64x8xf32, #tpu.memory_space<vmem>>, vector<1x64x8xf32>,
    %26 = vector.extract_strided_slice %6 {offsets = [0, 8], sizes = [64, 8], strides = [1, 1]} : vector<64x32xf32> to vector<64x8xf32>
    %c1 = arith.constant 1 : index
    %c0_23 = arith.constant 0 : index
    %c0_24 = arith.constant 0 : index
    %27 = vector.load %arg12[%c1, %c0_23, %c0_24] : memref<4x64x8xf32, #tpu.memory_space<vmem>>, vector<1x64x8xf32>
    %28 = vector.shape_cast %27 : vector<1x64x8xf32> to vector<64x8xf32>
    %29 = vector.shape_cast %26 : vector<64x8xf32> to vector<1x64x8xf32>
    tpu.vector_store %arg12[%c1, %c0_23, %c0_24], %29 {strides = array<i32>} : memref<4x64x8xf32, #tpu.memory_space<vmem>>, vector<1x64x8xf32>,
    %30 = vector.extract_strided_slice %8 {offsets = [0, 8], sizes = [64, 8], strides = [1, 1]} : vector<64x32xf32> to vector<64x8xf32>
    %c1_25 = arith.constant 1 : index
    %c0_26 = arith.constant 0 : index
    %c0_27 = arith.constant 0 : index
    %31 = vector.load %arg13[%c1_25, %c0_26, %c0_27] : memref<4x64x8xf32, #tpu.memory_space<vmem>>, vector<1x64x8xf32>
    %32 = vector.shape_cast %31 : vector<1x64x8xf32> to vector<64x8xf32>
    %33 = vector.shape_cast %30 : vector<64x8xf32> to vector<1x64x8xf32>
    tpu.vector_store %arg13[%c1_25, %c0_26, %c0_27], %33 {strides = array<i32>} : memref<4x64x8xf32, #tpu.memory_space<vmem>>, vector<1x64x8xf32>,
    %34 = vector.extract_strided_slice %13 {offsets = [0, 8], sizes = [64, 8], strides = [1, 1]} : vector<64x32xf32> to vector<64x8xf32>
    %c1_28 = arith.constant 1 : index
    %c0_29 = arith.constant 0 : index
    %c0_30 = arith.constant 0 : index
    %35 = vector.load %arg14[%c1_28, %c0_29, %c0_30] : memref<4x64x8xf32, #tpu.memory_space<vmem>>, vector<1x64x8xf32>
    %36 = vector.shape_cast %35 : vector<1x64x8xf32> to vector<64x8xf32>
    %37 = vector.shape_cast %34 : vector<64x8xf32> to vector<1x64x8xf32>
    tpu.vector_store %arg14[%c1_28, %c0_29, %c0_30], %37 {strides = array<i32>} : memref<4x64x8xf32, #tpu.memory_space<vmem>>, vector<1x64x8xf32>,
    %38 = vector.extract_strided_slice %6 {offsets = [0, 16], sizes = [64, 8], strides = [1, 1]} : vector<64x32xf32> to vector<64x8xf32>
    %c2 = arith.constant 2 : index
    %c0_31 = arith.constant 0 : index
    %c0_32 = arith.constant 0 : index
    %39 = vector.load %arg12[%c2, %c0_31, %c0_32] : memref<4x64x8xf32, #tpu.memory_space<vmem>>, vector<1x64x8xf32>
    %40 = vector.shape_cast %39 : vector<1x64x8xf32> to vector<64x8xf32>
    %41 = vector.shape_cast %38 : vector<64x8xf32> to vector<1x64x8xf32>
    tpu.vector_store %arg12[%c2, %c0_31, %c0_32], %41 {strides = array<i32>} : memref<4x64x8xf32, #tpu.memory_space<vmem>>, vector<1x64x8xf32>,
    %42 = vector.extract_strided_slice %8 {offsets = [0, 16], sizes = [64, 8], strides = [1, 1]} : vector<64x32xf32> to vector<64x8xf32>
    %c2_33 = arith.constant 2 : index
    %c0_34 = arith.constant 0 : index
    %c0_35 = arith.constant 0 : index
    %43 = vector.load %arg13[%c2_33, %c0_34, %c0_35] : memref<4x64x8xf32, #tpu.memory_space<vmem>>, vector<1x64x8xf32>
    %44 = vector.shape_cast %43 : vector<1x64x8xf32> to vector<64x8xf32>
    %45 = vector.shape_cast %42 : vector<64x8xf32> to vector<1x64x8xf32>
    tpu.vector_store %arg13[%c2_33, %c0_34, %c0_35], %45 {strides = array<i32>} : memref<4x64x8xf32, #tpu.memory_space<vmem>>, vector<1x64x8xf32>,
    %46 = vector.extract_strided_slice %13 {offsets = [0, 16], sizes = [64, 8], strides = [1, 1]} : vector<64x32xf32> to vector<64x8xf32>
    %c2_36 = arith.constant 2 : index
    %c0_37 = arith.constant 0 : index
    %c0_38 = arith.constant 0 : index
    %47 = vector.load %arg14[%c2_36, %c0_37, %c0_38] : memref<4x64x8xf32, #tpu.memory_space<vmem>>, vector<1x64x8xf32>
    %48 = vector.shape_cast %47 : vector<1x64x8xf32> to vector<64x8xf32>
    %49 = vector.shape_cast %46 : vector<64x8xf32> to vector<1x64x8xf32>
    tpu.vector_store %arg14[%c2_36, %c0_37, %c0_38], %49 {strides = array<i32>} : memref<4x64x8xf32, #tpu.memory_space<vmem>>, vector<1x64x8xf32>,
    %50 = vector.extract_strided_slice %6 {offsets = [0, 24], sizes = [64, 8], strides = [1, 1]} : vector<64x32xf32> to vector<64x8xf32>
    %c3 = arith.constant 3 : index
    %c0_39 = arith.constant 0 : index
    %c0_40 = arith.constant 0 : index
    %51 = vector.load %arg12[%c3, %c0_39, %c0_40] : memref<4x64x8xf32, #tpu.memory_space<vmem>>, vector<1x64x8xf32>
    %52 = vector.shape_cast %51 : vector<1x64x8xf32> to vector<64x8xf32>
    %53 = vector.shape_cast %50 : vector<64x8xf32> to vector<1x64x8xf32>
    tpu.vector_store %arg12[%c3, %c0_39, %c0_40], %53 {strides = array<i32>} : memref<4x64x8xf32, #tpu.memory_space<vmem>>, vector<1x64x8xf32>,
    %54 = vector.extract_strided_slice %8 {offsets = [0, 24], sizes = [64, 8], strides = [1, 1]} : vector<64x32xf32> to vector<64x8xf32>
    %c3_41 = arith.constant 3 : index
    %c0_42 = arith.constant 0 : index
    %c0_43 = arith.constant 0 : index
    %55 = vector.load %arg13[%c3_41, %c0_42, %c0_43] : memref<4x64x8xf32, #tpu.memory_space<vmem>>, vector<1x64x8xf32>
    %56 = vector.shape_cast %55 : vector<1x64x8xf32> to vector<64x8xf32>
    %57 = vector.shape_cast %54 : vector<64x8xf32> to vector<1x64x8xf32>
    tpu.vector_store %arg13[%c3_41, %c0_42, %c0_43], %57 {strides = array<i32>} : memref<4x64x8xf32, #tpu.memory_space<vmem>>, vector<1x64x8xf32>,
    %58 = vector.extract_strided_slice %13 {offsets = [0, 24], sizes = [64, 8], strides = [1, 1]} : vector<64x32xf32> to vector<64x8xf32>
    %c3_44 = arith.constant 3 : index
    %c0_45 = arith.constant 0 : index
    %c0_46 = arith.constant 0 : index
    %59 = vector.load %arg14[%c3_44, %c0_45, %c0_46] : memref<4x64x8xf32, #tpu.memory_space<vmem>>, vector<1x64x8xf32>
    %60 = vector.shape_cast %59 : vector<1x64x8xf32> to vector<64x8xf32>
    %61 = vector.shape_cast %58 : vector<64x8xf32> to vector<1x64x8xf32>
    tpu.vector_store %arg14[%c3_44, %c0_45, %c0_46], %61 {strides = array<i32>} : memref<4x64x8xf32, #tpu.memory_space<vmem>>, vector<1x64x8xf32>,
    %c0_47 = arith.constant 0 : index
    %c0_48 = arith.constant 0 : index
    %c0_49 = arith.constant 0 : index
    %62 = vector.load %arg12[%c0_47, %c0_48, %c0_49] : memref<4x64x8xf32, #tpu.memory_space<vmem>>, vector<4x64x8xf32>
    %c0_50 = arith.constant 0 : index
    %c0_51 = arith.constant 0 : index
    %c0_52 = arith.constant 0 : index
    %63 = vector.load %arg13[%c0_50, %c0_51, %c0_52] : memref<4x64x8xf32, #tpu.memory_space<vmem>>, vector<4x64x8xf32>
    %c0_53 = arith.constant 0 : index
    %c0_54 = arith.constant 0 : index
    %c0_55 = arith.constant 0 : index
    %64 = vector.load %arg14[%c0_53, %c0_54, %c0_55] : memref<4x64x8xf32, #tpu.memory_space<vmem>>, vector<4x64x8xf32>
    %65 = arith.mulf %62, %62 : vector<4x64x8xf32>
    %cst_56 = arith.constant dense<0.000000e+00> : vector<4x64xf32>
    %66 = vector.multi_reduction <add>, %65, %cst_56 [2] : vector<4x64x8xf32> to vector<4x64xf32>
    %67 = vector.shape_cast %66 : vector<4x64xf32> to vector<4x64x1xf32>
    %cst_57 = arith.constant 1.000000e-24 : f32
    %68 = vector.broadcast %cst_57 : f32 to vector<4x64x1xf32>
    %69 = arith.maximumf %67, %68 : vector<4x64x1xf32>
    %70 = math.rsqrt %69 : vector<4x64x1xf32>
    %71 = vector.broadcast %70 : vector<4x64x1xf32> to vector<4x64x8xf32>
    %72 = arith.mulf %62, %71 : vector<4x64x8xf32>
    %73 = arith.mulf %63, %63 : vector<4x64x8xf32>
    %cst_58 = arith.constant dense<0.000000e+00> : vector<4x64xf32>
    %74 = vector.multi_reduction <add>, %73, %cst_58 [2] : vector<4x64x8xf32> to vector<4x64xf32>
    %75 = vector.shape_cast %74 : vector<4x64xf32> to vector<4x64x1xf32>
    %cst_59 = arith.constant 1.000000e-24 : f32
    %76 = vector.broadcast %cst_59 : f32 to vector<4x64x1xf32>
    %77 = arith.maximumf %75, %76 : vector<4x64x1xf32>
    %78 = math.rsqrt %77 : vector<4x64x1xf32>
    %79 = vector.broadcast %78 : vector<4x64x1xf32> to vector<4x64x8xf32>
    %80 = arith.mulf %63, %79 : vector<4x64x8xf32>
    %c0_60 = arith.constant 0 : index
    %c0_61 = arith.constant 0 : index
    %c0_62 = arith.constant 0 : index
    %81 = vector.load %arg7[%c0_60, %c0_61, %c0_62] : memref<4x1x1xf32, #tpu.memory_space<vmem>>, vector<4x1x1xf32>
    %82 = vector.broadcast %81 : vector<4x1x1xf32> to vector<4x64x8xf32>
    %83 = arith.mulf %72, %82 : vector<4x64x8xf32>
    %84 = vector.shape_cast %83 : vector<4x64x8xf32> to vector<16x16x8xf32>
    %85 = vector.shape_cast %80 : vector<4x64x8xf32> to vector<16x16x8xf32>
    %86 = vector.shape_cast %64 : vector<4x64x8xf32> to vector<16x16x8xf32>
    "tpu.trace_start"() <{level = 10 : i32, message = "bqd,bkd->bqk"}> : () -> ()
    %cst_63 = arith.constant dense<0.000000e+00> : vector<16x16x16xf32>
    %87 = tpu.matmul %84, %85, %cst_63 {dimension_numbers = #tpu.dot_dimension_numbers<[2], [2], [1], [1], [0, 0, 0, 1, 1, 1], [0], [0]>} : vector<16x16x8xf32>, vector<16x16x8xf32>, vector<16x16x16xf32> -> vector<16x16x16xf32>
    "tpu.trace_stop"() : () -> ()
    %88 = vector.shape_cast %87 : vector<16x16x16xf32> to vector<4x4x16x16xf32>
    %c0_64 = arith.constant 0 : index
    %c0_65 = arith.constant 0 : index
    %c0_66 = arith.constant 0 : index
    %c0_67 = arith.constant 0 : index
    %89 = vector.load %arg8[%c0_64, %c0_65, %c0_66, %c0_67] : memref<4x1x16x16xf32, #tpu.memory_space<vmem>>, vector<4x1x16x16xf32>
    %90 = vector.broadcast %89 : vector<4x1x16x16xf32> to vector<4x4x16x16xf32>
    %91 = arith.addf %88, %90 : vector<4x4x16x16xf32>
    %cst_68 = arith.constant dense<0xFF800000> : vector<4x4x16xf32>
    %92 = vector.multi_reduction <maximumf>, %91, %cst_68 [3] : vector<4x4x16x16xf32> to vector<4x4x16xf32>
    %93 = vector.shape_cast %92 : vector<4x4x16xf32> to vector<4x4x16x1xf32>
    %94 = vector.broadcast %93 : vector<4x4x16x1xf32> to vector<4x4x16x16xf32>
    %95 = arith.subf %91, %94 : vector<4x4x16x16xf32>
    %96 = math.exp %95 : vector<4x4x16x16xf32>
    %cst_69 = arith.constant dense<0.000000e+00> : vector<4x4x16xf32>
    %97 = vector.multi_reduction <add>, %96, %cst_69 [3] : vector<4x4x16x16xf32> to vector<4x4x16xf32>
    %98 = vector.shape_cast %97 : vector<4x4x16xf32> to vector<4x4x16x1xf32>
    %99 = tpu.reciprocal %98 : vector<4x4x16x1xf32> -> vector<4x4x16x1xf32>
    %100 = vector.broadcast %99 : vector<4x4x16x1xf32> to vector<4x4x16x16xf32>
    %101 = arith.mulf %96, %100 : vector<4x4x16x16xf32>
    %102 = vector.shape_cast %101 : vector<4x4x16x16xf32> to vector<16x16x16xf32>
    "tpu.trace_start"() <{level = 10 : i32, message = "bqk,bkd->bqd"}> : () -> ()
    %cst_70 = arith.constant dense<0.000000e+00> : vector<16x16x8xf32>
    %103 = tpu.matmul %102, %86, %cst_70 {dimension_numbers = #tpu.dot_dimension_numbers<[2], [1], [1], [2], [0, 0, 0, 1, 1, 2], [0], [0]>} : vector<16x16x16xf32>, vector<16x16x8xf32>, vector<16x16x8xf32> -> vector<16x16x8xf32>
    "tpu.trace_stop"() : () -> ()
    %104 = vector.shape_cast %103 : vector<16x16x8xf32> to vector<4x64x8xf32>
    %105 = vector.extract_strided_slice %104 {offsets = [0, 0, 0], sizes = [1, 64, 8], strides = [1, 1, 1]} : vector<4x64x8xf32> to vector<1x64x8xf32>
    %106 = vector.shape_cast %105 : vector<1x64x8xf32> to vector<64x8xf32>
    %c0_71 = arith.constant 0 : index
    %c0_72 = arith.constant 0 : index
    %107 = vector.load %arg15[%c0_71, %c0_72] : memref<64x32xf32, #tpu.memory_space<vmem>>, vector<64x8xf32>
    tpu.vector_store %arg15[%c0_71, %c0_72], %106 {strides = array<i32>} : memref<64x32xf32, #tpu.memory_space<vmem>>, vector<64x8xf32>,
    %108 = vector.extract_strided_slice %104 {offsets = [1, 0, 0], sizes = [1, 64, 8], strides = [1, 1, 1]} : vector<4x64x8xf32> to vector<1x64x8xf32>
    %109 = vector.shape_cast %108 : vector<1x64x8xf32> to vector<64x8xf32>
    %c0_73 = arith.constant 0 : index
    %c8 = arith.constant 8 : index
    %110 = vector.load %arg15[%c0_73, %c8] : memref<64x32xf32, #tpu.memory_space<vmem>>, vector<64x8xf32>
    tpu.vector_store %arg15[%c0_73, %c8], %109 {strides = array<i32>} : memref<64x32xf32, #tpu.memory_space<vmem>>, vector<64x8xf32>,
    %111 = vector.extract_strided_slice %104 {offsets = [2, 0, 0], sizes = [1, 64, 8], strides = [1, 1, 1]} : vector<4x64x8xf32> to vector<1x64x8xf32>
    %112 = vector.shape_cast %111 : vector<1x64x8xf32> to vector<64x8xf32>
    %c0_74 = arith.constant 0 : index
    %c16 = arith.constant 16 : index
    %113 = vector.load %arg15[%c0_74, %c16] : memref<64x32xf32, #tpu.memory_space<vmem>>, vector<64x8xf32>
    tpu.vector_store %arg15[%c0_74, %c16], %112 {strides = array<i32>} : memref<64x32xf32, #tpu.memory_space<vmem>>, vector<64x8xf32>,
    %114 = vector.extract_strided_slice %104 {offsets = [3, 0, 0], sizes = [1, 64, 8], strides = [1, 1, 1]} : vector<4x64x8xf32> to vector<1x64x8xf32>
    %115 = vector.shape_cast %114 : vector<1x64x8xf32> to vector<64x8xf32>
    %c0_75 = arith.constant 0 : index
    %c24 = arith.constant 24 : index
    %116 = vector.load %arg15[%c0_75, %c24] : memref<64x32xf32, #tpu.memory_space<vmem>>, vector<64x8xf32>
    tpu.vector_store %arg15[%c0_75, %c24], %115 {strides = array<i32>} : memref<64x32xf32, #tpu.memory_space<vmem>>, vector<64x8xf32>,
    %c0_76 = arith.constant 0 : index
    %c0_77 = arith.constant 0 : index
    %117 = vector.load %arg15[%c0_76, %c0_77] : memref<64x32xf32, #tpu.memory_space<vmem>>, vector<64x32xf32>
    %c0_78 = arith.constant 0 : index
    %c0_79 = arith.constant 0 : index
    %118 = vector.load %arg9[%c0_78, %c0_79] : memref<32x32xf32, #tpu.memory_space<vmem>>, vector<32x32xf32>
    %cst_80 = arith.constant dense<0.000000e+00> : vector<64x32xf32>
    %119 = tpu.matmul %117, %118, %cst_80 {dimension_numbers = #tpu.dot_dimension_numbers<[1], [0], [0], [1], [0, 0, 1, 1], [], []>} : vector<64x32xf32>, vector<32x32xf32>, vector<64x32xf32> -> vector<64x32xf32>
    %c0_81 = arith.constant 0 : index
    %c0_82 = arith.constant 0 : index
    %120 = vector.load %arg10[%c0_81, %c0_82] : memref<1x32xf32, #tpu.memory_space<vmem>>, vector<1x32xf32>
    %121 = vector.broadcast %120 : vector<1x32xf32> to vector<64x32xf32>
    %122 = arith.addf %119, %121 : vector<64x32xf32>
    %123 = vector.shape_cast %122 : vector<64x32xf32> to vector<4x16x32xf32>
    %c0_83 = arith.constant 0 : index
    %c0_84 = arith.constant 0 : index
    %c0_85 = arith.constant 0 : index
    %124 = vector.load %arg11[%c0_83, %c0_84, %c0_85] : memref<4x16x32xf32, #tpu.memory_space<vmem>>, vector<4x16x32xf32>
    tpu.vector_store %arg11[%c0_83, %c0_84, %c0_85], %123 {strides = array<i32>} : memref<4x16x32xf32, #tpu.memory_space<vmem>>, vector<4x16x32xf32>,
    return
  }
  func.func @transform_0(%arg0: i32) -> (i32, i32, i32) {
    %c0_i32 = arith.constant 0 : i32
    %c0_i32_0 = arith.constant 0 : i32
    %c0_i32_1 = arith.constant 0 : i32
    return %arg0, %c0_i32, %c0_i32_0 : i32, i32, i32
  }
  func.func @transform_1(%arg0: i32) -> (i32, i32) {
    %c0_i32 = arith.constant 0 : i32
    %c0_i32_0 = arith.constant 0 : i32
    %c0_i32_1 = arith.constant 0 : i32
    return %c0_i32, %c0_i32_0 : i32, i32
  }
  func.func @transform_2(%arg0: i32) -> (i32, i32) {
    %c0_i32 = arith.constant 0 : i32
    %c0_i32_0 = arith.constant 0 : i32
    %c0_i32_1 = arith.constant 0 : i32
    return %c0_i32, %c0_i32_0 : i32, i32
  }
  func.func @transform_3(%arg0: i32) -> (i32, i32) {
    %c0_i32 = arith.constant 0 : i32
    %c0_i32_0 = arith.constant 0 : i32
    %c0_i32_1 = arith.constant 0 : i32
    return %c0_i32, %c0_i32_0 : i32, i32
  }
  func.func @transform_4(%arg0: i32) -> (i32, i32) {
    %c0_i32 = arith.constant 0 : i32
    %c0_i32_0 = arith.constant 0 : i32
    %c0_i32_1 = arith.constant 0 : i32
    return %c0_i32, %c0_i32_0 : i32, i32
  }
  func.func @transform_5(%arg0: i32) -> (i32, i32) {
    %c0_i32 = arith.constant 0 : i32
    %c0_i32_0 = arith.constant 0 : i32
    %c0_i32_1 = arith.constant 0 : i32
    return %c0_i32, %c0_i32_0 : i32, i32
  }
  func.func @transform_6(%arg0: i32) -> (i32, i32, i32) {
    %c0_i32 = arith.constant 0 : i32
    %c0_i32_0 = arith.constant 0 : i32
    %c0_i32_1 = arith.constant 0 : i32
    %c0_i32_2 = arith.constant 0 : i32
    return %c0_i32, %c0_i32_0, %c0_i32_1 : i32, i32, i32
  }
  func.func @transform_7(%arg0: i32) -> (i32, i32, i32, i32) {
    %c0_i32 = arith.constant 0 : i32
    %c0_i32_0 = arith.constant 0 : i32
    %c0_i32_1 = arith.constant 0 : i32
    %c0_i32_2 = arith.constant 0 : i32
    %c0_i32_3 = arith.constant 0 : i32
    return %c0_i32, %c0_i32_0, %c0_i32_1, %c0_i32_2 : i32, i32, i32, i32
  }
  func.func @transform_8(%arg0: i32) -> (i32, i32) {
    %c0_i32 = arith.constant 0 : i32
    %c0_i32_0 = arith.constant 0 : i32
    %c0_i32_1 = arith.constant 0 : i32
    return %c0_i32, %c0_i32_0 : i32, i32
  }
  func.func @transform_9(%arg0: i32) -> (i32, i32) {
    %c0_i32 = arith.constant 0 : i32
    %c0_i32_0 = arith.constant 0 : i32
    %c0_i32_1 = arith.constant 0 : i32
    return %c0_i32, %c0_i32_0 : i32, i32
  }
  func.func @transform_10(%arg0: i32) -> (i32, i32, i32) {
    %c0_i32 = arith.constant 0 : i32
    %c0_i32_0 = arith.constant 0 : i32
    %c0_i32_1 = arith.constant 0 : i32
    return %arg0, %c0_i32, %c0_i32_0 : i32, i32, i32
  }
}

</mosaic_0001>

<bundles_post_ra>
// kernel: tpu_custom_call.1
= control target key start
LH: loop header
LB: loop body
LE: loop exit
PB: predicated region body
PF: predicated region fallthrough
CT: control target
= control target key end

     0   :  { %s8223_s0 = inlined_call_operand.hbm [shape: f32[8,16,32], index: 0, kind: input, shape index: {}]   ;;  %s8224_s1 = inlined_call_operand.hbm [shape: f32[32,32], index: 1, kind: input, shape index: {}]   ;;  %s8225_s2 = inlined_call_operand.hbm [shape: f32[32,32], index: 2, kind: input, shape index: {}]   ;;  %s8226_s3 = inlined_call_operand.hbm [shape: f32[32,32], index: 3, kind: input, shape index: {}]   ;;  %s8227_s4 = inlined_call_operand.vmem [shape: f32[1,32], index: 4, kind: input, shape index: {}]   ;;  %s8228_s5 = inlined_call_operand.vmem [shape: f32[1,32], index: 5, kind: input, shape index: {}]   ;;  %s8229_s6 = inlined_call_operand.vmem [shape: f32[4,1,1], index: 6, kind: input, shape index: {}]   ;;  %s8230_s7 = inlined_call_operand.hbm [shape: f32[4,1,16,16], index: 7, kind: input, shape index: {}]   ;;  %s8231_s8 = inlined_call_operand.hbm [shape: f32[32,32], index: 8, kind: input, shape index: {}]   ;;  %s8232_s9 = inlined_call_operand.vmem [shape: f32[1,32], index: 9, kind: input, shape index: {}]   ;;  %s8233_s10 = inlined_call_operand.hbm [shape: f32[8,16,32], index: 10, kind: output, shape index: {}]  }
   0x1   :  { %8246 = sst [smem:[#allocation29_spill]] %s8224_s1 }
   0x2   :  { %8247 = sst [smem:[#allocation30_spill]] %s8225_s2 }
   0x3   :  { %8248 = sst [smem:[#allocation31_spill]] %s8226_s3 }
   0x4   :  { %8249 = sst [smem:[#allocation32_spill]] %s8230_s7 }
   0x5   :  { %15 = vsyncpa [#allocation7], 0 }
   0x6   :  { %17 = vsyncpa [#allocation7 + $0x1], 0 }
   0x7   :  { %18 = vsyncpa [#allocation10], 0 }
   0x8   :  { %19 = vsyncpa [#allocation13], 0 }
   0x9   :  { %20 = vsyncpa [#allocation16], 0 }
   0xa   :  { %21 = vsyncpa [#allocation8], 0 }
   0xb   :  { %23 = vsyncpa [#allocation8 + $0x1], 0  ;;  %s6635_s13 = smov 0   ;;  %s6637_s14 = smov 0  }
   0xc   :  { %s6639_s15 = smov 0   ;;  %s6641_s16 = smov 0  }
   0xd LB: > { %s6563_s17 = smov [#allocation9]   ;;  %s6656_s19 = sadd.s32 4294967295, %s6561_s16   ;;  %s6561_s16 = sphi %s6641_s16, %s8289_s16   ;;  %s6557_s15 = sphi %s6639_s15, %s8288_s15   ;;  %s6553_s14 = sphi %s6637_s14, %s8287_s14   ;;  %s6549_s13 = sphi %s6635_s13, %s8286_s13  }
   0xe   : > { %s287_s18 = sshll.u32 %s6563_s17, 4  ;;  %p5295_p0 = scmp.ge.s32.totalorder %s6561_s16, 1  ;;  %s288_s18 = int_to_ptr.vmem [resolvable:$true] %s287_s18 }
   0xf   : > { %p8236_p1 = scmp.eq.s32.totalorder %s6656_s19, 0  ;;  %p275_p2 = scmp.lt.s32.totalorder %s6561_s16, 3 }
  0x10   : > { %s6564_s21 = smov [#allocation12]   ;;  %s6565_s24 = smov [#allocation11]  }
  0x11   : > { %p6661_p3 = pnand %p5295_p0, %p275_p2  ;;  %s313_s22 = sshll.u32 %s6564_s21, 4  ;;  %s6674_s22 = int_to_ptr.vmem [resolvable:$true] %s313_s22 }
  0x12   : > { %s300_s25 = sshll.u32 %s6565_s24, 4  ;;  %s6338_s27 = scalar_lea.vmem %s288_s18, 512  ;;  %s6676_s25 = int_to_ptr.vmem [resolvable:$true] %s300_s25 }
  0x13   : > { %s8250_s20 = scalar_select %p6661_p3, 1, 0 }
  0x14   : > { %p5971_p5 = pneg %p6661_p3  ;;  %p6339_p8 = scmp.ne.s32.totalorder %s288_s18, %s6338_s27 }
  0x15   : > { %p6346_p11 = scmp.lt.s32.totalorder %s288_s18, %s288_s18  ;;  %p6347_p12 = scmp.lt.s32.totalorder %s6338_s27, %s6338_s27 }
  0x16   : > { %p6670_p6 = pnand %p5971_p5, %p8236_p1 }
  0x17   : > { %p6348_p13 = por %p6347_p12, %p6346_p11 }
  0x18   : > { %p6680_p7 = pneg %p6670_p6 }
  0x1a   : > { %p6341_p9 = pnand %p6339_p8, %p6680_p7 }
  0x1c   : > { %p6342_p10 = pneg %p6341_p9 }
  0x1e   : > { %p6349_p0 = pnand %p6348_p13, %p6342_p10 }
  0x20   : > { %6352 = shalt.err (!%p6349_p0)
}
  0x21   : > { %s8234_s28 = smov 128   ;;  %s8235_s29 = smov 8  }
  0x22   : > { %s8253_s1 = sld [smem:[#allocation29_spill]]  ;;  %s6364_s12 = scalar_lea.vmem %s6674_s22, 512 }
  0x23   : > { %p6365_p2 = scmp.ne.s32.totalorder %s6674_s22, %s6364_s12  ;;  %p6372_p9 = scmp.lt.s32.totalorder %s6674_s22, %s6674_s22 }
  0x24   : > { %p6373_p10 = scmp.lt.s32.totalorder %s6364_s12, %s6364_s12 }
  0x25   : > { %p6367_p5 = pnand %p6365_p2, %p6680_p7 }
  0x26   : > { %p6374_p11 = por %p6373_p10, %p6372_p9 }
  0x27   : > { %p6368_p8 = pneg %p6367_p5 }
  0x28   : > { %5974 = dma.hbm_to_vmem [thread:$0]  (!%p6670_p6), %s8253_s1, 512, %s288_s18, [#allocation10], %s8234_s28, %s8234_s28, %s8235_s29  }
  0x29   : > { %p6375_p12 = pnand %p6374_p11, %p6368_p8 }
  0x2b   : > { %6378 = shalt.err (!%p6375_p12)
}
  0x2c   : > { %s8254_s3 = sld [smem:[#allocation31_spill]]  ;;  %s6390_s18 = scalar_lea.vmem %s6676_s25, 512 }
  0x2d   : > { %p6391_p13 = scmp.ne.s32.totalorder %s6676_s25, %s6390_s18  ;;  %p6398_p5 = scmp.lt.s32.totalorder %s6676_s25, %s6676_s25 }
  0x2e   : > { %p6399_p8 = scmp.lt.s32.totalorder %s6390_s18, %s6390_s18 }
  0x2f   : > { %p6393_p0 = pnand %p6391_p13, %p6680_p7 }
  0x30   : > { %p6400_p9 = por %p6399_p8, %p6398_p5 }
  0x31   : > { %p6394_p2 = pneg %p6393_p0 }
  0x32   : > { %5980 = dma.hbm_to_vmem [thread:$0]  (!%p6670_p6), %s8254_s3, 512, %s6674_s22, [#allocation13], %s8234_s28, %s8234_s28, %s8235_s29  }
  0x33   : > { %p6401_p10 = pnand %p6400_p9, %p6394_p2 }
  0x35   : > { %6404 = shalt.err (!%p6401_p10)
}
  0x36   : > { %s8255_s2 = sld [smem:[#allocation30_spill]]  ;;  %s6568_s22 = smov [#allocation14]  }
  0x37   : > { %s335_s30 = sshll.u32 %s6568_s22, 4  ;;  %s6569_s11 = smov [#allocation15]   ;;  %s336_s30 = int_to_ptr.vmem [resolvable:$true] %s335_s30 }
  0x38   : > { %s348_s12 = sshll.u32 %s6569_s11, 4  ;;  %s6416_s17 = scalar_lea.vmem %s336_s30, 1024  ;;  %s349_s12 = int_to_ptr.vmem [resolvable:$true] %s348_s12 }
  0x39   : > { %p6417_p11 = scmp.ne.s32.totalorder %s336_s30, %s6416_s17  ;;  %p6424_p0 = scmp.lt.s32.totalorder %s336_s30, %s336_s30 }
  0x3a   : > { %p6425_p2 = scmp.lt.s32.totalorder %s6416_s17, %s6416_s17 }
  0x3b   : > { %p6419_p12 = pnand %p6417_p11, %p6680_p7 }
  0x3c   : > { %5977 = dma.hbm_to_vmem [thread:$0]  (!%p6670_p6), %s8255_s2, 512, %s6676_s25, [#allocation10], %s8234_s28, %s8234_s28, %s8235_s29  }
  0x3d   : > { %p6420_p13 = pneg %p6419_p12  ;;  %p6426_p5 = por %p6425_p2, %p6424_p0 }
  0x3f   : > { %p6427_p8 = pnand %p6426_p5, %p6420_p13 }
  0x41   : > { %6430 = shalt.err (!%p6427_p8)
}
  0x42   : > { %s8256_s7 = sld [smem:[#allocation32_spill]]  ;;  %s6442_s18 = scalar_lea.vmem %s349_s12, 512 }
  0x43   : > { %p6443_p9 = scmp.ne.s32.totalorder %s349_s12, %s6442_s18  ;;  %p6450_p12 = scmp.lt.s32.totalorder %s349_s12, %s349_s12 }
  0x44   : > { %p6451_p0 = scmp.lt.s32.totalorder %s6442_s18, %s6442_s18 }
  0x45   : > { %p6445_p10 = pnand %p6443_p9, %p6680_p7 }
  0x46   : > { %p6452_p13 = por %p6451_p0, %p6450_p12 }
  0x47   : > { %p6446_p11 = pneg %p6445_p10 }
  0x48   : > { %5983 = dma.hbm_to_vmem [thread:$0]  (!%p6670_p6), %s8256_s7, 1024, %s336_s30, [#allocation13], %s8234_s28, %s8234_s28, %s8235_s29  }
  0x49   : > { %p6453_p2 = pnand %p6452_p13, %p6446_p11 }
  0x4b   : > { %6456 = shalt.err (!%p6453_p2)
}
  0x4c   : > { %5986 = dma.hbm_to_vmem [thread:$0]  (!%p6670_p6), %s8231_s8, 512, %s349_s12, [#allocation16], %s8234_s28, %s8234_s28, %s8235_s29  }
  0x4d   : > { %s5294_s23 = sadd.s32 4294967294, %s6561_s16   ;;  %s6746_s26 = sadd.s32 1, %s6561_s16  }
  0x4e   : > { %s36_s22 = sadd.s32 1, %s6557_s15  ;;  %s33_s30 = ssub.s32 %s6561_s16, %s6746_s26 }
  0x4f   : > { %p43_p7 = scmp.ne.s32.totalorder %s6557_s15, %s6553_s14  ;;  %p34_p5 = scmp.eq.s32.totalorder %s33_s30, 0 }
  0x50   : > { %p44_p8 = scmp.eq.s32.totalorder %s6561_s16, 0  ;;  %p49_p9 = scmp.ne.s32.totalorder %s6553_s14, %s6549_s13 }
  0x51   : > { %p262_p10 = scmp.eq.s32.totalorder %s6656_s19, 1  ;;  %p268_p0 = scmp.eq.s32.totalorder %s5294_s23, 1 }
  0x52   : > { %s6758_s11 = scalar_select %p34_p5, %s6557_s15, %s36_s22  }
  0x53   : > { %p45_p11 = por %p44_p8, %p43_p7  ;;  %p6762_p12 = por %p8236_p1, %p49_p9 }
  0x54   : > { %p6766_p6 = por %p262_p10, %p43_p7  ;;  %p6000_p13 = scmp.lt.s32.totalorder %s6561_s16, 2 }
  0x55   : > { %s8257_s17 = scalar_select %p6762_p12, 1, 0 }
  0x56   : > { %s8258_s12 = scalar_select %p6766_p6, 1, 0 }
  0x57   : > { %s365_s25 = sand.u32 1, %s6557_s15   ;;  %p6772_p2 = por %p268_p0, %p49_p9 }
  0x58   : > { %s5302_s18 = sshll.u32 %s365_s25, 6  ;;  %s5456_s24 = sshll.u32 %s6561_s16, 10 }
  0x59   : > { %s8259_s21 = scalar_select %p6772_p2, 1, 0 }
  0x5a   : > { %s6780_s30 = scalar_lea.hbm %s8223_s0, %s5456_s24  ;;  %s369_s28 = scalar_lea.vmem [#allocation6], %s5302_s18 }
  0x5b   : > { %s377_s29 = sshll.u32 %s369_s28, 4  ;;  %p6782_p7 = pnand %p6000_p13, %p45_p11  ;;  %s6786_s29 = int_to_ptr.vmem [resolvable:$true] %s377_s29 }
  0x5c   : > { %s6788_s1 = scalar_lea.sflag [#allocation7], %s365_s25  ;;  %s6457_s2 = scalar_lea.hbm %s6780_s30, 1024 }
  0x5d   : > { %p6458_p5 = scmp.ne.s32.totalorder %s6780_s30, %s6457_s2  ;;  %p6459_p8 = pneg %p6782_p7 }
  0x5e   : > { %s6462_s18 = scalar_lea.hbm %s8223_s0, 2048  ;;  %p6463_p11 = scmp.lt.s32.totalorder %s6780_s30, %s8223_s0 }
  0x5f   : > { %p6460_p9 = pnand %p6459_p8, %p6458_p5  ;;  %p6464_p0 = scmp.lt.s32.totalorder %s6462_s18, %s6457_s2 }
  0x61   : > { %p6461_p10 = pneg %p6460_p9  ;;  %p6465_p13 = por %p6464_p0, %p6463_p11 }
  0x63   : > { %p6466_p4 = pnand %p6465_p13, %p6461_p10 }
  0x65   : > { %6469 = shalt.err (!%p6466_p4)
}
  0x66   : > { %s6470_s25 = scalar_lea.vmem %s6786_s29, 1024  ;;  %s6570_s3 = smov [#allocation6]  }
  0x67   : > { %p6471_p1 = scmp.ne.s32.totalorder %s6786_s29, %s6470_s25  ;;  %s6475_s7 = sshll.u32 %s6570_s3, 4  ;;  %s6476_s7 = int_to_ptr.vmem [resolvable:$false] %s6475_s7 }
  0x68   : > { %s6477_s24 = scalar_lea.vmem %s6476_s7, 2048  ;;  %p6478_p9 = scmp.lt.s32.totalorder %s6786_s29, %s6476_s7 }
  0x69   : > { %p6473_p2 = pnand %p6471_p1, %p6459_p8  ;;  %p6479_p6 = scmp.lt.s32.totalorder %s6477_s24, %s6470_s25 }
  0x6b   : > { %p6474_p5 = pneg %p6473_p2  ;;  %p6480_p12 = por %p6479_p6, %p6478_p9 }
  0x6d   : > { %p6481_p3 = pnand %p6480_p12, %p6474_p5 }
  0x6f   : > { %6484 = shalt.err (!%p6481_p3)
}
  0x70   : > { %s8261_s2 = smov 8   ;;  %s8262_s27 = smov 128  }
  0x71   : > { %5990 = dma.hbm_to_vmem [thread:$0]  (!%p6782_p7), %s6780_s30, 1024, %s6786_s29, %s6788_s1, %s8262_s27, %s8262_s27, %s8261_s2  }
  0x72   : > { %p8263_p1 = scmp.ne.s32.totalorder %s8250_s20, 0 }
  0x74   : > { %389 = sbr.rel (%p8263_p1) target bundleno = 2017 (0x7e1), region = 60 }
  0x79   : > { %s6815_s3 = sand.u32 1, %s6553_s14   ;;  %p8264_p3 = scmp.ne.s32.totalorder %s8257_s17, 0 }
  0x7a   : > { %s5307_s7 = sshll.u32 %s6815_s3, 6  ;;  %s392_s18 = scalar_lea.sflag [#allocation7], %s6815_s3 }
  0x7b   : > { %s6821_s23 = scalar_lea.vmem [#allocation6], %s5307_s7 }
  0x7c   : > { %6528 = dma.done.wait (%p8264_p3), %s392_s18, 1024  }
  0x7d   : > { %6530 = vsyncadd (%p8264_p3), %s392_s18, 4294966272  ;;  %p8265_p4 = scmp.eq.s32.totalorder %s6656_s19, 0 }
  0x7f   : > { %6532 = dma.done.wait (%p8265_p4), [#allocation10], 1024   ;;  %p8266_p12 = pmov %p8265_p4 }
  0x80   : > { %p8267_p6 = pmov %p8265_p4 }
  0x81   : > { %6534 = vsyncadd (%p8266_p12), [#allocation10], 4294966272 }
  0x82   : > { %6536 = dma.done.wait (%p8267_p6), [#allocation13], 1536   ;;  %p8268_p2 = pmov %p8265_p4 }
  0x84   : > { %6538 = vsyncadd (%p8268_p2), [#allocation13], 4294965760  ;;  %p8269_p7 = pmov %p8268_p2 }
  0x85   : > { %p8270_p8 = pmov %p8268_p2 }
  0x86   : > { %6540 = dma.done.wait (%p8269_p7), [#allocation16], 512  }
  0x87   : > { %6542 = vsyncadd (%p8270_p8), [#allocation16], 4294966784  ;;  %v6571_v0 = vmov 0   ;;  %v465_v1 = vld [vmem:[#allocation9 + $0x18] sm:$0xff]  ;;  %v464_v2 = vld [vmem:[#allocation9 + $0x10] sm:$0xff]  ;;  %vm473_vm0 = vcmask 261120  }
  0x88   : > { %6054 = vset.pattern.permute.xlu0 %v6571_v0  ;;  %6055 = vset.pattern.permute.xlu1 %v6571_v0  ;;  %v463_v3 = vld [vmem:[#allocation9 + $0x8] sm:$0xff]  ;;  %v462_v4 = vld [vmem:[#allocation9] sm:$0xff]  ;;  %v6848_v8 = vld [vmem:[%s6821_s23 + $0x10] sm:$0xff]  ;;  %vm828_vm1 = vcmask 64512   ;;  %s6572_s30 = smov 120   ;;  %s6573_s28 = smov 112  }
  0x89   : > { %5635 = vmatprep.subr.mxu0 %v465_v1  ;;  %5939 = vmatprep.subr.mxu1 %v465_v1  ;;  %v454_v5 = vld [vmem:[%s6821_s23] sm:$0xff]  ;;  %v6841_v6 = vld [vmem:[%s6821_s23 + $0x8] sm:$0xff]  ;;  %v606_v10 = vld [vmem:[#allocation11 + $0x18] sm:$0xff]  ;;  %s6574_s22 = smov 104   ;;  %vm3222_vm2 = vcmask 130048   ;;  %s6575_s29 = smov 8  }
  0x8a   : > { %5636 = vmatpush3.msra.mxu0 %v465_v1  ;;  %5943 = vmatpush3.msra.mxu1 %v465_v1  ;;  %v6845_v7 = vld [vmem:[%s6821_s23 + $0x20] sm:$0xff]  ;;  %v6851_v9 = vld [vmem:[%s6821_s23 + $0x28] sm:$0xff]  ;;  %v6856_v11 = vld [vmem:[%s6821_s23 + $0x30] sm:$0xff]  ;;  %s6576_s17 = smov 16   ;;  %vm4911_vm3 = vcmask 130112   ;;  %vm4952_vm4 = vcmask 195712  }
  0x8b   : > { %5637 = vmatprep.subr.mxu0 %v464_v2  ;;  %5940 = vmatprep.subr.mxu1 %v464_v2  ;;  %v6863_v12 = vld [vmem:[%s6821_s23 + $0x18] sm:$0xff]  ;;  %v605_v13 = vld [vmem:[#allocation11 + $0x10] sm:$0xff]  ;;  %v5340_v14 = vld [vmem:[%s8229_s6] ss:$0 sm:$0xff]  ;;  %vm4993_vm5 = vcmask 261312   ;;  %s451_s25 = scalar_lea.vmem [#allocation17], %s5307_s7 }
  0x8c   : > { %5638 = vmatpush3.msra.mxu0 %v464_v2  ;;  %5944 = vmatpush3.msra.mxu1 %v464_v2  ;;  %v6873_v15 = vld [vmem:[%s6821_s23 + $0x38] sm:$0xff]  ;;  %v604_v16 = vld [vmem:[#allocation11 + $0x8] sm:$0xff]  ;;  %v603_v17 = vld [vmem:[#allocation11] sm:$0xff]  ;;  %s5458_s7 = sshll.u32 %s6656_s19, 10  ;;  %s5173_s24 = sshll.u32 %s451_s25, 4  ;;  %s8178_s24 = int_to_ptr.vmem [resolvable:$true] %s5173_s24 }
  0x8d   : > { %5639 = vmatprep.subr.mxu0 %v463_v3  ;;  %5941 = vmatprep.subr.mxu1 %v463_v3  ;;  %v5314_v18 = vld [vmem:[%s8227_s4] ss:$0 sm:$0xff]  ;;  %v715_v54 = vld [vmem:[#allocation12 + $0x18] sm:$0xff]  ;;  %v714_v56 = vld [vmem:[#allocation12 + $0x10] sm:$0xff]  ;;  %s8175_s18 = scalar_lea.hbm %s8233_s10, %s5458_s7  ;;  %s5159_s19 = scalar_lea.sflag [#allocation8], %s6815_s3 }
  0x8e   : > { %5640 = vmatpush3.msra.mxu0 %v463_v3  ;;  %5945 = vmatpush3.msra.mxu1 %v463_v3  ;;  %v713_v58 = vld [vmem:[#allocation12 + $0x8] sm:$0xff]  ;;  %v712_v60 = vld [vmem:[#allocation12] sm:$0xff]  ;;  %s6485_s23 = scalar_lea.vmem %s8178_s24, 1024  ;;  %p8283_p11 = scmp.ne.s32.totalorder %s8258_s12, 0 }
  0x8f   : > { %5641 = vmatprep.subr.mxu0 %v462_v4  ;;  %5643 = vmatprep.mubr.msk.f32.mxu0 %vm473_vm0, %v454_v5  ;;  %p6486_p10 = scmp.ne.s32.totalorder %s8178_s24, %s6485_s23  ;;  %s6578_s1 = smov [#allocation17]  }
  0x90   : > { %5642 = vmatpush3.msra.mxu0 %v462_v4  ;;  %5942 = vmatprep.subr.mxu1 %v462_v4  ;;  %s6489_s20 = sshll.u32 %s6578_s1, 4  ;;  %s6490_s20 = int_to_ptr.vmem [resolvable:$false] %s6489_s20 }
  0x91   : > { %5644 = vmatmul.mubr.msk.f32.vlgmr.msra.gmra.mxu0 %vm473_vm0, %v6841_v6  ;;  %5946 = vmatpush3.msra.mxu1 %v462_v4  ;;  %p6487_p0 = pnand %p6486_p10, %p8283_p11  ;;  %p6492_p5 = scmp.lt.s32.totalorder %s8178_s24, %s6490_s20 }
  0x92   : > { %5649 = vmatprep.mubr.msk.f32.mxu1 %vm473_vm0, %v6845_v7  ;;  %5646 = vmatprep.mubr.msk.f32.mxu0 %vm473_vm0, %v6848_v8 }
  0x93   : > { %5650 = vmatmul.mubr.msk.f32.vlgmr.msra.gmra.mxu1 %vm473_vm0, %v6851_v9  ;;  %5655 = vmatprep.subr.mxu1 %v606_v10  ;;  %p6488_p13 = pneg %p6487_p0 }
  0x94   : > { %5652 = vmatprep.mubr.msk.f32.mxu1 %vm473_vm0, %v6856_v11  ;;  %5656 = vmatpush3.msra.mxu1 %v606_v10 }
  0x95   : > { %5647 = vmatmul.mubr.msk.f32.gmra.mxu0 %vm473_vm0, %v6863_v12  ;;  %5657 = vmatprep.subr.mxu1 %v605_v13 }
  0x96   : > { %5658 = vmatpush3.msra.mxu1 %v605_v13  ;;  %1743 = vperm.xlu0 %6054, %v5340_v14  }
  0x97   : > { %5653 = vmatmul.mubr.msk.f32.gmra.mxu1 %vm473_vm0, %v6873_v15  ;;  %5659 = vmatprep.subr.mxu1 %v604_v16 }
  0x98   : > { %5660 = vmatpush3.msra.mxu1 %v604_v16  ;;  %5663 = vmatprep.mubr.msk.f32.mxu1 %vm473_vm0, %v454_v5 }
  0x99   : > { %5661 = vmatprep.subr.mxu1 %v603_v17  ;;  %5683 = vmatprep.mubr.msk.f32.mxu0 %vm473_vm0, %v454_v5 }
  0x9a   : > { %5662 = vmatpush3.msra.mxu1 %v603_v17  ;;  %5675 = vmatprep.subr.mxu0 %v715_v54 }
  0x9b   : > { %5664 = vmatmul.mubr.msk.f32.vlgmr.msra.gmra.mxu1 %vm473_vm0, %v6841_v6  ;;  %5676 = vmatpush3.msra.mxu0 %v715_v54 }
  0x9c   : > { %5666 = vmatprep.mubr.msk.f32.mxu1 %vm473_vm0, %v6848_v8  ;;  %5677 = vmatprep.subr.mxu0 %v714_v56 }
  0x9d   : > { %5678 = vmatpush3.msra.mxu0 %v714_v56 }
  0x9e   : > { %5679 = vmatprep.subr.mxu0 %v713_v58 }
  0x9f   : > { %5667 = vmatmul.mubr.msk.f32.gmra.mxu1 %vm473_vm0, %v6863_v12  ;;  %5680 = vmatpush3.msra.mxu0 %v713_v58 }
  0xa0   : > { %5669 = vmatprep.mubr.msk.f32.mxu1 %vm473_vm0, %v6845_v7  ;;  %5681 = vmatprep.subr.mxu0 %v712_v60 }
  0xa1   : > { %5682 = vmatpush3.msra.mxu0 %v712_v60 }
  0xa2   : > { %5684 = vmatmul.mubr.msk.f32.vlgmr.msra.gmra.mxu0 %vm473_vm0, %v6841_v6 }
  0xa3   : > { %5670 = vmatmul.mubr.msk.f32.gmra.mxu1 %vm473_vm0, %v6851_v9  ;;  %5686 = vmatprep.mubr.msk.f32.mxu0 %vm473_vm0, %v6848_v8 }
  0xa4   : > { %5672 = vmatprep.mubr.msk.f32.mxu1 %vm473_vm0, %v6856_v11 }
  0xa6   : > { %5687 = vmatmul.mubr.msk.f32.gmra.mxu0 %vm473_vm0, %v6863_v12 }
  0xa7   : > { %5673 = vmatmul.mubr.msk.f32.gmra.mxu1 %vm473_vm0, %v6873_v15  ;;  %5689 = vmatprep.mubr.msk.f32.mxu0 %vm473_vm0, %v6845_v7 }
  0xaa   : > { %5690 = vmatmul.mubr.msk.f32.gmra.mxu0 %vm473_vm0, %v6851_v9 }
  0xab   : > { %5692 = vmatprep.mubr.msk.f32.mxu0 %vm473_vm0, %v6856_v11 }
  0xae   : > { %5693 = vmatmul.mubr.msk.f32.gmra.mxu0 %vm473_vm0, %v6873_v15 }
 0x111   : > { %v6971_v52 = vpop.permute.xlu0 %1743 }
 0x151   : > { %v5645_v19 = vpop.f32.mrf.mxu0 }
 0x152   : > { %v570_v20 = vadd.f32 %v5645_v19, %v5314_v18 }
 0x153   : > { %v564_v21 = vpop.f32.mrf.mxu0  ;;  %v5651_v22 = vpop.f32.mrf.mxu1 }
 0x154   : > { %830 = vst.msk [vmem:[#allocation2 + $0x8] sm:$0xff] %vm828_vm1, %v570_v20  ;;  %v565_v23 = vadd.f32 %v5314_v18, %v564_v21  ;;  %v590_v24 = vadd.f32 %v5651_v22, %v5314_v18  ;;  %863 = vrot.lane.b32.xlu0 %v570_v20, %s6572_s30 }
 0x155   : > { %v584_v25 = vpop.f32.mrf.mxu1  ;;  %v5648_v26 = vpop.f32.mrf.mxu0 }
 0x156   : > { %829 = vst.msk [vmem:[#allocation2] sm:$0xff] %vm828_vm1, %v565_v23  ;;  %834 = vst.msk [vmem:[#allocation2 + $0x28] sm:$0xff] %vm828_vm1, %v590_v24  ;;  %v585_v27 = vadd.f32 %v5314_v18, %v584_v25  ;;  %861 = vrot.lane.b32.xlu1 %v565_v23, %s6572_s30  ;;  %v580_v28 = vadd.f32 %v5648_v26, %v5314_v18 }
 0x157   : > { %v574_v29 = vpop.f32.mrf.mxu0  ;;  %v5654_v30 = vpop.f32.mrf.mxu1 }
 0x158   : > { %833 = vst.msk [vmem:[#allocation2 + $0x20] sm:$0xff] %vm828_vm1, %v585_v27  ;;  %871 = vrot.lane.b32.xlu0 %v590_v24, %s6572_s30  ;;  %832 = vst.msk [vmem:[#allocation2 + $0x18] sm:$0xff] %vm828_vm1, %v580_v28  ;;  %v575_v31 = vadd.f32 %v5314_v18, %v574_v29  ;;  %v600_v32 = vadd.f32 %v5654_v30, %v5314_v18 }
 0x159   : > { %v594_v33 = vpop.f32.mrf.mxu1 }
 0x15a   : > { %869 = vrot.lane.b32.xlu1 %v585_v27, %s6572_s30  ;;  %831 = vst.msk [vmem:[#allocation2 + $0x10] sm:$0xff] %vm828_vm1, %v575_v31  ;;  %836 = vst.msk [vmem:[#allocation2 + $0x38] sm:$0xff] %vm828_vm1, %v600_v32  ;;  %v595_v34 = vadd.f32 %v5314_v18, %v594_v33 }
 0x15b   : > { %v5665_v35 = vpop.f32.mrf.mxu1  ;;  %v6956_v45 = vld [vmem:[#allocation2 + $0x8] sm:$0xff] }
 0x15c   : > { %978 = vrot.lane.b32.xlu0 %v570_v20, %s6573_s28  ;;  %835 = vst.msk [vmem:[#allocation2 + $0x30] sm:$0xff] %vm828_vm1, %v595_v34  ;;  %838 = vst.msk [vmem:[#allocation3 + $0x8] sm:$0xff] %vm828_vm1, %v5665_v35  ;;  %v1271_v46 = vmul.f32 %v6956_v45, %v6956_v45 }
 0x15d   : > { %v673_v36 = vpop.f32.mrf.mxu1  ;;  %v1179_v42 = vld [vmem:[#allocation2 + $0x28] sm:$0xff]  ;;  %v7010_v8 = vld [vmem:[#allocation2] sm:$0xff] }
 0x15e   : > { %976 = vrot.lane.b32.xlu1 %v565_v23, %s6573_s28  ;;  %837 = vst.msk [vmem:[#allocation3] sm:$0xff] %vm828_vm1, %v673_v36  ;;  %v1275_v43 = vmul.f32 %v1179_v42, %v1179_v42  ;;  %v1305_v48 = vsel %vm828_vm1, %v1271_v46, 0.0  ;;  %v1270_v11 = vmul.f32 %v7010_v8, %v7010_v8 }
 0x15f   : > { %v5668_v37 = vpop.f32.mrf.mxu1  ;;  %v6960_v47 = vld [vmem:[#allocation2 + $0x20] sm:$0xff]  ;;  %v7016_v12 = vld [vmem:[#allocation2 + $0x18] sm:$0xff] }
 0x160   : > { %986 = vrot.lane.b32.xlu0 %v590_v24, %s6573_s28  ;;  %840 = vst.msk [vmem:[#allocation3 + $0x18] sm:$0xff] %vm828_vm1, %v5668_v37  ;;  %v1317_v44 = vsel %vm828_vm1, %v1275_v43, 0.0  ;;  %v1274_v49 = vmul.f32 %v6960_v47, %v6960_v47  ;;  %v1302_v15 = vsel %vm828_vm1, %v1270_v11, 0.0  ;;  %v1273_v16 = vmul.f32 %v7016_v12, %v7016_v12  ;;  %v5341_v43 = vld [vmem:[%s8229_s6 + $0x1] ss:$0 sm:$0xff] }
 0x161   : > { %v683_v38 = vpop.f32.mrf.mxu1  ;;  %v7023_v17 = vld [vmem:[#allocation2 + $0x38] sm:$0xff]  ;;  %v7033_v26 = vld [vmem:[#allocation2 + $0x10] sm:$0xff] }
 0x162   : > { %984 = vrot.lane.b32.xlu1 %v585_v27, %s6573_s28  ;;  %839 = vst.msk [vmem:[#allocation3 + $0x10] sm:$0xff] %vm828_vm1, %v683_v38  ;;  %v1314_v50 = vsel %vm828_vm1, %v1274_v49, 0.0  ;;  %v1277_v21 = vmul.f32 %v7023_v17, %v7023_v17 }
 0x163   : > { %v6918_v39 = vpop.f32.mrf.mxu1  ;;  %v7039_v30 = vld [vmem:[#allocation2 + $0x30] sm:$0xff] }
 0x164   : > { %1077 = vrot.lane.b32.xlu0 %v570_v20, %s6574_s22  ;;  %842 = vst.msk [vmem:[#allocation3 + $0x28] sm:$0xff] %vm828_vm1, %v6918_v39  ;;  %v1311_v20 = vsel %vm828_vm1, %v1273_v16, 0.0  ;;  %v1276_v33 = vmul.f32 %v7039_v30, %v7039_v30 }
 0x165   : > { %v6937_v40 = vpop.f32.mrf.mxu1  ;;  %v7075_v49 = vld [vmem:[#allocation3] sm:$0xff] }
 0x166   : > { %1075 = vrot.lane.b32.xlu1 %v565_v23, %s6574_s22  ;;  %841 = vst.msk [vmem:[#allocation3 + $0x20] sm:$0xff] %vm828_vm1, %v6937_v40 }
 0x167   : > { %v6947_v41 = vpop.f32.mrf.mxu1 }
 0x168   : > { %1085 = vrot.lane.b32.xlu0 %v590_v24, %s6574_s22  ;;  %844 = vst.msk [vmem:[#allocation3 + $0x38] sm:$0xff] %vm828_vm1, %v6947_v41  ;;  %v1323_v24 = vsel %vm828_vm1, %v1277_v21, 0.0 }
 0x169   : > { %v6966_v51 = vpop.f32.mrf.mxu1  ;;  %v7080_v54 = vld [vmem:[#allocation3 + $0x10] sm:$0xff] }
 0x16a   : > { %1083 = vrot.lane.b32.xlu1 %v585_v27, %s6574_s22  ;;  %843 = vst.msk [vmem:[#allocation3 + $0x30] sm:$0xff] %vm828_vm1, %v6966_v51  ;;  %v1496_v56 = vmul.f32 %v7080_v54, %v7080_v54 }
 0x16c   : > { %867 = vrot.lane.b32.xlu0 %v580_v28, %s6572_s30  ;;  %v1532_v60 = vsel %vm828_vm1, %v1496_v56, 0.0 }
 0x16e   : > { %865 = vrot.lane.b32.xlu1 %v575_v31, %s6572_s30 }
 0x170   : > { %875 = vrot.lane.b32.xlu0 %v600_v32, %s6572_s30 }
 0x172   : > { %873 = vrot.lane.b32.xlu1 %v595_v34, %s6572_s30 }
 0x174   : > { %982 = vrot.lane.b32.xlu0 %v580_v28, %s6573_s28 }
 0x176   : > { %980 = vrot.lane.b32.xlu1 %v575_v31, %s6573_s28 }
 0x178   : > { %990 = vrot.lane.b32.xlu0 %v600_v32, %s6573_s28 }
 0x17a   : > { %988 = vrot.lane.b32.xlu1 %v595_v34, %s6573_s28 }
 0x17c   : > { %1081 = vrot.lane.b32.xlu0 %v580_v28, %s6574_s22  ;;  %v1272_v28 = vmul.f32 %v7033_v26, %v7033_v26 }
 0x17e   : > { %1079 = vrot.lane.b32.xlu1 %v575_v31, %s6574_s22 }
 0x180   : > { %1089 = vrot.lane.b32.xlu0 %v600_v32, %s6574_s22  ;;  %v1308_v32 = vsel %vm828_vm1, %v1272_v28, 0.0 }
 0x182   : > { %1009 = vrot.lane.b32.xlu1 %v673_v36, %s6573_s28 }
 0x184   : > { %904 = vrot.lane.b32.xlu0 %v5665_v35, %s6572_s30 }
 0x186   : > { %1108 = vrot.lane.b32.xlu1 %v673_v36, %s6574_s22 }
 0x188   : > { %1011 = vrot.lane.b32.xlu0 %v5665_v35, %s6573_s28 }
 0x18a   : > { %908 = vrot.lane.b32.xlu1 %v5668_v37, %s6572_s30 }
 0x18c   : > { %1110 = vrot.lane.b32.xlu0 %v5665_v35, %s6574_s22 }
 0x190   : > { %1087 = vrot.lane.b32.xlu0 %v595_v34, %s6574_s22 }
 0x194   : > { %902 = vrot.lane.b32.xlu0 %v673_v36, %s6572_s30  ;;  %v1320_v36 = vsel %vm828_vm1, %v1276_v33, 0.0  ;;  %v7134_v33 = vld [vmem:[#allocation3 + $0x18] sm:$0xff] }
 0x198   : > { %1015 = vrot.lane.b32.xlu0 %v5668_v37, %s6573_s28 }
 0x19c   : > { %1114 = vrot.lane.b32.xlu0 %v5668_v37, %s6574_s22 }
 0x1ae   : > { %1318 = vadd.xlane.f32.xlu1 %v1317_v44  ;;  %v7068_v44 = vld [vmem:[#allocation3 + $0x8] sm:$0xff] }
 0x1bb   : > { %1306 = vadd.xlane.f32.xlu0 %v1305_v48 }
 0x1bf   : > { %1315 = vadd.xlane.f32.xlu0 %v1314_v50  ;;  %906 = vrot.lane.b32.xlu1 %v683_v38, %s6572_s30 }
 0x1c3   : > { %1013 = vrot.lane.b32.xlu1 %v683_v38, %s6573_s28 }
 0x1c6   : > { %v864_v53 = vpop.permute.xlu0 %863 }
 0x1c7   : > { %887 = vst.msk [vmem:[#allocation2 + $0x48] sm:$0xff] %vm828_vm1, %v864_v53  ;;  %1112 = vrot.lane.b32.xlu1 %v683_v38, %s6574_s22  ;;  %v1494_v53 = vmul.f32 %v7075_v49, %v7075_v49 }
 0x1c8   : > { %v862_v55 = vpop.permute.xlu1 %861 }
 0x1c9   : > { %886 = vst.msk [vmem:[#allocation2 + $0x40] sm:$0xff] %vm828_vm1, %v862_v55  ;;  %v1526_v55 = vsel %vm828_vm1, %v1494_v53, 0.0 }
 0x1ca   : > { %v872_v57 = vpop.permute.xlu0 %871 }
 0x1cb   : > { %891 = vst.msk [vmem:[#allocation2 + $0x68] sm:$0xff] %vm828_vm1, %v872_v57  ;;  %v7088_v57 = vld [vmem:[#allocation3 + $0x20] sm:$0xff] }
 0x1cc   : > { %v870_v59 = vpop.permute.xlu1 %869 }
 0x1cd   : > { %890 = vst.msk [vmem:[#allocation2 + $0x60] sm:$0xff] %vm828_vm1, %v870_v59 }
 0x1ce   : > { %v979_v61 = vpop.permute.xlu0 %978 }
 0x1cf   : > { %1002 = vst.msk [vmem:[#allocation2 + $0x88] sm:$0xff] %vm828_vm1, %v979_v61  ;;  %v1498_v61 = vmul.f32 %v7088_v57, %v7088_v57 }
 0x1d0   : > { %v977_v62 = vpop.permute.xlu1 %976 }
 0x1d1   : > { %1001 = vst.msk [vmem:[#allocation2 + $0x80] sm:$0xff] %vm828_vm1, %v977_v62  ;;  %v7098_v62 = vld [vmem:[#allocation3 + $0x30] sm:$0xff] }
 0x1d2   : > { %v987_v63 = vpop.permute.xlu0 %986 }
 0x1d3   : > { %1006 = vst.msk [vmem:[#allocation2 + $0xa8] sm:$0xff] %vm828_vm1, %v987_v63 }
 0x1d4   : > { %v985_v0 = vpop.permute.xlu1 %984 }
 0x1d5   : > { %1005 = vst.msk [vmem:[#allocation2 + $0xa0] sm:$0xff] %vm828_vm1, %v985_v0  ;;  %912 = vrot.lane.b32.xlu0 %v6918_v39, %s6572_s30  ;;  %v1538_v0 = vsel %vm828_vm1, %v1498_v61, 0.0 }
 0x1d6   : > { %v1078_v1 = vpop.permute.xlu0 %1077 }
 0x1d7   : > { %1101 = vst.msk [vmem:[#allocation2 + $0xc8] sm:$0xff] %vm828_vm1, %v1078_v1  ;;  %v1500_v1 = vmul.f32 %v7098_v62, %v7098_v62 }
 0x1d8   : > { %v1076_v2 = vpop.permute.xlu1 %1075 }
 0x1d9   : > { %1100 = vst.msk [vmem:[#allocation2 + $0xc0] sm:$0xff] %vm828_vm1, %v1076_v2  ;;  %1019 = vrot.lane.b32.xlu0 %v6918_v39, %s6573_s28 }
 0x1da   : > { %v1086_v3 = vpop.permute.xlu0 %1085  ;;  %v1195_v61 = vld [vmem:[#allocation2 + $0xa8] sm:$0xff] }
 0x1db   : > { %1105 = vst.msk [vmem:[#allocation2 + $0xe8] sm:$0xff] %vm828_vm1, %v1086_v3  ;;  %v1191_v3 = vld [vmem:[#allocation2 + $0x88] sm:$0xff] }
 0x1dc   : > { %v1084_v4 = vpop.permute.xlu1 %1083 }
 0x1dd   : > { %1104 = vst.msk [vmem:[#allocation2 + $0xe0] sm:$0xff] %vm828_vm1, %v1084_v4  ;;  %1118 = vrot.lane.b32.xlu0 %v6918_v39, %s6574_s22  ;;  %v1544_v4 = vsel %vm828_vm1, %v1500_v1, 0.0  ;;  %v5342_v1 = vld [vmem:[%s8229_s6 + $0x2] ss:$0 sm:$0xff] }
 0x1de   : > { %v868_v5 = vpop.permute.xlu0 %867 }
 0x1df   : > { %889 = vst.msk [vmem:[#allocation2 + $0x58] sm:$0xff] %vm828_vm1, %v868_v5  ;;  %v1287_v5 = vmul.f32 %v1191_v3, %v1191_v3  ;;  %v7167_v3 = vld [vmem:[#allocation2 + $0x60] sm:$0xff] }
 0x1e0   : > { %v866_v6 = vpop.permute.xlu1 %865 }
 0x1e1   : > { %888 = vst.msk [vmem:[#allocation2 + $0x50] sm:$0xff] %vm828_vm1, %v866_v6 }
 0x1e2   : > { %v876_v7 = vpop.permute.xlu0 %875 }
 0x1e3   : > { %893 = vst.msk [vmem:[#allocation2 + $0x78] sm:$0xff] %vm828_vm1, %v876_v7  ;;  %v7106_v7 = vld [vmem:[#allocation2 + $0x40] sm:$0xff] }
 0x1e4   : > { %v874_v9 = vpop.permute.xlu1 %873 }
 0x1e5   : > { %892 = vst.msk [vmem:[#allocation2 + $0x70] sm:$0xff] %vm828_vm1, %v874_v9  ;;  %v1353_v9 = vsel %vm828_vm1, %v1287_v5, 0.0 }
 0x1e6   : > { %v983_v10 = vpop.permute.xlu0 %982 }
 0x1e7   : > { %1004 = vst.msk [vmem:[#allocation2 + $0x98] sm:$0xff] %vm828_vm1, %v983_v10  ;;  %v1278_v10 = vmul.f32 %v7106_v7, %v7106_v7 }
 0x1e8   : > { %v981_v13 = vpop.permute.xlu1 %980 }
 0x1e9   : > { %1003 = vst.msk [vmem:[#allocation2 + $0x90] sm:$0xff] %vm828_vm1, %v981_v13  ;;  %v7112_v13 = vld [vmem:[#allocation2 + $0x50] sm:$0xff] }
 0x1ea   : > { %v991_v14 = vpop.permute.xlu0 %990 }
 0x1eb   : > { %1008 = vst.msk [vmem:[#allocation2 + $0xb8] sm:$0xff] %vm828_vm1, %v991_v14  ;;  %1303 = vadd.xlane.f32.xlu1 %v1302_v15  ;;  %v1280_v14 = vmul.f32 %v7112_v13, %v7112_v13 }
 0x1ec   : > { %v989_v18 = vpop.permute.xlu1 %988 }
 0x1ed   : > { %1007 = vst.msk [vmem:[#allocation2 + $0xb0] sm:$0xff] %vm828_vm1, %v989_v18 }
 0x1ee   : > { %v1082_v19 = vpop.permute.xlu0 %1081 }
 0x1ef   : > { %1103 = vst.msk [vmem:[#allocation2 + $0xd8] sm:$0xff] %vm828_vm1, %v1082_v19  ;;  %1312 = vadd.xlane.f32.xlu1 %v1311_v20  ;;  %v1332_v19 = vsel %vm828_vm1, %v1280_v14, 0.0 }
 0x1f0   : > { %v1080_v22 = vpop.permute.xlu1 %1079 }
 0x1f1   : > { %1102 = vst.msk [vmem:[#allocation2 + $0xd0] sm:$0xff] %vm828_vm1, %v1080_v22 }
 0x1f2   : > { %v1090_v23 = vpop.permute.xlu0 %1089 }
 0x1f3   : > { %1107 = vst.msk [vmem:[#allocation2 + $0xf8] sm:$0xff] %vm828_vm1, %v1090_v23  ;;  %1324 = vadd.xlane.f32.xlu1 %v1323_v24 }
 0x1f4   : > { %v1010_v25 = vpop.permute.xlu1 %1009 }
 0x1f5   : > { %1034 = vst.msk [vmem:[#allocation3 + $0x80] sm:$0xff] %vm828_vm1, %v1010_v25 }
 0x1f6   : > { %v905_v27 = vpop.permute.xlu0 %904 }
 0x1f7   : > { %928 = vst.msk [vmem:[#allocation3 + $0x48] sm:$0xff] %vm828_vm1, %v905_v27 }
 0x1f8   : > { %v1109_v29 = vpop.permute.xlu1 %1108 }
 0x1f9   : > { %1133 = vst.msk [vmem:[#allocation3 + $0xc0] sm:$0xff] %vm828_vm1, %v1109_v29 }
 0x1fa   : > { %v1012_v31 = vpop.permute.xlu0 %1011 }
 0x1fb   : > { %1035 = vst.msk [vmem:[#allocation3 + $0x88] sm:$0xff] %vm828_vm1, %v1012_v31  ;;  %v1202_v31 = vld [vmem:[#allocation2 + $0xe0] sm:$0xff] }
 0x1fc   : > { %1309 = vadd.xlane.f32.xlu0 %v1308_v32  ;;  %v909_v34 = vpop.permute.xlu1 %908  ;;  %v1298_v32 = vmul.f32 %v1202_v31, %v1202_v31  ;;  %v1189_v31 = vld [vmem:[#allocation2 + $0x78] sm:$0xff] }
 0x1fd   : > { %930 = vst.msk [vmem:[#allocation3 + $0x58] sm:$0xff] %vm828_vm1, %v909_v34 }
 0x1fe   : > { %v1111_v35 = vpop.permute.xlu0 %1110  ;;  %v1386_v34 = vsel %vm828_vm1, %v1298_v32, 0.0  ;;  %v1285_v32 = vmul.f32 %v1189_v31, %v1189_v31 }
 0x1ff   : > { %1134 = vst.msk [vmem:[#allocation3 + $0xc8] sm:$0xff] %vm828_vm1, %v1111_v35  ;;  %v1497_v35 = vmul.f32 %v7134_v33, %v7134_v33 }
 0x200   : > { %1321 = vadd.xlane.f32.xlu0 %v1320_v36  ;;  %v7139_v36 = vld [vmem:[#allocation3 + $0x28] sm:$0xff] }
 0x202   : > { %v1088_v37 = vpop.permute.xlu0 %1087 }
 0x203   : > { %1106 = vst.msk [vmem:[#allocation2 + $0xf0] sm:$0xff] %vm828_vm1, %v1088_v37  ;;  %v1535_v37 = vsel %vm828_vm1, %v1497_v35, 0.0  ;;  %v1347_v35 = vsel %vm828_vm1, %v1285_v32, 0.0 }
 0x204   : > { %910 = vrot.lane.b32.xlu1 %v6937_v40, %s6572_s30 }
 0x206   : > { %v903_v38 = vpop.permute.xlu0 %902 }
 0x207   : > { %927 = vst.msk [vmem:[#allocation3 + $0x40] sm:$0xff] %vm828_vm1, %v903_v38  ;;  %v1499_v38 = vmul.f32 %v7139_v36, %v7139_v36 }
 0x208   : > { %1017 = vrot.lane.b32.xlu1 %v6937_v40, %s6573_s28 }
 0x20a   : > { %v1016_v39 = vpop.permute.xlu0 %1015 }
 0x20b   : > { %1037 = vst.msk [vmem:[#allocation3 + $0x98] sm:$0xff] %vm828_vm1, %v1016_v39  ;;  %v7144_v39 = vld [vmem:[#allocation3 + $0x38] sm:$0xff] }
 0x20c   : > { %1116 = vrot.lane.b32.xlu1 %v6937_v40, %s6574_s22  ;;  %v1495_v40 = vmul.f32 %v7068_v44, %v7068_v44 }
 0x20e   : > { %v1115_v42 = vpop.permute.xlu0 %1114  ;;  %v1529_v46 = vsel %vm828_vm1, %v1495_v40, 0.0  ;;  %v7118_v16 = vld [vmem:[#allocation3 + $0x40] sm:$0xff]  ;;  %v7149_v40 = vld [vmem:[#allocation2 + $0x48] sm:$0xff] }
 0x20f   : > { %1136 = vst.msk [vmem:[#allocation3 + $0xd8] sm:$0xff] %vm828_vm1, %v1115_v42  ;;  %v1502_v20 = vmul.f32 %v7118_v16, %v7118_v16  ;;  %v1541_v42 = vsel %vm828_vm1, %v1499_v38, 0.0  ;;  %v1279_v53 = vmul.f32 %v7149_v40, %v7149_v40 }
 0x211   : > { %v1550_v24 = vsel %vm828_vm1, %v1502_v20, 0.0 }
 0x216   : > { %916 = vrot.lane.b32.xlu0 %v6947_v41, %s6572_s30  ;;  %v1233_v27 = vld [vmem:[#allocation3 + $0xd8] sm:$0xff] }
 0x217   : > { %v1521_v29 = vmul.f32 %v1233_v27, %v1233_v27  ;;  %v7192_v27 = vld [vmem:[#allocation2 + $0x58] sm:$0xff] }
 0x21a   : > { %1747 = vperm.xlu0 %6054, %v5341_v43   ;;  %v1501_v43 = vmul.f32 %v7144_v39, %v7144_v39 }
 0x21e   : > { %1023 = vrot.lane.b32.xlu0 %v6947_v41, %s6573_s28 }
 0x222   : > { %1122 = vrot.lane.b32.xlu0 %v6947_v41, %s6574_s22 }
 0x230   : > { %1530 = vadd.xlane.f32.xlu1 %v1529_v46 }
 0x237   : > { %v7073_v48 = vpop.xlane.xlu1 %1318 }
 0x23b   : > { %v907_v50 = vpop.permute.xlu1 %906 }
 0x23c   : > { %929 = vst.msk [vmem:[#allocation3 + $0x50] sm:$0xff] %vm828_vm1, %v907_v50  ;;  %v1547_v50 = vsel %vm828_vm1, %v1501_v43, 0.0 }
 0x23f   : > { %v1014_v41 = vpop.permute.xlu1 %1013 }
 0x240   : > { %1036 = vst.msk [vmem:[#allocation3 + $0x90] sm:$0xff] %vm828_vm1, %v1014_v41 }
 0x241   : > { %1527 = vadd.xlane.f32.xlu0 %v1526_v55  ;;  %914 = vrot.lane.b32.xlu1 %v6966_v51, %s6572_s30  ;;  %v7154_v55 = vld [vmem:[#allocation2 + $0x68] sm:$0xff] }
 0x243   : > { %v1113_v58 = vpop.permute.xlu1 %1112  ;;  %v7125_v22 = vld [vmem:[#allocation3 + $0x50] sm:$0xff] }
 0x244   : > { %1135 = vst.msk [vmem:[#allocation3 + $0xd0] sm:$0xff] %vm828_vm1, %v1113_v58  ;;  %v7091_v59 = vpop.xlane.xlu0 %1306  ;;  %v1504_v25 = vmul.f32 %v7125_v22, %v7125_v22  ;;  %v1329_v58 = vsel %vm828_vm1, %v1279_v53, 0.0 }
 0x245   : > { %1533 = vadd.xlane.f32.xlu0 %v1532_v60  ;;  %1021 = vrot.lane.b32.xlu1 %v6966_v51, %s6573_s28  ;;  %v1283_v60 = vmul.f32 %v7154_v55, %v7154_v55 }
 0x246   : > { %v1556_v28 = vsel %vm828_vm1, %v1504_v25, 0.0 }
 0x248   : > { %v1316_v63 = vpop.xlane.xlu0 %1315 }
 0x249   : > { %v1402_v2 = vmax.f32 %v1316_v63, 1e-24  ;;  %1539 = vadd.xlane.f32.xlu0 %v1538_v0  ;;  %1120 = vrot.lane.b32.xlu1 %v6966_v51, %s6574_s22  ;;  %v1326_v51 = vsel %vm828_vm1, %v1278_v10, 0.0  ;;  %v1341_v0 = vsel %vm828_vm1, %v1283_v60, 0.0  ;;  %v7209_v60 = vld [vmem:[#allocation3 + $0x88] sm:$0xff] }
 0x24b   : > { %6056 = vrsqrt.f32 %v1402_v2  ;;  %v1291_v2 = vmul.f32 %v1195_v61, %v1195_v61 }
 0x24c   : > { %v913_v6 = vpop.permute.xlu0 %912 }
 0x24d   : > { %1545 = vadd.xlane.f32.xlu0 %v1544_v4  ;;  %932 = vst.msk [vmem:[#allocation3 + $0x68] sm:$0xff] %vm828_vm1, %v913_v6  ;;  %v1365_v5 = vsel %vm828_vm1, %v1291_v2, 0.0  ;;  %v1282_v6 = vmul.f32 %v7167_v3, %v7167_v3  ;;  %v7215_v2 = vld [vmem:[#allocation2 + $0x70] sm:$0xff] }
 0x250   : > { %v1020_v11 = vpop.permute.xlu0 %1019 }
 0x251   : > { %1354 = vadd.xlane.f32.xlu0 %v1353_v9  ;;  %1039 = vst.msk [vmem:[#allocation3 + $0xa8] sm:$0xff] %vm828_vm1, %v1020_v11  ;;  %v7173_v9 = vld [vmem:[#allocation2 + $0x80] sm:$0xff] }
 0x252   : > { %v1286_v14 = vmul.f32 %v7173_v9, %v7173_v9 }
 0x254   : > { %v1119_v15 = vpop.permute.xlu0 %1118 }
 0x255   : > { %1327 = vadd.xlane.f32.xlu0 %v1326_v51  ;;  %1138 = vst.msk [vmem:[#allocation3 + $0xe8] sm:$0xff] %vm828_vm1, %v1119_v15  ;;  %v1338_v51 = vsel %vm828_vm1, %v1282_v6, 0.0  ;;  %v1192_v6 = vld [vmem:[#allocation2 + $0x90] sm:$0xff] }
 0x258   : > { %v6057_v18 = vpop.eup %6056 }
 0x259   : > { %1333 = vadd.xlane.f32.xlu0 %v1332_v19  ;;  %v1466_v21 = vmul.f32 %v6057_v18, %v6960_v47  ;;  %v1607_v47 = vsel %vm828_vm1, %v1521_v29, 0.0  ;;  %v7182_v19 = vld [vmem:[#allocation2 + $0xa0] sm:$0xff] }
 0x25b   : > { %v1762_v23 = vmul.f32 %v6971_v52, %v1466_v21 }
 0x25d   : > { %5713 = vmatprep.mubr.msk.f32.mxu0 %vm828_vm1, %v1762_v23  ;;  %1551 = vadd.xlane.f32.xlu0 %v1550_v24  ;;  %v1350_v23 = vsel %vm828_vm1, %v1286_v14, 0.0  ;;  %v1290_v24 = vmul.f32 %v7182_v19, %v7182_v19 }
 0x261   : > { %1557 = vadd.xlane.f32.xlu0 %v1556_v28  ;;  %v1281_v28 = vmul.f32 %v7192_v27, %v7192_v27 }
 0x265   : > { %1608 = vadd.xlane.f32.xlu0 %v1607_v47  ;;  %v1335_v47 = vsel %vm828_vm1, %v1281_v28, 0.0 }
 0x269   : > { %1387 = vadd.xlane.f32.xlu0 %v1386_v34  ;;  %v1193_v34 = vld [vmem:[#allocation2 + $0x98] sm:$0xff] }
 0x26d   : > { %1536 = vadd.xlane.f32.xlu1 %v1535_v37  ;;  %v1289_v37 = vmul.f32 %v1193_v34, %v1193_v34  ;;  %v7237_v34 = vld [vmem:[#allocation3 + $0x58] sm:$0xff] }
 0x26f   : > { %v1359_v43 = vsel %vm828_vm1, %v1289_v37, 0.0 }
 0x271   : > { %1542 = vadd.xlane.f32.xlu1 %v1541_v42  ;;  %v1197_v42 = vld [vmem:[#allocation2 + $0xb8] sm:$0xff] }
 0x274   : > { %v1304_v46 = vpop.xlane.xlu1 %1303 }
 0x275   : > { %v1398_v41 = vmax.f32 %v1304_v46, 1e-24  ;;  %1548 = vadd.xlane.f32.xlu1 %v1547_v50  ;;  %v1293_v46 = vmul.f32 %v1197_v42, %v1197_v42  ;;  %v7203_v50 = vld [vmem:[#allocation3 + $0x48] sm:$0xff]  ;;  %v1505_v42 = vmul.f32 %v7237_v34, %v7237_v34 }
 0x277   : > { %6058 = vrsqrt.f32 %v1398_v41  ;;  %v1371_v41 = vsel %vm828_vm1, %v1293_v46, 0.0  ;;  %v7242_v46 = vld [vmem:[#allocation3 + $0x98] sm:$0xff] }
 0x278   : > { %v7156_v56 = vpop.xlane.xlu1 %1312 }
 0x279   : > { %1330 = vadd.xlane.f32.xlu1 %v1329_v58  ;;  %v1503_v58 = vmul.f32 %v7203_v50, %v7203_v50 }
 0x27c   : > { %v7161_v63 = vpop.xlane.xlu1 %1324 }
 0x27d   : > { %1342 = vadd.xlane.f32.xlu1 %v1341_v0  ;;  %v1553_v0 = vsel %vm828_vm1, %v1503_v58, 0.0 }
 0x27f   : > { %1751 = vperm.xlu0 %6054, %v5342_v1   ;;  %v1511_v1 = vmul.f32 %v7209_v60, %v7209_v60 }
 0x280   : > { %v911_v4 = vpop.permute.xlu1 %910 }
 0x281   : > { %931 = vst.msk [vmem:[#allocation3 + $0x60] sm:$0xff] %vm828_vm1, %v911_v4  ;;  %1366 = vadd.xlane.f32.xlu1 %v1365_v5  ;;  %v1577_v4 = vsel %vm828_vm1, %v1511_v1, 0.0  ;;  %v1284_v5 = vmul.f32 %v7215_v2, %v7215_v2 }
 0x284   : > { %v6059_v10 = vpop.eup %6058  ;;  %v1018_v11 = vpop.permute.xlu1 %1017 }
 0x285   : > { %1038 = vst.msk [vmem:[#allocation3 + $0xa0] sm:$0xff] %vm828_vm1, %v1018_v11  ;;  %v7179_v15 = vpop.xlane.xlu0 %1309  ;;  %1339 = vadd.xlane.f32.xlu1 %v1338_v51  ;;  %v1462_v18 = vmul.f32 %v6059_v10, %v7010_v8  ;;  %v1362_v8 = vsel %vm828_vm1, %v1290_v24, 0.0  ;;  %v1344_v10 = vsel %vm828_vm1, %v1284_v5, 0.0  ;;  %v1288_v11 = vmul.f32 %v1192_v6, %v1192_v6  ;;  %v7221_v51 = vld [vmem:[#allocation3 + $0xc8] sm:$0xff]  ;;  %v7227_v24 = vld [vmem:[#allocation3 + $0x80] sm:$0xff] }
 0x286   : > { %v1510_v28 = vmul.f32 %v7227_v24, %v7227_v24  ;;  %v7254_v5 = vld [vmem:[#allocation2 + $0xc8] sm:$0xff]  ;;  %v1399_v6 = vmax.f32 %v7091_v59, 1e-24 }
 0x287   : > { %v1758_v20 = vmul.f32 %v6971_v52, %v1462_v18  ;;  %v1356_v14 = vsel %vm828_vm1, %v1288_v11, 0.0  ;;  %v1519_v18 = vmul.f32 %v7221_v51, %v7221_v51 }
 0x288   : > { %v1117_v21 = vpop.permute.xlu1 %1116  ;;  %v1574_v31 = vsel %vm828_vm1, %v1510_v28, 0.0 }
 0x289   : > { %1137 = vst.msk [vmem:[#allocation3 + $0xe0] sm:$0xff] %vm828_vm1, %v1117_v21  ;;  %v7189_v25 = vpop.xlane.xlu0 %1321  ;;  %1351 = vadd.xlane.f32.xlu1 %v1350_v23  ;;  %5699 = vmatprep.mubr.msk.f32.mxu1 %vm828_vm1, %v1758_v20  ;;  %v1196_v20 = vld [vmem:[#allocation2 + $0xb0] sm:$0xff]  ;;  %v1601_v21 = vsel %vm828_vm1, %v1519_v18, 0.0 }
 0x28a   : > { %v1292_v23 = vmul.f32 %v1196_v20, %v1196_v20  ;;  %v1200_v20 = vld [vmem:[#allocation2 + $0xd0] sm:$0xff] }
 0x28b   : > { %v1296_v28 = vmul.f32 %v1200_v20, %v1200_v20  ;;  %v5331_v20 = vld [vmem:[%s8228_s5] ss:$0 sm:$0xff] }
 0x28d   : > { %1363 = vadd.xlane.f32.xlu1 %v1362_v8  ;;  %v917_v29 = vpop.permute.xlu0 %916  ;;  %v1368_v8 = vsel %vm828_vm1, %v1292_v23, 0.0 }
 0x28e   : > { %934 = vst.msk [vmem:[#allocation3 + $0x78] sm:$0xff] %vm828_vm1, %v917_v29  ;;  %v7232_v29 = vld [vmem:[#allocation3 + $0xc0] sm:$0xff] }
 0x291   : > { %1336 = vadd.xlane.f32.xlu1 %v1335_v47  ;;  %v1518_v47 = vmul.f32 %v7232_v29, %v7232_v29 }
 0x293   : > { %v1598_v37 = vsel %vm828_vm1, %v1518_v47, 0.0 }
 0x295   : > { %v7200_v38 = vpop.permute.xlu0 %1747  ;;  %1348 = vadd.xlane.f32.xlu1 %v1347_v35 }
 0x299   : > { %1360 = vadd.xlane.f32.xlu1 %v1359_v43  ;;  %v1024_v53 = vpop.permute.xlu0 %1023 }
 0x29a   : > { %1041 = vst.msk [vmem:[#allocation3 + $0xb8] sm:$0xff] %vm828_vm1, %v1024_v53  ;;  %v1559_v53 = vsel %vm828_vm1, %v1505_v42, 0.0 }
 0x29d   : > { %1372 = vadd.xlane.f32.xlu1 %v1371_v41  ;;  %v1123_v61 = vpop.permute.xlu0 %1122  ;;  %v1513_v41 = vmul.f32 %v7242_v46, %v7242_v46 }
 0x29e   : > { %1140 = vst.msk [vmem:[#allocation3 + $0xf8] sm:$0xff] %vm828_vm1, %v1123_v61  ;;  %v7248_v61 = vld [vmem:[#allocation2 + $0xc0] sm:$0xff] }
 0x29f   : > { %v1294_v1 = vmul.f32 %v7248_v61, %v7248_v61 }
 0x2a1   : > { %1554 = vadd.xlane.f32.xlu1 %v1553_v0  ;;  %v1583_v0 = vsel %vm828_vm1, %v1513_v41, 0.0  ;;  %v1374_v11 = vsel %vm828_vm1, %v1294_v1, 0.0 }
 0x2a5   : > { %1578 = vadd.xlane.f32.xlu1 %v1577_v4 }
 0x2a9   : > { %1345 = vadd.xlane.f32.xlu1 %v1344_v10  ;;  %v1400_v10 = vmax.f32 %v7179_v15, 1e-24  ;;  %v1201_v15 = vld [vmem:[#allocation2 + $0xd8] sm:$0xff] }
 0x2aa   : > { %v1297_v47 = vmul.f32 %v1201_v15, %v1201_v15  ;;  %v7292_v15 = vld [vmem:[#allocation3 + $0x68] sm:$0xff] }
 0x2ad   : > { %1357 = vadd.xlane.f32.xlu1 %v1356_v14  ;;  %v1295_v14 = vmul.f32 %v7254_v5, %v7254_v5 }
 0x2af   : > { %v1377_v59 = vsel %vm828_vm1, %v1295_v14, 0.0  ;;  %v5685_v14 = vpop.f32.mrf.mxu0 }
 0x2b1   : > { %1602 = vadd.xlane.f32.xlu1 %v1601_v21 }
 0x2b5   : > { %1369 = vadd.xlane.f32.xlu1 %v1368_v8 }
 0x2b9   : > { %1575 = vadd.xlane.f32.xlu1 %v1574_v31  ;;  %v1531_v32 = vpop.xlane.xlu1 %1530  ;;  %v1380_v31 = vsel %vm828_vm1, %v1296_v28, 0.0 }
 0x2ba   : > { %v1623_v35 = vmax.f32 %v1531_v32, 1e-24  ;;  %v1203_v32 = vld [vmem:[#allocation2 + $0xe8] sm:$0xff] }
 0x2bc   : > { %6060 = vrsqrt.f32 %v1623_v35  ;;  %v1299_v35 = vmul.f32 %v1203_v32, %v1203_v32 }
 0x2bd   : > { %1599 = vadd.xlane.f32.xlu1 %v1598_v37  ;;  %v915_v43 = vpop.permute.xlu1 %914  ;;  %6062 = vrsqrt.f32 %v1399_v6  ;;  %v1204_v37 = vld [vmem:[#allocation2 + $0xf0] sm:$0xff] }
 0x2be   : > { %933 = vst.msk [vmem:[#allocation3 + $0x70] sm:$0xff] %vm828_vm1, %v915_v43  ;;  %6064 = vrsqrt.f32 %v1400_v10  ;;  %v1389_v43 = vsel %vm828_vm1, %v1299_v35, 0.0 }
 0x2c1   : > { %1560 = vadd.xlane.f32.xlu1 %v1559_v53  ;;  %v1022_v58 = vpop.permute.xlu1 %1021  ;;  %v1300_v53 = vmul.f32 %v1204_v37, %v1204_v37  ;;  %v7306_v37 = vld [vmem:[#allocation3 + $0xa8] sm:$0xff] }
 0x2c2   : > { %1040 = vst.msk [vmem:[#allocation3 + $0xb0] sm:$0xff] %vm828_vm1, %v1022_v58  ;;  %v7269_v58 = vld [vmem:[#allocation3 + $0x90] sm:$0xff] }
 0x2c3   : > { %v1392_v6 = vsel %vm828_vm1, %v1300_v53, 0.0  ;;  %v1512_v10 = vmul.f32 %v7269_v58, %v7269_v58 }
 0x2c5   : > { %1584 = vadd.xlane.f32.xlu1 %v1583_v0  ;;  %v1121_v4 = vpop.permute.xlu1 %1120 }
 0x2c6   : > { %1139 = vst.msk [vmem:[#allocation3 + $0xf0] sm:$0xff] %vm828_vm1, %v1121_v4 }
 0x2c9   : > { %v6061_v18 = vpop.eup %6060  ;;  %1375 = vadd.xlane.f32.xlu1 %v1374_v11 }
 0x2ca   : > { %v1528_v21 = vpop.xlane.xlu0 %1527  ;;  %v1687_v23 = vmul.f32 %v6061_v18, %v7068_v44  ;;  %v1383_v44 = vsel %vm828_vm1, %v1297_v47, 0.0  ;;  %v6063_v42 = vpop.eup %6062  ;;  %v1232_v18 = vld [vmem:[#allocation3 + $0xd0] sm:$0xff] }
 0x2cb   : > { %v1622_v8 = vmax.f32 %v1528_v21, 1e-24  ;;  %v6065_v41 = vpop.eup %6064  ;;  %v1463_v1 = vmul.f32 %v6063_v42, %v6956_v45  ;;  %v7282_v45 = vadd.f32 %v5685_v14, %v5331_v20  ;;  %v1520_v28 = vmul.f32 %v1232_v18, %v1232_v18 }
 0x2cc   : > { %5695 = vmatprep.subr.msk.mxu1 %vm828_vm1, %v1687_v23  ;;  %v1464_v11 = vmul.f32 %v6065_v41, %v7033_v26  ;;  %v1580_v26 = vsel %vm828_vm1, %v1512_v10, 0.0 }
 0x2cd   : > { %6066 = vrsqrt.f32 %v1622_v8  ;;  %1378 = vadd.xlane.f32.xlu1 %v1377_v59  ;;  %5696 = vmatpush3.xpose.msk.msra.mxu1 %vm828_vm1, %v1687_v23  ;;  %v1759_v21 = vmul.f32 %v6971_v52, %v1463_v1  ;;  %846 = vst.msk [vmem:[#allocation4 + $0x8] sm:$0xff] %vm828_vm1, %v7282_v45  ;;  %v1604_v32 = vsel %vm828_vm1, %v1520_v28, 0.0  ;;  %v1515_v1 = vmul.f32 %v7306_v37, %v7306_v37 }
 0x2ce   : > { %v1534_v8 = vpop.xlane.xlu0 %1533  ;;  %v1760_v59 = vmul.f32 %v6971_v52, %v1464_v11 }
 0x2cf   : > { %v1589_v14 = vsel %vm828_vm1, %v1515_v1, 0.0  ;;  %v7358_v1 = vld [vmem:[#allocation3 + $0xe0] sm:$0xff] }
 0x2d0   : > { %8274 = vst [vmem:[#allocation26_spill] sm:$0xff] %v7358_v1 }
 0x2d1   : > { %1381 = vadd.xlane.f32.xlu1 %v1380_v31 }
 0x2d5   : > { %1384 = vadd.xlane.f32.xlu1 %v1383_v44  ;;  %v1507_v44 = vmul.f32 %v7292_v15, %v7292_v15 }
 0x2d9   : > { %1390 = vadd.xlane.f32.xlu1 %v1389_v43  ;;  %v1540_v43 = vpop.xlane.xlu0 %1539 }
 0x2da   : > { %v6067_v0 = vpop.eup %6066 }
 0x2db   : > { %v1686_v4 = vmul.f32 %v6067_v0, %v7075_v49  ;;  %v789_v49 = vpop.f32.mrf.mxu0  ;;  %v1565_v0 = vsel %vm828_vm1, %v1507_v44, 0.0  ;;  %v7347_v44 = vld [vmem:[#allocation3 + $0xa0] sm:$0xff] }
 0x2dc   : > { %v7285_v23 = vadd.f32 %v5331_v20, %v789_v49 }
 0x2dd   : > { %1393 = vadd.xlane.f32.xlu1 %v1392_v6  ;;  %5697 = vmatprep.subr.msk.mxu1 %vm828_vm1, %v1686_v4  ;;  %v5688_v31 = vpop.f32.mrf.mxu0  ;;  %v7327_v11 = vpop.xlane.xlu0 %1545 }
 0x2de   : > { %5698 = vmatpush3.xpose.msk.msra.mxu1 %vm828_vm1, %v1686_v4  ;;  %8271 = vst [vmem:[#allocation23_spill] sm:$0xff] %v7285_v23  ;;  %845 = vst.msk [vmem:[#allocation4] sm:$0xff] %vm828_vm1, %v7285_v23  ;;  %943 = vrot.lane.b32.xlu0 %v7285_v23, %s6572_s30  ;;  %v7299_v47 = vadd.f32 %v5688_v31, %v5331_v20  ;;  %v7319_v4 = vld [vmem:[#allocation3 + $0xe8] sm:$0xff] }
 0x2df   : > { %v799_v35 = vpop.f32.mrf.mxu0  ;;  %v1523_v18 = vmul.f32 %v7319_v4, %v7319_v4 }
 0x2e0   : > { %848 = vst.msk [vmem:[#allocation4 + $0x18] sm:$0xff] %vm828_vm1, %v7299_v47  ;;  %v7308_v42 = vadd.f32 %v5331_v20, %v799_v35 }
 0x2e1   : > { %1581 = vadd.xlane.f32.xlu1 %v1580_v26  ;;  %5700 = vmatmul.mubr.msk.f32.vlgmr.msra.gmra.mxu1 %vm828_vm1, %v1759_v21  ;;  %v5691_v53 = vpop.f32.mrf.mxu0  ;;  %v7334_v21 = vld [vmem:[#allocation3 + $0x60] sm:$0xff]  ;;  %v1613_v31 = vsel %vm828_vm1, %v1523_v18, 0.0  ;;  %v7351_v35 = vpop.xlane.xlu0 %1354  ;;  %v1404_v18 = vmax.f32 %v7189_v25, 1e-24  ;;  %v1403_v25 = vmax.f32 %v7073_v48, 1e-24 }
 0x2e2   : > { %5706 = vmatprep.mubr.msk.f32.mxu1 %vm828_vm1, %v1760_v59  ;;  %949 = vrot.lane.b32.xlu0 %v7299_v47, %s6572_s30  ;;  %847 = vst.msk [vmem:[#allocation4 + $0x10] sm:$0xff] %vm828_vm1, %v7308_v42  ;;  %v7314_v41 = vadd.f32 %v5691_v53, %v5331_v20  ;;  %v1624_v53 = vmax.f32 %v1534_v8, 1e-24 }
 0x2e3   : > { %v809_v6 = vpop.f32.mrf.mxu0 }
 0x2e4   : > { %850 = vst.msk [vmem:[#allocation4 + $0x28] sm:$0xff] %vm828_vm1, %v7314_v41  ;;  %v7325_v10 = vadd.f32 %v5331_v20, %v809_v6  ;;  %v1401_v6 = vmax.f32 %v7156_v56, 1e-24  ;;  %6068 = vrsqrt.f32 %v1624_v53 }
 0x2e5   : > { %1605 = vadd.xlane.f32.xlu1 %v1604_v32  ;;  %v5694_v49 = vpop.f32.mrf.mxu0  ;;  %v1506_v32 = vmul.f32 %v7334_v21, %v7334_v21  ;;  %v1328_v8 = vpop.xlane.xlu0 %1327 }
 0x2e6   : > { %953 = vrot.lane.b32.xlu0 %v7314_v41, %s6572_s30  ;;  %849 = vst.msk [vmem:[#allocation4 + $0x20] sm:$0xff] %vm828_vm1, %v7325_v10  ;;  %v7336_v26 = vadd.f32 %v5694_v49, %v5331_v20 }
 0x2e7   : > { %v819_v59 = vpop.f32.mrf.mxu0 }
 0x2e8   : > { %8272 = vst [vmem:[#allocation24_spill] sm:$0xff] %v7336_v26  ;;  %852 = vst.msk [vmem:[#allocation4 + $0x38] sm:$0xff] %vm828_vm1, %v7336_v26  ;;  %v7342_v28 = vadd.f32 %v5331_v20, %v819_v59  ;;  %v1562_v20 = vsel %vm828_vm1, %v1506_v32, 0.0  ;;  %v1626_v59 = vmax.f32 %v1540_v43, 1e-24  ;;  %v1522_v32 = vmul.f32 %v7358_v1, %v7358_v1 }
 0x2e9   : > { %1566 = vadd.xlane.f32.xlu1 %v1565_v0  ;;  %v1514_v0 = vmul.f32 %v7347_v44, %v7347_v44  ;;  %v1406_v43 = vmax.f32 %v1328_v8, 1e-24 }
 0x2ea   : > { %1044 = vrot.lane.b32.xlu0 %v7282_v45, %s6573_s28  ;;  %8273 = vst [vmem:[#allocation25_spill] sm:$0xff] %v7342_v28  ;;  %851 = vst.msk [vmem:[#allocation4 + $0x30] sm:$0xff] %vm828_vm1, %v7342_v28 }
 0x2ed   : > { %1590 = vadd.xlane.f32.xlu1 %v1589_v14 }
 0x2ee   : > { %955 = vrot.lane.b32.xlu0 %v7342_v28, %s6572_s30 }
 0x2f1   : > { %1614 = vadd.xlane.f32.xlu1 %v1613_v31  ;;  %v1586_v31 = vsel %vm828_vm1, %v1514_v0, 0.0  ;;  %v1610_v0 = vsel %vm828_vm1, %v1522_v32, 0.0 }
 0x2f2   : > { %1042 = vrot.lane.b32.xlu0 %v7285_v23, %s6573_s28 }
 0x2f5   : > { %1563 = vadd.xlane.f32.xlu1 %v1562_v20  ;;  %v7367_v20 = vld [vmem:[#allocation3 + $0x78] sm:$0xff] }
 0x2f6   : > { %v1537_v14 = vpop.xlane.xlu1 %1536  ;;  %1046 = vrot.lane.b32.xlu0 %v7308_v42, %s6573_s28 }
 0x2f7   : > { %v1625_v49 = vmax.f32 %v1537_v14, 1e-24  ;;  %v1509_v14 = vmul.f32 %v7367_v20, %v7367_v20 }
 0x2f9   : > { %6070 = vrsqrt.f32 %v1625_v49  ;;  %1587 = vadd.xlane.f32.xlu1 %v1586_v31  ;;  %v7375_v49 = vld [vmem:[#allocation3 + $0xb8] sm:$0xff]  ;;  %v1334_v31 = vpop.xlane.xlu0 %1333 }
 0x2fa   : > { %6072 = vrsqrt.f32 %v1401_v6  ;;  %v1543_v56 = vpop.xlane.xlu1 %1542  ;;  %8275 = vst [vmem:[#allocation27_spill] sm:$0xff] %v7375_v49  ;;  %v1628_v6 = vmax.f32 %v7327_v11, 1e-24  ;;  %1050 = vrot.lane.b32.xlu0 %v7325_v10, %s6573_s28  ;;  %v1517_v8 = vmul.f32 %v7375_v49, %v7375_v49  ;;  %v1408_v32 = vmax.f32 %v1334_v31, 1e-24  ;;  %v7421_v49 = vld [vmem:[#allocation3 + $0xb0] sm:$0xff] }
 0x2fb   : > { %6074 = vrsqrt.f32 %v1404_v18  ;;  %v1627_v53 = vmax.f32 %v1543_v56, 1e-24  ;;  %v1405_v18 = vmax.f32 %v7161_v63, 1e-24  ;;  %v7384_v56 = vld [vmem:[#allocation3 + $0xf8] sm:$0xff] }
 0x2fc   : > { %6076 = vrsqrt.f32 %v1626_v59  ;;  %v1571_v59 = vsel %vm828_vm1, %v1509_v14, 0.0  ;;  %8276 = vst [vmem:[#allocation28_spill] sm:$0xff] %v7384_v56  ;;  %v1595_v63 = vsel %vm828_vm1, %v1517_v8, 0.0 }
 0x2fd   : > { %6078 = vrsqrt.f32 %v1627_v53  ;;  %1611 = vadd.xlane.f32.xlu1 %v1610_v0  ;;  %v7393_v53 = vld [vmem:[#allocation3 + $0x70] sm:$0xff] }
 0x2fe   : > { %v1549_v23 = vpop.xlane.xlu1 %1548  ;;  %6080 = vrsqrt.f32 %v1403_v25  ;;  %1056 = vrot.lane.b32.xlu0 %v7336_v26, %s6573_s28  ;;  %v6069_v25 = vpop.eup %6068 }
 0x2ff   : > { %v1629_v48 = vmax.f32 %v1549_v23, 1e-24  ;;  %6082 = vrsqrt.f32 %v1406_v43  ;;  %v1525_v23 = vmul.f32 %v7384_v56, %v7384_v56  ;;  %v1688_v8 = vmul.f32 %v6069_v25, %v7080_v54 }
 0x301   : > { %6084 = vrsqrt.f32 %v1629_v48  ;;  %1572 = vadd.xlane.f32.xlu1 %v1571_v59  ;;  %v1619_v48 = vsel %vm828_vm1, %v1525_v23, 0.0 }
 0x302   : > { %6086 = vrsqrt.f32 %v1628_v6  ;;  %v7386_v11 = vpop.xlane.xlu1 %1330  ;;  %1143 = vrot.lane.b32.xlu0 %v7282_v45, %s6574_s22 }
 0x303   : > { %6088 = vrsqrt.f32 %v1405_v18  ;;  %v1508_v18 = vmul.f32 %v7393_v53, %v7393_v53 }
 0x304   : > { %6090 = vrsqrt.f32 %v1408_v32  ;;  %v7405_v32 = vld [vmem:[#allocation2 + $0xf8] sm:$0xff] }
 0x305   : > { %1596 = vadd.xlane.f32.xlu1 %v1595_v63  ;;  %v1301_v54 = vmul.f32 %v7405_v32, %v7405_v32 }
 0x306   : > { %v6071_v43 = vpop.eup %6070  ;;  %v7395_v0 = vpop.xlane.xlu1 %1342  ;;  %1054 = vrot.lane.b32.xlu0 %v7342_v28, %s6573_s28 }
 0x307   : > { %v6073_v14 = vpop.eup %6072  ;;  %v1689_v6 = vmul.f32 %v6071_v43, %v7134_v33 }
 0x308   : > { %v6075_v31 = vpop.eup %6074  ;;  %v1465_v23 = vmul.f32 %v6073_v14, %v7016_v12  ;;  %v6312_v14 = vld [vmem:[#allocation2 + $0x28] sm:$0xff] }
 0x309   : > { %v6077_v59 = vpop.eup %6076  ;;  %1620 = vadd.xlane.f32.xlu1 %v1619_v48  ;;  %5702 = vmatprep.subr.msk.mxu1 %vm828_vm1, %v1689_v6  ;;  %v1568_v48 = vsel %vm828_vm1, %v1508_v18, 0.0  ;;  %v1468_v28 = vmul.f32 %v6075_v31, %v7039_v30  ;;  %v1516_v30 = vmul.f32 %v7421_v49, %v7421_v49 }
 0x30a   : > { %v6079_v63 = vpop.eup %6078  ;;  %5703 = vmatpush3.xpose.msk.msra.mxu1 %vm828_vm1, %v1689_v6  ;;  %v7408_v56 = vpop.xlane.xlu1 %1366  ;;  %v1690_v6 = vmul.f32 %v6077_v59, %v7088_v57  ;;  %v1395_v57 = vsel %vm828_vm1, %v1301_v54, 0.0 }
 0x30b   : > { %5704 = vmatprep.subr.msk.mxu1 %vm828_vm1, %v1688_v8  ;;  %v1691_v33 = vmul.f32 %v6079_v63, %v7139_v36  ;;  %v6081_v43 = vpop.eup %6080  ;;  %v1761_v63 = vmul.f32 %v6971_v52, %v1465_v23 }
 0x30c   : > { %v6083_v25 = vpop.eup %6082  ;;  %v1467_v18 = vmul.f32 %v6312_v14, %v6081_v43 }
 0x30d   : > { %1569 = vadd.xlane.f32.xlu1 %v1568_v48  ;;  %5709 = vmatprep.subr.msk.mxu0 %vm828_vm1, %v1691_v33  ;;  %v1470_v31 = vmul.f32 %v6083_v25, %v7106_v7 }
 0x30e   : > { %v6085_v1 = vpop.eup %6084  ;;  %5705 = vmatpush3.xpose.msk.msra.mxu1 %vm828_vm1, %v1688_v8  ;;  %5710 = vmatpush3.xpose.msk.msra.mxu0 %vm828_vm1, %v1691_v33  ;;  %v1340_v12 = vpop.xlane.xlu1 %1339  ;;  %v1764_v8 = vmul.f32 %v6971_v52, %v1468_v28  ;;  %v7434_v33 = vld [vmem:[#allocation3 + $0xf0] sm:$0xff]  ;;  %v1763_v7 = vmul.f32 %v6971_v52, %v1467_v18  ;;  %v1592_v28 = vsel %vm828_vm1, %v1516_v30, 0.0  ;;  %v5343_v30 = vld [vmem:[%s8229_s6 + $0x3] ss:$0 sm:$0xff] }
 0x30f   : > { %v6087_v36 = vpop.eup %6086  ;;  %5711 = vmatprep.subr.msk.mxu0 %vm828_vm1, %v1690_v6  ;;  %v1693_v48 = vmul.f32 %v6085_v1, %v7144_v39  ;;  %v1766_v23 = vmul.f32 %v7200_v38, %v1470_v31  ;;  %v1524_v54 = vmul.f32 %v7434_v33, %v7434_v33 }
 0x310   : > { %v6089_v59 = vpop.eup %6088  ;;  %v1692_v1 = vmul.f32 %v6087_v36, %v7098_v62 }
 0x311   : > { %1396 = vadd.xlane.f32.xlu1 %v1395_v57  ;;  %5707 = vmatmul.mubr.msk.f32.vlgmr.msra.gmra.mxu1 %vm828_vm1, %v1761_v63  ;;  %v6091_v43 = vpop.eup %6090  ;;  %v1469_v25 = vmul.f32 %v6089_v59, %v7023_v17  ;;  %v1616_v36 = vsel %vm828_vm1, %v1524_v54, 0.0  ;;  %v1407_v59 = vmax.f32 %v7386_v11, 1e-24 }
 0x312   : > { %5716 = vmatprep.subr.msk.mxu1 %vm828_vm1, %v1693_v48  ;;  %5712 = vmatpush3.xpose.msk.msra.mxu0 %vm828_vm1, %v1690_v6  ;;  %v7438_v39 = vpop.xlane.xlu1 %1351  ;;  %v1472_v62 = vmul.f32 %v6091_v43, %v7112_v13  ;;  %v1410_v43 = vmax.f32 %v1340_v12, 1e-24 }
 0x313   : > { %5717 = vmatpush3.xpose.msk.msra.mxu1 %vm828_vm1, %v1693_v48  ;;  %5720 = vmatprep.mubr.msk.f32.mxu1 %vm828_vm1, %v1764_v8  ;;  %v1765_v14 = vmul.f32 %v6971_v52, %v1469_v25  ;;  %v1552_v48 = vpop.xlane.xlu0 %1551 }
 0x314   : > { %5718 = vmatprep.subr.msk.mxu1 %vm828_vm1, %v1692_v1  ;;  %v1768_v18 = vmul.f32 %v7200_v38, %v1472_v62  ;;  %v1630_v52 = vmax.f32 %v1552_v48, 1e-24 }
 0x315   : > { %1593 = vadd.xlane.f32.xlu1 %v1592_v28  ;;  %5714 = vmatmul.mubr.msk.f32.vlgmr.msra.gmra.mxu0 %vm828_vm1, %v1763_v7 }
 0x316   : > { %5727 = vmatprep.mubr.msk.f32.mxu0 %vm828_vm1, %v1766_v23  ;;  %v7453_v6 = vpop.xlane.xlu1 %1363  ;;  %6092 = vrsqrt.f32 %v1630_v52 }
 0x317   : > { %5719 = vmatpush3.xpose.msk.msra.mxu1 %vm828_vm1, %v1692_v1 }
 0x319   : > { %1617 = vadd.xlane.f32.xlu1 %v1616_v36 }
 0x31a   : > { %5721 = vmatmul.mubr.msk.f32.vlgmr.msra.gmra.mxu1 %vm828_vm1, %v1765_v14  ;;  %v1337_v17 = vpop.xlane.xlu1 %1336 }
 0x31b   : > { %5734 = vmatprep.mubr.msk.f32.mxu1 %vm828_vm1, %v1768_v18 }
 0x31e   : > { %v7461_v63 = vpop.xlane.xlu1 %1348 }
 0x322   : > { %v7463_v13 = vpop.xlane.xlu1 %1360 }
 0x323   : > { %v6093_v11 = vpop.eup %6092 }
 0x324   : > { %v1694_v62 = vmul.f32 %v6093_v11, %v7118_v16 }
 0x326   : > { %v7465_v57 = vpop.xlane.xlu1 %1372 }
 0x32a   : > { %v1555_v31 = vpop.xlane.xlu1 %1554  ;;  %1755 = vperm.xlu1 %6055, %v5343_v30   ;;  %v1558_v30 = vpop.xlane.xlu0 %1557 }
 0x32b   : > { %v1631_v8 = vmax.f32 %v1555_v31, 1e-24  ;;  %v1409_v31 = vmax.f32 %v1337_v17, 1e-24 }
 0x32d   : > { %6094 = vrsqrt.f32 %v1631_v8 }
 0x32e   : > { %v7471_v1 = vpop.xlane.xlu1 %1578  ;;  %945 = vrot.lane.b32.xlu1 %v7282_v45, %s6572_s30  ;;  %6096 = vrsqrt.f32 %v1407_v59 }
 0x32f   : > { %6098 = vrsqrt.f32 %v1410_v43 }
 0x332   : > { %v1346_v7 = vpop.xlane.xlu1 %1345  ;;  %947 = vrot.lane.b32.xlu1 %v7308_v42, %s6572_s30 }
 0x333   : > { %v1412_v8 = vmax.f32 %v1346_v7, 1e-24 }
 0x336   : > { %v7477_v28 = vpop.xlane.xlu1 %1357  ;;  %951 = vrot.lane.b32.xlu1 %v7325_v10, %s6572_s30 }
 0x33a   : > { %v6095_v23 = vpop.eup %6094  ;;  %v7481_v12 = vpop.xlane.xlu1 %1602  ;;  %957 = vrot.lane.b32.xlu1 %v7336_v26, %s6572_s30  ;;  %v1418_v26 = vmax.f32 %v7453_v6, 1e-24  ;;  %v1419_v6 = vmax.f32 %v7408_v56, 1e-24  ;;  %s6577_s30 = smov 24  }
 0x33b   : > { %v1695_v45 = vmul.f32 %v6095_v23, %v7203_v50  ;;  %v6097_v54 = vpop.eup %6096  ;;  %v7511_v23 = vpop.xlane.xlu0 %1608 }
 0x33c   : > { %v6099_v25 = vpop.eup %6098  ;;  %v1471_v14 = vmul.f32 %v6097_v54, %v7149_v40  ;;  %v1632_v40 = vmax.f32 %v1558_v30, 1e-24 }
 0x33d   : > { %5723 = vmatprep.subr.msk.mxu0 %vm828_vm1, %v1695_v45  ;;  %v1474_v18 = vmul.f32 %v6099_v25, %v7167_v3 }
 0x33e   : > { %5724 = vmatpush3.xpose.msk.msra.mxu0 %vm828_vm1, %v1695_v45  ;;  %v7489_v36 = vpop.xlane.xlu1 %1369  ;;  %1048 = vrot.lane.b32.xlu1 %v7299_v47, %s6573_s28  ;;  %v1767_v16 = vmul.f32 %v7200_v38, %v1471_v14  ;;  %6100 = vrsqrt.f32 %v1632_v40 }
 0x33f   : > { %5725 = vmatprep.subr.msk.mxu0 %vm828_vm1, %v1694_v62  ;;  %v1770_v48 = vmul.f32 %v7200_v38, %v1474_v18 }
 0x342   : > { %5726 = vmatpush3.xpose.msk.msra.mxu0 %vm828_vm1, %v1694_v62  ;;  %v7497_v50 = vpop.xlane.xlu1 %1575  ;;  %1052 = vrot.lane.b32.xlu1 %v7314_v41, %s6573_s28  ;;  %v7515_v62 = vpop.xlane.xlu0 %1387 }
 0x345   : > { %5728 = vmatmul.mubr.msk.f32.vlgmr.msra.gmra.mxu0 %vm828_vm1, %v1767_v16 }
 0x346   : > { %5741 = vmatprep.mubr.msk.f32.mxu0 %vm828_vm1, %v1770_v48  ;;  %v7505_v52 = vpop.xlane.xlu1 %1599  ;;  %v7522_v48 = vpop.permute.xlu0 %1751 }
 0x34a   : > { %v1561_v3 = vpop.xlane.xlu1 %1560 }
 0x34b   : > { %v1633_v59 = vmax.f32 %v1561_v3, 1e-24  ;;  %v6101_v54 = vpop.eup %6100 }
 0x34c   : > { %v1696_v16 = vmul.f32 %v6101_v54, %v7125_v22 }
 0x34d   : > { %6102 = vrsqrt.f32 %v1633_v59 }
 0x34e   : > { %v7507_v43 = vpop.xlane.xlu1 %1584  ;;  %6104 = vrsqrt.f32 %v1409_v31 }
 0x34f   : > { %6106 = vrsqrt.f32 %v1412_v8 }
 0x350   : > { %v944_v31 = vpop.permute.xlu0 %943 }
 0x351   : > { %968 = vst.msk [vmem:[#allocation4 + $0x40] sm:$0xff] %vm828_vm1, %v944_v31  ;;  %v1639_v31 = vmax.f32 %v7471_v1, 1e-24 }
 0x352   : > { %v7509_v11 = vpop.xlane.xlu1 %1375 }
 0x356   : > { %v7513_v45 = vpop.xlane.xlu1 %1378 }
 0x35a   : > { %v6103_v25 = vpop.eup %6102  ;;  %v7517_v14 = vpop.xlane.xlu1 %1381 }
 0x35b   : > { %v1697_v17 = vmul.f32 %v6103_v25, %v7237_v34  ;;  %v6105_v7 = vpop.eup %6104 }
 0x35c   : > { %v6107_v18 = vpop.eup %6106  ;;  %v1473_v40 = vmul.f32 %v6105_v7, %v7192_v27  ;;  %v950_v27 = vpop.permute.xlu0 %949 }
 0x35d   : > { %5730 = vmatprep.subr.msk.mxu1 %vm828_vm1, %v1697_v17  ;;  %v1476_v3 = vmul.f32 %v6107_v18, %v7215_v2  ;;  %971 = vst.msk [vmem:[#allocation4 + $0x58] sm:$0xff] %vm828_vm1, %v950_v27  ;;  %v1638_v27 = vmax.f32 %v7497_v50, 1e-24 }
 0x35e   : > { %5731 = vmatpush3.xpose.msk.msra.mxu1 %vm828_vm1, %v1697_v17  ;;  %v7525_v30 = vpop.xlane.xlu1 %1384  ;;  %v1769_v59 = vmul.f32 %v7200_v38, %v1473_v40 }
 0x35f   : > { %5732 = vmatprep.subr.msk.mxu1 %vm828_vm1, %v1696_v16  ;;  %v1772_v22 = vmul.f32 %v7200_v38, %v1476_v3  ;;  %v1414_v3 = vmax.f32 %v7438_v39, 1e-24 }
 0x360   : > { %v954_v54 = vpop.permute.xlu0 %953 }
 0x361   : > { %973 = vst.msk [vmem:[#allocation4 + $0x68] sm:$0xff] %vm828_vm1, %v954_v54 }
 0x362   : > { %5733 = vmatpush3.xpose.msk.msra.mxu1 %vm828_vm1, %v1696_v16  ;;  %v7531_v34 = vpop.xlane.xlu1 %1390  ;;  %v1411_v16 = vmax.f32 %v7395_v0, 1e-24 }
 0x365   : > { %5735 = vmatmul.mubr.msk.f32.vlgmr.msra.gmra.mxu1 %vm828_vm1, %v1769_v59 }
 0x366   : > { %5748 = vmatprep.mubr.msk.f32.mxu1 %vm828_vm1, %v1772_v22  ;;  %v7538_v8 = vpop.xlane.xlu1 %1393 }
 0x36a   : > { %v7541_v2 = vpop.xlane.xlu1 %1581 }
 0x36e   : > { %v7544_v25 = vpop.xlane.xlu1 %1605 }
 0x372   : > { %v1567_v17 = vpop.xlane.xlu1 %1566 }
 0x373   : > { %v1635_v7 = vmax.f32 %v1567_v17, 1e-24 }
 0x375   : > { %6108 = vrsqrt.f32 %v1635_v7  ;;  %v1415_v7 = vmax.f32 %v7351_v35, 1e-24 }
 0x376   : > { %v1591_v18 = vpop.xlane.xlu1 %1590  ;;  %6110 = vrsqrt.f32 %v1411_v16  ;;  %v1045_v16 = vpop.permute.xlu0 %1044 }
 0x377   : > { %6112 = vrsqrt.f32 %v1414_v3  ;;  %v1643_v39 = vmax.f32 %v1591_v18, 1e-24  ;;  %1068 = vst.msk [vmem:[#allocation4 + $0x88] sm:$0xff] %vm828_vm1, %v1045_v16  ;;  %v1422_v16 = vmax.f32 %v7509_v11, 1e-24 }
 0x378   : > { %6114 = vrsqrt.f32 %v1639_v31 }
 0x37a   : > { %v7547_v40 = vpop.xlane.xlu1 %1614  ;;  %v956_v3 = vpop.permute.xlu0 %955 }
 0x37b   : > { %974 = vst.msk [vmem:[#allocation4 + $0x70] sm:$0xff] %vm828_vm1, %v956_v3 }
 0x37e   : > { %v1564_v59 = vpop.xlane.xlu1 %1563 }
 0x37f   : > { %v1634_v22 = vmax.f32 %v1564_v59, 1e-24 }
 0x381   : > { %6116 = vrsqrt.f32 %v1634_v22  ;;  %v1647_v22 = vmax.f32 %v7481_v12, 1e-24 }
 0x382   : > { %v6109_v54 = vpop.eup %6108  ;;  %v1588_v17 = vpop.xlane.xlu1 %1587  ;;  %6118 = vrsqrt.f32 %v1638_v27 }
 0x383   : > { %v1699_v0 = vmul.f32 %v6109_v54, %v7292_v15  ;;  %6120 = vrsqrt.f32 %v1415_v7  ;;  %v1642_v50 = vmax.f32 %v1588_v17, 1e-24  ;;  %v6111_v15 = vpop.eup %6110  ;;  %v1413_v54 = vmax.f32 %v7461_v63, 1e-24  ;;  %v1043_v17 = vpop.permute.xlu0 %1042 }
 0x384   : > { %6122 = vrsqrt.f32 %v1418_v26  ;;  %v6113_v18 = vpop.eup %6112  ;;  %v1416_v7 = vmax.f32 %v7477_v28, 1e-24  ;;  %1067 = vst.msk [vmem:[#allocation4 + $0x80] sm:$0xff] %vm828_vm1, %v1043_v17  ;;  %v1641_v28 = vmax.f32 %v7507_v43, 1e-24 }
 0x385   : > { %5737 = vmatprep.subr.msk.mxu0 %vm828_vm1, %v1699_v0  ;;  %6124 = vrsqrt.f32 %v1643_v39  ;;  %v6115_v59 = vpop.eup %6114  ;;  %v1646_v39 = vmax.f32 %v7505_v52, 1e-24  ;;  %v1478_v12 = vmul.f32 %v6113_v18, %v7173_v9  ;;  %v1423_v52 = vmax.f32 %v7513_v45, 1e-24  ;;  %v6313_v18 = vld [vmem:[#allocation2 + $0x88] sm:$0xff] }
 0x386   : > { %5738 = vmatpush3.xpose.msk.msra.mxu0 %vm828_vm1, %v1699_v0  ;;  %v7557_v1 = vpop.xlane.xlu1 %1611  ;;  %6126 = vrsqrt.f32 %v1642_v50  ;;  %v1475_v0 = vmul.f32 %v6111_v15, %v7154_v55  ;;  %v1703_v63 = vmul.f32 %v6115_v59, %v7209_v60  ;;  %v1651_v60 = vmax.f32 %v7547_v40, 1e-24 }
 0x387   : > { %v1774_v43 = vmul.f32 %v7522_v48, %v1478_v12 }
 0x388   : > { %v1771_v9 = vmul.f32 %v7200_v38, %v1475_v0  ;;  %v1417_v0 = vmax.f32 %v7463_v13, 1e-24 }
 0x38a   : > { %v1573_v35 = vpop.xlane.xlu1 %1572 }
 0x38b   : > { %v1637_v31 = vmax.f32 %v1573_v35, 1e-24 }
 0x38d   : > { %6128 = vrsqrt.f32 %v1637_v31  ;;  %v1426_v31 = vmax.f32 %v7515_v62, 1e-24  ;;  %v1650_v62 = vmax.f32 %v7557_v1, 1e-24 }
 0x38e   : > { %v6117_v27 = vpop.eup %6116  ;;  %v7564_v26 = vpop.xlane.xlu1 %1596  ;;  %6130 = vrsqrt.f32 %v1419_v6 }
 0x38f   : > { %v1698_v56 = vmul.f32 %v6117_v27, %v7334_v21  ;;  %6132 = vrsqrt.f32 %v1647_v22  ;;  %v6119_v50 = vpop.eup %6118  ;;  %v1047_v21 = vpop.permute.xlu0 %1046  ;;  %v1640_v22 = vmax.f32 %v7541_v2, 1e-24  ;;  %v1645_v1 = vmax.f32 %v7564_v26, 1e-24  ;;  %v7615_v26 = vld [vmem:[#allocation14 + $0x8] sm:$0xff] }
 0x390   : > { %6134 = vrsqrt.f32 %v1413_v54  ;;  %1069 = vst.msk [vmem:[#allocation4 + $0x90] sm:$0xff] %vm828_vm1, %v1047_v21  ;;  %v6121_v11 = vpop.eup %6120  ;;  %v1702_v3 = vmul.f32 %v6119_v50, %v7227_v24 }
 0x391   : > { %5739 = vmatprep.subr.msk.mxu0 %vm828_vm1, %v1698_v56  ;;  %6136 = vrsqrt.f32 %v1416_v7  ;;  %v6123_v35 = vpop.eup %6122  ;;  %v1479_v59 = vmul.f32 %v6313_v18, %v6121_v11 }
 0x392   : > { %5740 = vmatpush3.xpose.msk.msra.mxu0 %vm828_vm1, %v1698_v56  ;;  %v7577_v55 = vpop.xlane.xlu1 %1620  ;;  %6138 = vrsqrt.f32 %v1646_v39  ;;  %v6125_v15 = vpop.eup %6124  ;;  %v1482_v54 = vmul.f32 %v6123_v35, %v7182_v19 }
 0x393   : > { %5751 = vmatprep.subr.msk.mxu0 %vm828_vm1, %v1703_v63  ;;  %6140 = vrsqrt.f32 %v1422_v16  ;;  %v1051_v6 = vpop.permute.xlu0 %1050  ;;  %v6127_v24 = vpop.eup %6126  ;;  %v1707_v27 = vmul.f32 %v6125_v15, %v7306_v37  ;;  %v1775_v39 = vmul.f32 %v7522_v48, %v1479_v59  ;;  %v1420_v37 = vmax.f32 %v7489_v36, 1e-24 }
 0x394   : > { %6142 = vrsqrt.f32 %v1641_v28  ;;  %1071 = vst.msk [vmem:[#allocation4 + $0xa0] sm:$0xff] %vm828_vm1, %v1051_v6  ;;  %v1778_v13 = vmul.f32 %v7522_v48, %v1482_v54  ;;  %v1706_v12 = vmul.f32 %v6127_v24, %v7347_v44  ;;  %v6314_v28 = vld [vmem:[#allocation2 + $0xa8] sm:$0xff]  ;;  %v1424_v54 = vmax.f32 %v7517_v14, 1e-24  ;;  %v6316_v14 = vld [vmem:[#allocation2 + $0x90] sm:$0xff] }
 0x395   : > { %5742 = vmatmul.mubr.msk.f32.vlgmr.msra.gmra.mxu0 %vm828_vm1, %v1771_v9  ;;  %6144 = vrsqrt.f32 %v1423_v52  ;;  %v7618_v9 = vld [vmem:[#allocation14] sm:$0xff] }
 0x396   : > { %5752 = vmatpush3.xpose.msk.msra.mxu0 %vm828_vm1, %v1703_v63  ;;  %5755 = vmatprep.mubr.msk.f32.mxu0 %vm828_vm1, %v1774_v43  ;;  %v1570_v45 = vpop.xlane.xlu1 %1569  ;;  %6146 = vrsqrt.f32 %v1651_v60 }
 0x397   : > { %v1636_v40 = vmax.f32 %v1570_v45, 1e-24  ;;  %5753 = vmatprep.subr.msk.mxu0 %vm828_vm1, %v1702_v3  ;;  %v1057_v56 = vpop.permute.xlu0 %1056  ;;  %v1421_v45 = vmax.f32 %v7465_v57, 1e-24 }
 0x398   : > { %1074 = vst.msk [vmem:[#allocation4 + $0xb8] sm:$0xff] %vm828_vm1, %v1057_v56 }
 0x399   : > { %6148 = vrsqrt.f32 %v1636_v40  ;;  %v1649_v40 = vmax.f32 %v7511_v23, 1e-24 }
 0x39a   : > { %v6129_v17 = vpop.eup %6128  ;;  %5754 = vmatpush3.xpose.msk.msra.mxu0 %vm828_vm1, %v1702_v3  ;;  %v7597_v7 = vpop.xlane.xlu1 %1396  ;;  %6150 = vrsqrt.f32 %v1426_v31 }
 0x39b   : > { %5765 = vmatprep.subr.msk.mxu0 %vm828_vm1, %v1707_v27  ;;  %v1701_v2 = vmul.f32 %v6129_v17, %v7367_v20  ;;  %v6131_v19 = vpop.eup %6130  ;;  %6152 = vrsqrt.f32 %v1640_v22  ;;  %v1427_v20 = vmax.f32 %v7531_v34, 1e-24  ;;  %v1144_v63 = vpop.permute.xlu0 %1143 }
 0x39c   : > { %v6133_v16 = vpop.eup %6132  ;;  %6154 = vrsqrt.f32 %v1650_v62  ;;  %v1483_v44 = vmul.f32 %v6314_v28, %v6131_v19  ;;  %1167 = vst.msk [vmem:[#allocation4 + $0xc8] sm:$0xff] %vm828_vm1, %v1144_v63  ;;  %v1653_v28 = vmax.f32 %v7577_v55, 1e-24  ;;  %v6318_v55 = vld [vmem:[#allocation2 + $0x98] sm:$0xff] }
 0x39d   : > { %5744 = vmatprep.subr.msk.mxu1 %vm828_vm1, %v1701_v2  ;;  %5756 = vmatmul.mubr.msk.f32.vlgmr.msra.gmra.mxu0 %vm828_vm1, %v1775_v39  ;;  %v6135_v50 = vpop.eup %6134  ;;  %6156 = vrsqrt.f32 %v1417_v0  ;;  %v1711_v11 = vmul.f32 %v6133_v16, %v7221_v51  ;;  %v1648_v39 = vmax.f32 %v7544_v25, 1e-24 }
 0x39e   : > { %5745 = vmatpush3.xpose.msk.msra.mxu1 %vm828_vm1, %v1701_v2  ;;  %5766 = vmatpush3.xpose.msk.msra.mxu0 %vm828_vm1, %v1707_v27  ;;  %v1594_v36 = vpop.xlane.xlu1 %1593  ;;  %v6137_v34 = vpop.eup %6136  ;;  %6158 = vrsqrt.f32 %v1420_v37  ;;  %v1779_v31 = vmul.f32 %v7522_v48, %v1483_v44 }
 0x39f   : > { %5769 = vmatprep.mubr.msk.f32.mxu0 %vm828_vm1, %v1778_v13  ;;  %5767 = vmatprep.subr.msk.mxu0 %vm828_vm1, %v1706_v12  ;;  %v6139_v21 = vpop.eup %6138  ;;  %6160 = vrsqrt.f32 %v1645_v1  ;;  %v1644_v43 = vmax.f32 %v1594_v36, 1e-24  ;;  %v1480_v2 = vmul.f32 %v6316_v14, %v6137_v34  ;;  %v1055_v1 = vpop.permute.xlu0 %1054  ;;  %v1425_v36 = vmax.f32 %v7525_v30, 1e-24  ;;  %v7693_v14 = vld [vmem:[#allocation4 + $0x28] sm:$0xff] }
 0x3a0   : > { %v6141_v60 = vpop.eup %6140  ;;  %6162 = vrsqrt.f32 %v1427_v20  ;;  %v1710_v57 = vmul.f32 %v6139_v21, %v7232_v29  ;;  %1073 = vst.msk [vmem:[#allocation4 + $0xb0] sm:$0xff] %vm828_vm1, %v1055_v1  ;;  %v1428_v34 = vmax.f32 %v7538_v8, 1e-24  ;;  %v8277_v21 = vld [vmem:[#allocation26_spill] sm:$0xff]  ;;  %v8278_v8 = vld [vmem:[#allocation27_spill] sm:$0xff] }
 0x3a1   : > { %v5701_v52 = vpop.f32.mrf.mxu1  ;;  %v6143_v15 = vpop.eup %6142  ;;  %v1486_v22 = vmul.f32 %v6141_v60, %v7248_v61  ;;  %6164 = vrsqrt.f32 %v1644_v43  ;;  %v6315_v61 = vld [vmem:[#allocation2 + $0x78] sm:$0xff]  ;;  %v1776_v63 = vmul.f32 %v7522_v48, %v1480_v2 }
 0x3a2   : > { %v7622_v35 = vadd.f32 %v5701_v52, %v7615_v26  ;;  %5768 = vmatpush3.xpose.msk.msra.mxu0 %vm828_vm1, %v1706_v12  ;;  %v7625_v3 = vpop.xlane.xlu1 %1617  ;;  %v6145_v51 = vpop.eup %6144  ;;  %6166 = vrsqrt.f32 %v1421_v45  ;;  %v1477_v56 = vmul.f32 %v6315_v61, %v6135_v50  ;;  %v1705_v19 = vmul.f32 %v6143_v15, %v7242_v46  ;;  %v1239_v45 = vld [vmem:[#allocation4 + $0x8] sm:$0xff]  ;;  %v1238_v61 = vld [vmem:[#allocation4] sm:$0xff]  ;;  %v6322_v2 = vld [vmem:[#allocation3 + $0xd8] sm:$0xff] }
 0x3a3   : > { %v1868_v6 = vpop.f32.mrf.mxu1  ;;  %5779 = vmatprep.subr.msk.mxu0 %vm828_vm1, %v1711_v11  ;;  %v6147_v24 = vpop.eup %6146  ;;  %6168 = vrsqrt.f32 %v1649_v40 }
 0x3a4   : > { %v7632_v18 = vadd.f32 %v7618_v9, %v1868_v6  ;;  %v3226_v59 = vsel %vm3222_vm2, %v7622_v35, -inf  ;;  %v1715_v37 = vmul.f32 %v6147_v24, %v7319_v4  ;;  %6170 = vrsqrt.f32 %v1424_v54  ;;  %v6319_v6 = vld [vmem:[#allocation2 + $0xb0] sm:$0xff] }
 0x3a5   : > { %3227 = vmax.xlane.f32.xlu1 %v3226_v59  ;;  %5770 = vmatmul.mubr.msk.f32.vlgmr.msra.gmra.mxu0 %vm828_vm1, %v1779_v31  ;;  %v1773_v46 = vmul.f32 %v7200_v38, %v1477_v56  ;;  %6172 = vrsqrt.f32 %v1648_v39  ;;  %v6321_v56 = vld [vmem:[#allocation2 + $0xb8] sm:$0xff] }
 0x3a6   : > { %v6149_v27 = vpop.eup %6148  ;;  %5780 = vmatpush3.xpose.msk.msra.mxu0 %vm828_vm1, %v1711_v11  ;;  %v7641_v23 = vpop.permute.xlu1 %1755  ;;  %v3223_v17 = vsel %vm3222_vm2, %v7632_v18, -inf  ;;  %6174 = vrsqrt.f32 %v1425_v36  ;;  %v6325_v36 = vld [vmem:[#allocation2 + $0xd8] sm:$0xff] }
 0x3a7   : > { %3224 = vmax.xlane.f32.xlu0 %v3223_v17  ;;  %5781 = vmatprep.subr.msk.mxu0 %vm828_vm1, %v1710_v57  ;;  %v1700_v62 = vmul.f32 %v6149_v27, %v7393_v53  ;;  %v1782_v29 = vmul.f32 %v7641_v23, %v1486_v22  ;;  %v6151_v0 = vpop.eup %6150  ;;  %v1487_v53 = vmul.f32 %v6145_v51, %v7254_v5  ;;  %v6317_v5 = vld [vmem:[#allocation2 + $0xe0] sm:$0xff]  ;;  %6176 = vrsqrt.f32 %v1653_v28  ;;  %v6320_v51 = vld [vmem:[#allocation2 + $0xe8] sm:$0xff]  ;;  %v6326_v28 = vld [vmem:[#allocation2 + $0xf0] sm:$0xff] }
 0x3a8   : > { %v6153_v13 = vpop.eup %6152  ;;  %v1490_v16 = vmul.f32 %v6317_v5, %v6151_v0  ;;  %6178 = vrsqrt.f32 %v1428_v34 }
 0x3a9   : > { %5746 = vmatprep.subr.msk.mxu1 %vm828_vm1, %v1700_v62  ;;  %5783 = vmatprep.mubr.msk.f32.mxu0 %vm828_vm1, %v1782_v29  ;;  %v6155_v25 = vpop.eup %6154  ;;  %v1783_v4 = vmul.f32 %v7641_v23, %v1487_v53  ;;  %v1704_v30 = vmul.f32 %v6153_v13, %v7269_v58  ;;  %v1652_v58 = vmax.f32 %v7625_v3, 1e-24 }
 0x3aa   : > { %5747 = vmatpush3.xpose.msk.msra.mxu1 %vm828_vm1, %v1700_v62  ;;  %5782 = vmatpush3.xpose.msk.msra.mxu0 %vm828_vm1, %v1710_v57  ;;  %v946_v12 = vpop.permute.xlu1 %945  ;;  %v6157_v20 = vpop.eup %6156  ;;  %v1786_v38 = vmul.f32 %v7641_v23, %v1490_v16  ;;  %v1714_v52 = vmul.f32 %v6155_v25, %v8277_v21  ;;  %v1429_v57 = vmax.f32 %v7597_v7, 1e-24  ;;  %v6324_v25 = vld [vmem:[#allocation3 + $0xd0] sm:$0xff] }
 0x3ab   : > { %5758 = vmatprep.subr.msk.mxu1 %vm828_vm1, %v1705_v19  ;;  %5793 = vmatprep.subr.msk.mxu0 %vm828_vm1, %v1715_v37  ;;  %969 = vst.msk [vmem:[#allocation4 + $0x48] sm:$0xff] %vm828_vm1, %v946_v12  ;;  %v6159_v50 = vpop.eup %6158  ;;  %v1481_v43 = vmul.f32 %v6318_v55, %v6157_v20  ;;  %6180 = vrsqrt.f32 %v1652_v58  ;;  %v1240_v55 = vld [vmem:[#allocation4 + $0x10] sm:$0xff] }
 0x3ac   : > { %v6161_v44 = vpop.eup %6160  ;;  %v1484_v31 = vmul.f32 %v6319_v6, %v6159_v50  ;;  %6182 = vrsqrt.f32 %v1429_v57 }
 0x3ad   : > { %5749 = vmatmul.mubr.msk.f32.vlgmr.msra.gmra.mxu1 %vm828_vm1, %v1773_v46  ;;  %5784 = vmatmul.mubr.msk.f32.vlgmr.msra.gmra.mxu0 %vm828_vm1, %v1783_v4  ;;  %v6163_v60 = vpop.eup %6162  ;;  %v1709_v15 = vmul.f32 %v6161_v44, %v8278_v8  ;;  %v1777_v3 = vmul.f32 %v7522_v48, %v1481_v43 }
 0x3ae   : > { %5759 = vmatpush3.xpose.msk.msra.mxu1 %vm828_vm1, %v1705_v19  ;;  %5762 = vmatprep.mubr.msk.f32.mxu1 %vm828_vm1, %v1776_v63  ;;  %v948_v11 = vpop.permute.xlu1 %947  ;;  %v1491_v40 = vmul.f32 %v6320_v51, %v6163_v60  ;;  %v6165_v24 = vpop.eup %6164  ;;  %v1780_v17 = vmul.f32 %v7522_v48, %v1484_v31  ;;  %v6323_v19 = vld [vmem:[#allocation2 + $0xd0] sm:$0xff] }
 0x3af   : > { %5794 = vmatpush3.xpose.msk.msra.mxu0 %vm828_vm1, %v1715_v37  ;;  %5797 = vmatprep.mubr.msk.f32.mxu0 %vm828_vm1, %v1786_v38  ;;  %970 = vst.msk [vmem:[#allocation4 + $0x50] sm:$0xff] %vm828_vm1, %v948_v11  ;;  %v6167_v22 = vpop.eup %6166  ;;  %v1708_v7 = vmul.f32 %v6165_v24, %v7421_v49  ;;  %v1241_v11 = vld [vmem:[#allocation4 + $0x18] sm:$0xff] }
 0x3b0   : > { %5760 = vmatprep.subr.msk.mxu1 %vm828_vm1, %v1704_v30  ;;  %5795 = vmatprep.subr.msk.mxu0 %vm828_vm1, %v1714_v52  ;;  %v1787_v27 = vmul.f32 %v7641_v23, %v1491_v40  ;;  %v6169_v54 = vpop.eup %6168  ;;  %v1485_v0 = vmul.f32 %v6321_v56, %v6167_v22 }
 0x3b1   : > { %v6171_v29 = vpop.eup %6170  ;;  %v1713_v39 = vmul.f32 %v6322_v2, %v6169_v54  ;;  %v3185_v54 = vld [vmem:[#allocation14 + $0x18] sm:$0xff] }
 0x3b2   : > { %5761 = vmatpush3.xpose.msk.msra.mxu1 %vm828_vm1, %v1704_v30  ;;  %v952_v59 = vpop.permute.xlu1 %951  ;;  %v6173_v49 = vpop.eup %6172  ;;  %v1488_v37 = vmul.f32 %v6323_v19, %v6171_v29  ;;  %v1781_v1 = vmul.f32 %v7522_v48, %v1485_v0  ;;  %v8279_v48 = vld [vmem:[#allocation28_spill] sm:$0xff] }
 0x3b3   : > { %5796 = vmatpush3.xpose.msk.msra.mxu0 %vm828_vm1, %v1714_v52  ;;  %5772 = vmatprep.subr.msk.mxu1 %vm828_vm1, %v1709_v15  ;;  %972 = vst.msk [vmem:[#allocation4 + $0x60] sm:$0xff] %vm828_vm1, %v952_v59  ;;  %v6175_v12 = vpop.eup %6174  ;;  %v1712_v46 = vmul.f32 %v6324_v25, %v6173_v49 }
 0x3b4   : > { %5807 = vmatprep.subr.mxu0 %v1239_v45  ;;  %v1784_v13 = vmul.f32 %v7641_v23, %v1488_v37  ;;  %v6177_v4 = vpop.eup %6176  ;;  %v1489_v63 = vmul.f32 %v6325_v36, %v6175_v12 }
 0x3b5   : > { %5763 = vmatmul.mubr.msk.f32.vlgmr.msra.gmra.mxu1 %vm828_vm1, %v1777_v3  ;;  %v6179_v16 = vpop.eup %6178  ;;  %v1717_v20 = vmul.f32 %v6177_v4, %v8279_v48 }
 0x3b6   : > { %5798 = vmatmul.mubr.msk.f32.vlgmr.msra.gmra.mxu0 %vm828_vm1, %v1787_v27  ;;  %5773 = vmatpush3.xpose.msk.msra.mxu1 %vm828_vm1, %v1709_v15  ;;  %v958_v62 = vpop.permute.xlu1 %957  ;;  %v1492_v38 = vmul.f32 %v6326_v28, %v6179_v16  ;;  %v1785_v44 = vmul.f32 %v7641_v23, %v1489_v63  ;;  %v3186_v16 = vld [vmem:[#allocation14 + $0x20] sm:$0xff] }
 0x3b7   : > { %5776 = vmatprep.mubr.msk.f32.mxu1 %vm828_vm1, %v1780_v17  ;;  %5808 = vmatpush3.msra.mxu0 %v1239_v45  ;;  %975 = vst.msk [vmem:[#allocation4 + $0x78] sm:$0xff] %vm828_vm1, %v958_v62 }
 0x3b8   : > { %5774 = vmatprep.subr.msk.mxu1 %vm828_vm1, %v1708_v7  ;;  %5809 = vmatprep.subr.mxu0 %v1238_v61  ;;  %v6181_v50 = vpop.eup %6180  ;;  %v1788_v30 = vmul.f32 %v7641_v23, %v1492_v38 }
 0x3b9   : > { %5810 = vmatpush3.msra.mxu0 %v1238_v61  ;;  %v6183_v34 = vpop.eup %6182  ;;  %v1716_v21 = vmul.f32 %v6181_v50, %v7434_v33  ;;  %v7722_v33 = vld [vmem:[#allocation4 + $0x38] sm:$0xff] }
 0x3ba   : > { %5775 = vmatpush3.xpose.msk.msra.mxu1 %vm828_vm1, %v1708_v7  ;;  %5821 = vmatprep.subr.mxu0 %v7693_v14  ;;  %v1049_v53 = vpop.permute.xlu1 %1048  ;;  %v1493_v52 = vmul.f32 %v6183_v34, %v7405_v32  ;;  %v3184_v7 = vld [vmem:[#allocation14 + $0x10] sm:$0xff] }
 0x3bb   : > { %5786 = vmatprep.subr.msk.mxu1 %vm828_vm1, %v1713_v39  ;;  %1070 = vst.msk [vmem:[#allocation4 + $0x98] sm:$0xff] %vm828_vm1, %v1049_v53 }
 0x3bc   : > { %v1789_v60 = vmul.f32 %v7641_v23, %v1493_v52 }
 0x3bd   : > { %5777 = vmatmul.mubr.msk.f32.vlgmr.msra.gmra.mxu1 %vm828_vm1, %v1781_v1 }
 0x3be   : > { %5787 = vmatpush3.xpose.msk.msra.mxu1 %vm828_vm1, %v1713_v39  ;;  %5790 = vmatprep.mubr.msk.f32.mxu1 %vm828_vm1, %v1784_v13  ;;  %v1053_v5 = vpop.permute.xlu1 %1052 }
 0x3bf   : > { %5788 = vmatprep.subr.msk.mxu1 %vm828_vm1, %v1712_v46  ;;  %1072 = vst.msk [vmem:[#allocation4 + $0xa8] sm:$0xff] %vm828_vm1, %v1053_v5 }
 0x3c2   : > { %5789 = vmatpush3.xpose.msk.msra.mxu1 %vm828_vm1, %v1712_v46  ;;  %v3187_v46 = vld [vmem:[#allocation14 + $0x28] sm:$0xff] }
 0x3c3   : > { %5800 = vmatprep.subr.msk.mxu1 %vm828_vm1, %v1717_v20 }
 0x3c5   : > { %5791 = vmatmul.mubr.msk.f32.vlgmr.msra.gmra.mxu1 %vm828_vm1, %v1785_v44 }
 0x3c6   : > { %5801 = vmatpush3.xpose.msk.msra.mxu1 %vm828_vm1, %v1717_v20  ;;  %5804 = vmatprep.mubr.msk.f32.mxu1 %vm828_vm1, %v1788_v30 }
 0x3c7   : > { %5802 = vmatprep.subr.msk.mxu1 %vm828_vm1, %v1716_v21 }
 0x3ca   : > { %5803 = vmatpush3.xpose.msk.msra.mxu1 %vm828_vm1, %v1716_v21  ;;  %v7793_v21 = vld [vmem:[#allocation14 + $0x38] sm:$0xff] }
 0x3cb   : > { %5814 = vmatprep.subr.mxu1 %v1241_v11 }
 0x3cd   : > { %5805 = vmatmul.mubr.msk.f32.vlgmr.msra.gmra.mxu1 %vm828_vm1, %v1789_v60 }
 0x3ce   : > { %5815 = vmatpush3.msra.mxu1 %v1241_v11 }
 0x3cf   : > { %5816 = vmatprep.subr.mxu1 %v1240_v55 }
 0x3d0   : > { %5817 = vmatpush3.msra.mxu1 %v1240_v55 }
 0x3d1   : > { %v5708_v43 = vpop.f32.mrf.mxu1  ;;  %5828 = vmatprep.subr.mxu1 %v7722_v33 }
 0x3d2   : > { %v7726_v58 = vadd.f32 %v5708_v43, %v7615_v26 }
 0x3d3   : > { %v1955_v8 = vpop.f32.mrf.mxu1 }
 0x3d4   : > { %v3232_v32 = vsel %vm3222_vm2, %v7726_v58, -inf  ;;  %v7734_v45 = vadd.f32 %v7618_v9, %v1955_v8 }
 0x3d5   : > { %3233 = vmax.xlane.f32.xlu0 %v3232_v32  ;;  %v5715_v23 = vpop.f32.mrf.mxu0  ;;  %v3188_v32 = vld [vmem:[#allocation14 + $0x30] sm:$0xff] }
 0x3d6   : > { %v7731_v15 = vadd.f32 %v5715_v23, %v7615_v26  ;;  %v3229_v57 = vsel %vm3222_vm2, %v7734_v45, -inf }
 0x3d7   : > { %v2042_v31 = vpop.f32.mrf.mxu0 }
 0x3d8   : > { %v3238_v6 = vsel %vm3222_vm2, %v7731_v15, -inf  ;;  %v7742_v59 = vadd.f32 %v7618_v9, %v2042_v31 }
 0x3d9   : > { %3239 = vmax.xlane.f32.xlu0 %v3238_v6 }
 0x3da   : > { %v5722_v51 = vpop.f32.mrf.mxu1  ;;  %v3235_v27 = vsel %vm3222_vm2, %v7742_v59, -inf }
 0x3db   : > { %v7739_v40 = vadd.f32 %v5722_v51, %v7615_v26 }
 0x3dc   : > { %v2129_v24 = vpop.f32.mrf.mxu1 }
 0x3dd   : > { %v7747_v3 = vadd.f32 %v7618_v9, %v2129_v24  ;;  %3230 = vmax.xlane.f32.xlu0 %v3229_v57  ;;  %v3244_v22 = vsel %vm3222_vm2, %v7739_v40, -inf }
 0x3de   : > { %3245 = vmax.xlane.f32.xlu1 %v3244_v22 }
 0x3df   : > { %v3241_v26 = vsel %vm3222_vm2, %v7747_v3, -inf }
 0x3e1   : > { %3236 = vmax.xlane.f32.xlu0 %v3235_v27 }
 0x3e2   : > { %3242 = vmax.xlane.f32.xlu1 %v3241_v26 }
 0x405   : > { %v5729_v17 = vpop.f32.mrf.mxu0 }
 0x406   : > { %v7755_v62 = vadd.f32 %v5729_v17, %v3185_v54 }
 0x407   : > { %v2216_v9 = vpop.f32.mrf.mxu0 }
 0x408   : > { %v7757_v29 = vadd.f32 %v3184_v7, %v2216_v9  ;;  %v3250_v61 = vsel %vm3222_vm2, %v7755_v62, -inf }
 0x409   : > { %3251 = vmax.xlane.f32.xlu0 %v3250_v61 }
 0x40a   : > { %v3247_v56 = vsel %vm3222_vm2, %v7757_v29, -inf }
 0x40d   : > { %3248 = vmax.xlane.f32.xlu0 %v3247_v56 }
 0x425   : > { %v5736_v0 = vpop.f32.mrf.mxu1 }
 0x426   : > { %v7763_v2 = vadd.f32 %v5736_v0, %v3185_v54 }
 0x427   : > { %v2303_v39 = vpop.f32.mrf.mxu1 }
 0x428   : > { %v7765_v49 = vadd.f32 %v3184_v7, %v2303_v39  ;;  %v3256_v19 = vsel %vm3222_vm2, %v7763_v2, -inf }
 0x429   : > { %3257 = vmax.xlane.f32.xlu1 %v3256_v19 }
 0x42a   : > { %v3253_v37 = vsel %vm3222_vm2, %v7765_v49, -inf }
 0x42d   : > { %3254 = vmax.xlane.f32.xlu1 %v3253_v37 }
 0x42e   : > { %v3228_v22 = vpop.xlane.xlu1 %3227 }
 0x42f   : > { %v3320_v9 = vsub.f32 %v7622_v35, %v3228_v22 }
 0x430   : > { %v3225_v17 = vpop.xlane.xlu0 %3224 }
 0x431   : > { %v3319_v0 = vsub.f32 %v7632_v18, %v3225_v17  ;;  %v3353_v39 = vmul.f32 1.442695, %v3320_v9  ;;  %v8280_v9 = vld [vmem:[#allocation23_spill] sm:$0xff] }
 0x433   : > { %6184 = vpow2.f32 %v3353_v39 }
 0x455   : > { %v5743_v53 = vpop.f32.mrf.mxu0 }
 0x456   : > { %v7771_v1 = vadd.f32 %v5743_v53, %v3185_v54  ;;  %v3351_v53 = vmul.f32 1.442695, %v3319_v0 }
 0x457   : > { %v2390_v13 = vpop.f32.mrf.mxu0 }
 0x458   : > { %v7773_v12 = vadd.f32 %v3184_v7, %v2390_v13  ;;  %v3262_v25 = vsel %vm3222_vm2, %v7771_v1, -inf  ;;  %6186 = vpow2.f32 %v3351_v53 }
 0x459   : > { %3263 = vmax.xlane.f32.xlu0 %v3262_v25 }
 0x45a   : > { %v3259_v4 = vsel %vm3222_vm2, %v7773_v12, -inf }
 0x45d   : > { %3260 = vmax.xlane.f32.xlu0 %v3259_v4  ;;  %v5757_v5 = vpop.f32.mrf.mxu0 }
 0x45e   : > { %v7779_v48 = vadd.f32 %v5757_v5, %v3187_v46 }
 0x45f   : > { %v2564_v20 = vpop.f32.mrf.mxu0 }
 0x460   : > { %v7781_v36 = vadd.f32 %v3186_v16, %v2564_v20  ;;  %v3274_v63 = vsel %vm3222_vm2, %v7779_v48, -inf }
 0x461   : > { %3275 = vmax.xlane.f32.xlu0 %v3274_v63 }
 0x462   : > { %v3271_v50 = vsel %vm3222_vm2, %v7781_v36, -inf }
 0x465   : > { %3272 = vmax.xlane.f32.xlu0 %v3271_v50  ;;  %v5771_v28 = vpop.f32.mrf.mxu0 }
 0x466   : > { %v7787_v38 = vadd.f32 %v5771_v28, %v3187_v46 }
 0x467   : > { %v2738_v44 = vpop.f32.mrf.mxu0  ;;  %v3246_v39 = vpop.xlane.xlu1 %3245 }
 0x468   : > { %v7789_v34 = vadd.f32 %v3186_v16, %v2738_v44  ;;  %v3286_v30 = vsel %vm3222_vm2, %v7787_v38, -inf }
 0x469   : > { %3287 = vmax.xlane.f32.xlu0 %v3286_v30 }
 0x46a   : > { %v3283_v52 = vsel %vm3222_vm2, %v7789_v34, -inf }
 0x46b   : > { %v3243_v53 = vpop.xlane.xlu1 %3242 }
 0x46d   : > { %3284 = vmax.xlane.f32.xlu0 %v3283_v52  ;;  %v5750_v11 = vpop.f32.mrf.mxu1  ;;  %v5785_v60 = vpop.f32.mrf.mxu0 }
 0x46e   : > { %v7797_v55 = vadd.f32 %v5750_v11, %v3185_v54  ;;  %v7800_v43 = vadd.f32 %v5785_v60, %v7793_v21  ;;  %v7848_v60 = vpop.eup %6184 }
 0x46f   : > { %v2477_v8 = vpop.f32.mrf.mxu1  ;;  %v2912_v23 = vpop.f32.mrf.mxu0  ;;  %v3418_v22 = vsel %vm3222_vm2, %v7848_v60, 0.0 }
 0x470   : > { %v7802_v6 = vadd.f32 %v3184_v7, %v2477_v8  ;;  %v3268_v31 = vsel %vm3222_vm2, %v7797_v55, -inf  ;;  %v7806_v51 = vadd.f32 %v3188_v32, %v2912_v23  ;;  %v3298_v24 = vsel %vm3222_vm2, %v7800_v43, -inf }
 0x471   : > { %3269 = vmax.xlane.f32.xlu1 %v3268_v31  ;;  %3299 = vmax.xlane.f32.xlu0 %v3298_v24  ;;  %v7852_v31 = vpop.eup %6186 }
 0x472   : > { %v3265_v57 = vsel %vm3222_vm2, %v7802_v6, -inf  ;;  %v3295_v26 = vsel %vm3222_vm2, %v7806_v51, -inf }
 0x475   : > { %3266 = vmax.xlane.f32.xlu1 %v3265_v57  ;;  %v5764_v27 = vpop.f32.mrf.mxu1  ;;  %3296 = vmax.xlane.f32.xlu0 %v3295_v26  ;;  %v3415_v26 = vsel %vm3222_vm2, %v7852_v31, 0.0 }
 0x476   : > { %v7814_v54 = vadd.f32 %v5764_v27, %v3187_v46  ;;  %v5799_v5 = vpop.f32.mrf.mxu0 }
 0x477   : > { %v2651_v7 = vpop.f32.mrf.mxu1  ;;  %v7836_v28 = vadd.f32 %v5799_v5, %v7793_v21 }
 0x478   : > { %v7817_v61 = vadd.f32 %v3186_v16, %v2651_v7  ;;  %v3280_v56 = vsel %vm3222_vm2, %v7814_v54, -inf }
 0x479   : > { %3281 = vmax.xlane.f32.xlu1 %v3280_v56  ;;  %v3310_v11 = vsel %vm3222_vm2, %v7836_v28, -inf }
 0x47a   : > { %v3277_v19 = vsel %vm3222_vm2, %v7817_v61, -inf }
 0x47d   : > { %3278 = vmax.xlane.f32.xlu1 %v3277_v19  ;;  %v5778_v37 = vpop.f32.mrf.mxu1 }
 0x47e   : > { %v7824_v13 = vadd.f32 %v5778_v37, %v3187_v46  ;;  %v3086_v46 = vpop.f32.mrf.mxu0 }
 0x47f   : > { %v2825_v25 = vpop.f32.mrf.mxu1  ;;  %v7842_v30 = vadd.f32 %v3188_v32, %v3086_v46 }
 0x480   : > { %v7826_v35 = vadd.f32 %v3186_v16, %v2825_v25  ;;  %v3292_v4 = vsel %vm3222_vm2, %v7824_v13, -inf  ;;  %v3326_v25 = vsub.f32 %v7739_v40, %v3246_v39 }
 0x481   : > { %3293 = vmax.xlane.f32.xlu1 %v3292_v4  ;;  %v3307_v23 = vsel %vm3222_vm2, %v7842_v30, -inf }
 0x482   : > { %v3289_v18 = vsel %vm3222_vm2, %v7826_v35, -inf  ;;  %v3365_v5 = vmul.f32 1.442695, %v3326_v25 }
 0x485   : > { %3290 = vmax.xlane.f32.xlu1 %v3289_v18  ;;  %v5792_v20 = vpop.f32.mrf.mxu1 }
 0x486   : > { %v7833_v63 = vadd.f32 %v5792_v20, %v7793_v21 }
 0x487   : > { %v2999_v50 = vpop.f32.mrf.mxu1 }
 0x488   : > { %v7838_v16 = vadd.f32 %v3188_v32, %v2999_v50  ;;  %v3304_v44 = vsel %vm3222_vm2, %v7833_v63, -inf }
 0x489   : > { %3305 = vmax.xlane.f32.xlu0 %v3304_v44 }
 0x48a   : > { %v3301_v52 = vsel %vm3222_vm2, %v7838_v16, -inf }
 0x48b   : > { %3302 = vmax.xlane.f32.xlu1 %v3301_v52 }
 0x48d   : > { %v5806_v8 = vpop.f32.mrf.mxu1  ;;  %3311 = vmax.xlane.f32.xlu0 %v3310_v11 }
 0x48e   : > { %v7855_v57 = vadd.f32 %v5806_v8, %v7793_v21  ;;  %v3234_v21 = vpop.xlane.xlu0 %3233 }
 0x48f   : > { %v3173_v24 = vpop.f32.mrf.mxu1  ;;  %3308 = vmax.xlane.f32.xlu1 %v3307_v23  ;;  %v3322_v56 = vsub.f32 %v7726_v58, %v3234_v21 }
 0x490   : > { %v7859_v27 = vadd.f32 %v3188_v32, %v3173_v24  ;;  %v3316_v17 = vsel %vm3222_vm2, %v7855_v57, -inf }
 0x491   : > { %3419 = vadd.xlane.f32.xlu0 %v3418_v22  ;;  %v3357_v19 = vmul.f32 1.442695, %v3322_v56 }
 0x492   : > { %v3313_v7 = vsel %vm3222_vm2, %v7859_v27, -inf  ;;  %v3240_v32 = vpop.xlane.xlu0 %3239 }
 0x493   : > { %3416 = vadd.xlane.f32.xlu1 %v3415_v26  ;;  %6188 = vpow2.f32 %v3357_v19 }
 0x495   : > { %3317 = vmax.xlane.f32.xlu0 %v3316_v17 }
 0x496   : > { %v3231_v0 = vpop.xlane.xlu0 %3230 }
 0x497   : > { %3314 = vmax.xlane.f32.xlu1 %v3313_v7  ;;  %v3321_v37 = vsub.f32 %v7734_v45, %v3231_v0 }
 0x49a   : > { %v3237_v4 = vpop.xlane.xlu0 %3236 }
 0x49b   : > { %v3323_v45 = vsub.f32 %v7742_v59, %v3237_v4 }
 0x49d   : > { %v3359_v44 = vmul.f32 1.442695, %v3323_v45 }
 0x49e   : > { %v3252_v18 = vpop.xlane.xlu0 %3251 }
 0x49f   : > { %v3328_v40 = vsub.f32 %v7755_v62, %v3252_v18 }
 0x4a0   : > { %v7886_v8 = vpop.eup %6188 }
 0x4a2   : > { %v3249_v52 = vpop.xlane.xlu0 %3248 }
 0x4a3   : > { %v3327_v59 = vsub.f32 %v7757_v29, %v3249_v52 }
 0x4a5   : > { %v3367_v62 = vmul.f32 1.442695, %v3327_v59 }
 0x4a8   : > { %1141 = vrot.lane.b32.xlu1 %v8280_v9, %s6574_s22 }
 0x4ab   : > { %1147 = vrot.lane.b32.xlu0 %v7299_v47, %s6574_s22  ;;  %v3355_v47 = vmul.f32 1.442695, %v3321_v37 }
 0x4ad   : > { %6190 = vpow2.f32 %v3355_v47 }
 0x4ae   : > { %6192 = vpow2.f32 %v3365_v5 }
 0x4af   : > { %1145 = vrot.lane.b32.xlu0 %v7308_v42, %s6574_s22  ;;  %v3324_v42 = vsub.f32 %v7731_v15, %v3240_v32 }
 0x4b1   : > { %v3361_v20 = vmul.f32 1.442695, %v3324_v42 }
 0x4b2   : > { %v3258_v58 = vpop.xlane.xlu1 %3257 }
 0x4b3   : > { %1151 = vrot.lane.b32.xlu0 %v7314_v41, %s6574_s22  ;;  %v3325_v41 = vsub.f32 %v7747_v3, %v3243_v53  ;;  %6194 = vpow2.f32 %v3361_v20  ;;  %v3369_v3 = vmul.f32 1.442695, %v3328_v40 }
 0x4b5   : > { %v3363_v46 = vmul.f32 1.442695, %v3325_v41 }
 0x4b6   : > { %v3255_v50 = vpop.xlane.xlu1 %3254 }
 0x4b7   : > { %1149 = vrot.lane.b32.xlu0 %v7325_v10, %s6574_s22  ;;  %v3330_v10 = vsub.f32 %v7763_v2, %v3258_v58  ;;  %6196 = vpow2.f32 %v3363_v46  ;;  %v3329_v11 = vsub.f32 %v7765_v49, %v3255_v50  ;;  %v3424_v2 = vsel %vm3222_vm2, %v7886_v8, 0.0 }
 0x4b8   : > { %6198 = vpow2.f32 %v3359_v44 }
 0x4b9   : > { %v3373_v15 = vmul.f32 1.442695, %v3330_v10  ;;  %v3371_v23 = vmul.f32 1.442695, %v3329_v11 }
 0x4ba   : > { %v7891_v24 = vpop.eup %6190 }
 0x4bb   : > { %6200 = vpow2.f32 %v3373_v15  ;;  %v3421_v49 = vsel %vm3222_vm2, %v7891_v24, 0.0  ;;  %v7895_v22 = vpop.eup %6192 }
 0x4bc   : > { %6202 = vpow2.f32 %v3369_v3  ;;  %v3436_v29 = vsel %vm3222_vm2, %v7895_v22, 0.0 }
 0x4bd   : > { %6204 = vpow2.f32 %v3371_v23 }
 0x4be   : > { %6206 = vpow2.f32 %v3367_v62 }
 0x4c0   : > { %v7897_v26 = vpop.eup %6194 }
 0x4c1   : > { %v3430_v7 = vsel %vm3222_vm2, %v7897_v26, 0.0 }
 0x4c4   : > { %v7901_v17 = vpop.eup %6196 }
 0x4c5   : > { %v7905_v21 = vpop.eup %6198  ;;  %v3433_v9 = vsel %vm3222_vm2, %v7901_v17, 0.0 }
 0x4c6   : > { %v3427_v56 = vsel %vm3222_vm2, %v7905_v21, 0.0 }
 0x4c8   : > { %v7909_v32 = vpop.eup %6200 }
 0x4c9   : > { %v7913_v0 = vpop.eup %6202  ;;  %v3448_v39 = vsel %vm3222_vm2, %v7909_v32, 0.0 }
 0x4ca   : > { %v7917_v19 = vpop.eup %6204  ;;  %v3442_v37 = vsel %vm3222_vm2, %v7913_v0, 0.0 }
 0x4cb   : > { %v7921_v53 = vpop.eup %6206  ;;  %v3445_v47 = vsel %vm3222_vm2, %v7917_v19, 0.0 }
 0x4cc   : > { %3425 = vadd.xlane.f32.xlu1 %v3424_v2  ;;  %v3439_v25 = vsel %vm3222_vm2, %v7921_v53, 0.0 }
 0x4d0   : > { %3422 = vadd.xlane.f32.xlu1 %v3421_v49 }
 0x4d4   : > { %3437 = vadd.xlane.f32.xlu1 %v3436_v29 }
 0x4d6   : > { %3431 = vadd.xlane.f32.xlu0 %v3430_v7 }
 0x4d8   : > { %3434 = vadd.xlane.f32.xlu1 %v3433_v9 }
 0x4da   : > { %3428 = vadd.xlane.f32.xlu0 %v3427_v56 }
 0x4dc   : > { %3449 = vadd.xlane.f32.xlu1 %v3448_v39 }
 0x4de   : > { %3443 = vadd.xlane.f32.xlu0 %v3442_v37 }
 0x4e0   : > { %3446 = vadd.xlane.f32.xlu1 %v3445_v47 }
 0x4e2   : > { %v3264_v4 = vpop.xlane.xlu0 %3263  ;;  %3440 = vadd.xlane.f32.xlu0 %v3439_v25 }
 0x4e3   : > { %v3332_v42 = vsub.f32 %v7771_v1, %v3264_v4 }
 0x4e5   : > { %v3377_v58 = vmul.f32 1.442695, %v3332_v42 }
 0x4e6   : > { %v3261_v5 = vpop.xlane.xlu0 %3260 }
 0x4e7   : > { %6208 = vpow2.f32 %v3377_v58  ;;  %v3331_v41 = vsub.f32 %v7773_v12, %v3261_v5 }
 0x4e9   : > { %v3375_v18 = vmul.f32 1.442695, %v3331_v41 }
 0x4ea   : > { %v3276_v20 = vpop.xlane.xlu0 %3275 }
 0x4eb   : > { %6210 = vpow2.f32 %v3375_v18  ;;  %v3336_v45 = vsub.f32 %v7779_v48, %v3276_v20 }
 0x4ed   : > { %v3385_v46 = vmul.f32 1.442695, %v3336_v45 }
 0x4ee   : > { %v3273_v10 = vpop.xlane.xlu0 %3272 }
 0x4ef   : > { %6212 = vpow2.f32 %v3385_v46  ;;  %v3335_v50 = vsub.f32 %v7781_v36, %v3273_v10 }
 0x4f1   : > { %v3383_v44 = vmul.f32 1.442695, %v3335_v50 }
 0x4f2   : > { %v3288_v40 = vpop.xlane.xlu0 %3287 }
 0x4f3   : > { %6214 = vpow2.f32 %v3383_v44  ;;  %v3340_v1 = vsub.f32 %v7787_v38, %v3288_v40 }
 0x4f4   : > { %v7932_v52 = vpop.eup %6208 }
 0x4f5   : > { %v3393_v15 = vmul.f32 1.442695, %v3340_v1  ;;  %v3454_v12 = vsel %vm3222_vm2, %v7932_v52, 0.0 }
 0x4f6   : > { %v3285_v11 = vpop.xlane.xlu0 %3284  ;;  %3455 = vadd.xlane.f32.xlu0 %v3454_v12 }
 0x4f7   : > { %6216 = vpow2.f32 %v3393_v15  ;;  %v3339_v48 = vsub.f32 %v7789_v34, %v3285_v11 }
 0x4f8   : > { %v7937_v3 = vpop.eup %6210 }
 0x4f9   : > { %v3391_v59 = vmul.f32 1.442695, %v3339_v48  ;;  %v3451_v36 = vsel %vm3222_vm2, %v7937_v3, 0.0 }
 0x4fa   : > { %3452 = vadd.xlane.f32.xlu0 %v3451_v36  ;;  %v3270_v23 = vpop.xlane.xlu1 %3269  ;;  %v3300_v47 = vpop.xlane.xlu0 %3299 }
 0x4fb   : > { %6218 = vpow2.f32 %v3391_v59  ;;  %v3334_v38 = vsub.f32 %v7797_v55, %v3270_v23  ;;  %v3344_v5 = vsub.f32 %v7800_v43, %v3300_v47 }
 0x4fc   : > { %v7942_v2 = vpop.eup %6212 }
 0x4fd   : > { %v3381_v62 = vmul.f32 1.442695, %v3334_v38  ;;  %v3466_v49 = vsel %vm3222_vm2, %v7942_v2, 0.0  ;;  %v3401_v10 = vmul.f32 1.442695, %v3344_v5 }
 0x4fe   : > { %3467 = vadd.xlane.f32.xlu0 %v3466_v49  ;;  %v3267_v29 = vpop.xlane.xlu1 %3266  ;;  %v3297_v18 = vpop.xlane.xlu0 %3296 }
 0x4ff   : > { %6220 = vpow2.f32 %v3381_v62  ;;  %v3333_v34 = vsub.f32 %v7802_v6, %v3267_v29  ;;  %v3343_v50 = vsub.f32 %v7806_v51, %v3297_v18 }
 0x500   : > { %v7947_v7 = vpop.eup %6214 }
 0x501   : > { %v3379_v9 = vmul.f32 1.442695, %v3333_v34  ;;  %v3463_v56 = vsel %vm3222_vm2, %v7947_v7, 0.0  ;;  %v3399_v15 = vmul.f32 1.442695, %v3343_v50 }
 0x502   : > { %3464 = vadd.xlane.f32.xlu0 %v3463_v56  ;;  %v3282_v39 = vpop.xlane.xlu1 %3281 }
 0x503   : > { %6222 = vpow2.f32 %v3379_v9  ;;  %v3338_v55 = vsub.f32 %v7814_v54, %v3282_v39 }
 0x504   : > { %v7952_v37 = vpop.eup %6216 }
 0x505   : > { %v3389_v25 = vmul.f32 1.442695, %v3338_v55  ;;  %v3478_v4 = vsel %vm3222_vm2, %v7952_v37, 0.0 }
 0x506   : > { %3479 = vadd.xlane.f32.xlu0 %v3478_v4  ;;  %v3279_v6 = vpop.xlane.xlu1 %3278 }
 0x507   : > { %6224 = vpow2.f32 %v3389_v25  ;;  %v3337_v42 = vsub.f32 %v7817_v61, %v3279_v6 }
 0x508   : > { %v7957_v58 = vpop.eup %6218 }
 0x509   : > { %v3387_v41 = vmul.f32 1.442695, %v3337_v42  ;;  %v3475_v54 = vsel %vm3222_vm2, %v7957_v58, 0.0 }
 0x50a   : > { %3476 = vadd.xlane.f32.xlu0 %v3475_v54  ;;  %v3294_v20 = vpop.xlane.xlu1 %3293 }
 0x50b   : > { %6226 = vpow2.f32 %v3387_v41  ;;  %v3342_v45 = vsub.f32 %v7824_v13, %v3294_v20 }
 0x50c   : > { %v7963_v46 = vpop.eup %6220 }
 0x50d   : > { %v3397_v61 = vmul.f32 1.442695, %v3342_v45  ;;  %v3460_v44 = vsel %vm3222_vm2, %v7963_v46, 0.0 }
 0x50e   : > { %3461 = vadd.xlane.f32.xlu1 %v3460_v44  ;;  %v3291_v43 = vpop.xlane.xlu1 %3290 }
 0x50f   : > { %6228 = vpow2.f32 %v3397_v61  ;;  %v3341_v40 = vsub.f32 %v7826_v35, %v3291_v43 }
 0x510   : > { %v7969_v1 = vpop.eup %6222  ;;  %6230 = vpow2.f32 %v3401_v10 }
 0x511   : > { %v3395_v12 = vmul.f32 1.442695, %v3341_v40  ;;  %v3457_v13 = vsel %vm3222_vm2, %v7969_v1, 0.0 }
 0x512   : > { %v3306_v11 = vpop.xlane.xlu0 %3305  ;;  %3458 = vadd.xlane.f32.xlu1 %v3457_v13 }
 0x513   : > { %6232 = vpow2.f32 %v3395_v12  ;;  %v3346_v51 = vsub.f32 %v7833_v63, %v3306_v11 }
 0x514   : > { %v7974_v48 = vpop.eup %6224  ;;  %v3303_v59 = vpop.xlane.xlu1 %3302  ;;  %6234 = vpow2.f32 %v3399_v15 }
 0x515   : > { %v3405_v36 = vmul.f32 1.442695, %v3346_v51  ;;  %v3345_v35 = vsub.f32 %v7838_v16, %v3303_v59  ;;  %v3472_v23 = vsel %vm3222_vm2, %v7974_v48, 0.0 }
 0x516   : > { %v3312_v38 = vpop.xlane.xlu0 %3311  ;;  %3473 = vadd.xlane.f32.xlu1 %v3472_v23 }
 0x517   : > { %v3403_v62 = vmul.f32 1.442695, %v3345_v35  ;;  %v3348_v49 = vsub.f32 %v7836_v28, %v3312_v38  ;;  %6236 = vpow2.f32 %v3405_v36 }
 0x518   : > { %v7980_v29 = vpop.eup %6226  ;;  %v3309_v34 = vpop.xlane.xlu1 %3308 }
 0x519   : > { %6238 = vpow2.f32 %v3403_v62  ;;  %v3409_v63 = vmul.f32 1.442695, %v3348_v49  ;;  %v3347_v9 = vsub.f32 %v7842_v30, %v3309_v34  ;;  %v3469_v56 = vsel %vm3222_vm2, %v7980_v29, 0.0  ;;  %v1242_v49 = vld [vmem:[#allocation4 + $0x20] sm:$0xff] }
 0x51a   : > { %v3420_v16 = vpop.xlane.xlu0 %3419  ;;  %3470 = vadd.xlane.f32.xlu1 %v3469_v56 }
 0x51b   : > { %6240 = vpow2.f32 %v3409_v63  ;;  %v3407_v39 = vmul.f32 1.442695, %v3347_v9  ;;  %v8281_v9 = vld [vmem:[#allocation24_spill] sm:$0xff] }
 0x51c   : > { %v7985_v55 = vpop.eup %6228  ;;  %6242 = vrcp.f32 %v3420_v16  ;;  %v3417_v47 = vpop.xlane.xlu1 %3416 }
 0x51d   : > { %6244 = vpow2.f32 %v3407_v39  ;;  %v3484_v28 = vsel %vm3222_vm2, %v7985_v55, 0.0  ;;  %v7989_v25 = vpop.eup %6230 }
 0x51e   : > { %6246 = vrcp.f32 %v3417_v47  ;;  %v3318_v4 = vpop.xlane.xlu0 %3317  ;;  %3485 = vadd.xlane.f32.xlu0 %v3484_v28  ;;  %v3490_v54 = vsel %vm3222_vm2, %v7989_v25, 0.0 }
 0x51f   : > { %v3350_v30 = vsub.f32 %v7855_v57, %v3318_v4 }
 0x520   : > { %v7992_v6 = vpop.eup %6232  ;;  %v3315_v42 = vpop.xlane.xlu1 %3314 }
 0x521   : > { %v3413_v5 = vmul.f32 1.442695, %v3350_v30  ;;  %v3349_v41 = vsub.f32 %v7859_v27, %v3315_v42  ;;  %v3481_v18 = vsel %vm3222_vm2, %v7992_v6, 0.0  ;;  %v7999_v20 = vpop.eup %6234 }
 0x522   : > { %v1148_v45 = vpop.permute.xlu0 %1147  ;;  %3491 = vadd.xlane.f32.xlu0 %v3490_v54  ;;  %3482 = vadd.xlane.f32.xlu1 %v3481_v18  ;;  %v3487_v27 = vsel %vm3222_vm2, %v7999_v20, 0.0 }
 0x523   : > { %6248 = vpow2.f32 %v3413_v5  ;;  %v3411_v10 = vmul.f32 1.442695, %v3349_v41  ;;  %1169 = vst.msk [vmem:[#allocation4 + $0xd8] sm:$0xff] %vm828_vm1, %v1148_v45 }
 0x524   : > { %v1142_v57 = vpop.permute.xlu1 %1141  ;;  %v8002_v50 = vpop.eup %6236 }
 0x525   : > { %6250 = vpow2.f32 %v3411_v10  ;;  %1166 = vst.msk [vmem:[#allocation4 + $0xc0] sm:$0xff] %vm828_vm1, %v1142_v57  ;;  %v3496_v12 = vsel %vm3222_vm2, %v8002_v50, 0.0  ;;  %v1244_v57 = vld [vmem:[#allocation4 + $0x30] sm:$0xff] }
 0x526   : > { %v8007_v61 = vpop.eup %6238  ;;  %v1146_v44 = vpop.permute.xlu0 %1145  ;;  %3488 = vadd.xlane.f32.xlu0 %v3487_v27 }
 0x527   : > { %1168 = vst.msk [vmem:[#allocation4 + $0xd0] sm:$0xff] %vm828_vm1, %v1146_v44  ;;  %v3493_v43 = vsel %vm3222_vm2, %v8007_v61, 0.0  ;;  %v1249_v44 = vld [vmem:[#allocation4 + $0x58] sm:$0xff] }
 0x528   : > { %v8012_v40 = vpop.eup %6240  ;;  %3494 = vadd.xlane.f32.xlu1 %v3493_v43 }
 0x529   : > { %v6243_v15 = vpop.eup %6242  ;;  %v3502_v59 = vsel %vm3222_vm2, %v8012_v40, 0.0 }
 0x52a   : > { %v8016_v13 = vpop.eup %6244  ;;  %v1152_v11 = vpop.permute.xlu0 %1151  ;;  %3497 = vadd.xlane.f32.xlu0 %v3496_v12  ;;  %v3544_v23 = vmul.f32 %v6243_v15, %v7848_v60  ;;  %v1247_v60 = vld [vmem:[#allocation4 + $0x48] sm:$0xff] }
 0x52b   : > { %v6247_v51 = vpop.eup %6246  ;;  %1171 = vst.msk [vmem:[#allocation4 + $0xe8] sm:$0xff] %vm828_vm1, %v1152_v11  ;;  %v3499_v35 = vsel %vm3222_vm2, %v8016_v13, 0.0 }
 0x52c   : > { %3503 = vadd.xlane.f32.xlu1 %v3502_v59  ;;  %v3543_v36 = vmul.f32 %v6247_v51, %v7852_v31  ;;  %v1248_v51 = vld [vmem:[#allocation4 + $0x50] sm:$0xff] }
 0x52e   : > { %5811 = vmatprep.mubr.msk.f32.mxu0 %vm3222_vm2, %v3543_v36  ;;  %v1150_v38 = vpop.permute.xlu0 %1149  ;;  %3500 = vadd.xlane.f32.xlu0 %v3499_v35  ;;  %v1251_v35 = vld [vmem:[#allocation4 + $0x68] sm:$0xff] }
 0x52f   : > { %1170 = vst.msk [vmem:[#allocation4 + $0xe0] sm:$0xff] %vm828_vm1, %v1150_v38  ;;  %5812 = vmatmul.mubr.msk.f32.vlgmr.msra.gmra.mxu0 %vm3222_vm2, %v3544_v23 }
 0x530   : > { %v8028_v62 = vpop.eup %6248  ;;  %5822 = vmatpush3.msra.mxu0 %v7693_v14  ;;  %v8282_v14 = vld [vmem:[#allocation25_spill] sm:$0xff] }
 0x531   : > { %5823 = vmatprep.subr.mxu0 %v1242_v49  ;;  %v3508_v31 = vsel %vm3222_vm2, %v8028_v62, 0.0 }
 0x532   : > { %v8033_v34 = vpop.eup %6250  ;;  %5824 = vmatpush3.msra.mxu0 %v1242_v49  ;;  %3509 = vadd.xlane.f32.xlu1 %v3508_v31 }
 0x533   : > { %5835 = vmatprep.subr.mxu0 %v1247_v60  ;;  %v3505_v63 = vsel %vm3222_vm2, %v8033_v34, 0.0 }
 0x534   : > { %3506 = vadd.xlane.f32.xlu0 %v3505_v63  ;;  %v8062_v63 = vld [vmem:[#allocation4 + $0x98] sm:$0xff] }
 0x543   : > { %1155 = vrot.lane.b32.xlu1 %v8281_v9, %s6574_s22 }
 0x54a   : > { %1153 = vrot.lane.b32.xlu0 %v8282_v14, %s6574_s22 }
 0x555   : > { %v3426_v56 = vpop.xlane.xlu1 %3425 }
 0x556   : > { %6252 = vrcp.f32 %v3426_v56 }
 0x559   : > { %v3423_v16 = vpop.xlane.xlu1 %3422 }
 0x55a   : > { %6254 = vrcp.f32 %v3423_v16 }
 0x55d   : > { %v3438_v39 = vpop.xlane.xlu1 %3437 }
 0x55e   : > { %6256 = vrcp.f32 %v3438_v39 }
 0x55f   : > { %v3432_v47 = vpop.xlane.xlu0 %3431 }
 0x561   : > { %v3435_v28 = vpop.xlane.xlu1 %3434 }
 0x562   : > { %6258 = vrcp.f32 %v3435_v28 }
 0x563   : > { %6260 = vrcp.f32 %v3432_v47  ;;  %v3429_v4 = vpop.xlane.xlu0 %3428  ;;  %v6253_v42 = vpop.eup %6252 }
 0x564   : > { %6262 = vrcp.f32 %v3429_v4  ;;  %v3546_v45 = vmul.f32 %v6253_v42, %v7886_v8 }
 0x565   : > { %v3450_v30 = vpop.xlane.xlu1 %3449 }
 0x566   : > { %6264 = vrcp.f32 %v3450_v30  ;;  %v1254_v30 = vld [vmem:[#allocation4 + $0x80] sm:$0xff] }
 0x567   : > { %v6255_v5 = vpop.eup %6254  ;;  %v3444_v41 = vpop.xlane.xlu0 %3443 }
 0x568   : > { %v3545_v54 = vmul.f32 %v6255_v5, %v7891_v24 }
 0x569   : > { %v3447_v18 = vpop.xlane.xlu1 %3446 }
 0x56a   : > { %6266 = vrcp.f32 %v3447_v18  ;;  %5818 = vmatprep.mubr.msk.f32.mxu1 %vm3222_vm2, %v3545_v54 }
 0x56b   : > { %6268 = vrcp.f32 %v3444_v41  ;;  %v3441_v10 = vpop.xlane.xlu0 %3440  ;;  %5819 = vmatmul.mubr.msk.f32.vlgmr.msra.gmra.mxu1 %vm3222_vm2, %v3546_v45  ;;  %v6257_v27 = vpop.eup %6256  ;;  %v1259_v41 = vld [vmem:[#allocation4 + $0xa8] sm:$0xff]  ;;  %v1258_v45 = vld [vmem:[#allocation4 + $0xa0] sm:$0xff] }
 0x56c   : > { %6270 = vrcp.f32 %v3441_v10  ;;  %5829 = vmatpush3.msra.mxu1 %v7722_v33  ;;  %v3550_v12 = vmul.f32 %v6257_v27, %v7895_v22  ;;  %v1253_v22 = vld [vmem:[#allocation4 + $0x78] sm:$0xff]  ;;  %v1263_v27 = vld [vmem:[#allocation4 + $0xc8] sm:$0xff] }
 0x56d   : > { %5830 = vmatprep.subr.mxu1 %v1244_v57 }
 0x56e   : > { %5831 = vmatpush3.msra.mxu1 %v1244_v57 }
 0x56f   : > { %v6259_v24 = vpop.eup %6258  ;;  %5842 = vmatprep.subr.mxu1 %v1249_v44 }
 0x570   : > { %v6261_v43 = vpop.eup %6260  ;;  %v3549_v8 = vmul.f32 %v6259_v24, %v7901_v17  ;;  %v1246_v17 = vld [vmem:[#allocation4 + $0x40] sm:$0xff] }
 0x571   : > { %v6263_v15 = vpop.eup %6262  ;;  %v3548_v33 = vmul.f32 %v6261_v43, %v7897_v26  ;;  %v1262_v43 = vld [vmem:[#allocation4 + $0xc0] sm:$0xff] }
 0x572   : > { %5832 = vmatprep.mubr.msk.f32.mxu1 %vm3222_vm2, %v3549_v8  ;;  %v3547_v11 = vmul.f32 %v6263_v15, %v7905_v21 }
 0x573   : > { %5833 = vmatmul.mubr.msk.f32.vlgmr.msra.gmra.mxu1 %vm3222_vm2, %v3550_v12  ;;  %v6265_v59 = vpop.eup %6264  ;;  %v8077_v12 = vld [vmem:[#allocation4 + $0xe8] sm:$0xff] }
 0x574   : > { %5843 = vmatpush3.msra.mxu1 %v1249_v44  ;;  %5825 = vmatprep.mubr.msk.f32.mxu0 %vm3222_vm2, %v3547_v11  ;;  %v3554_v38 = vmul.f32 %v6265_v59, %v7909_v32  ;;  %v1256_v59 = vld [vmem:[#allocation4 + $0x90] sm:$0xff] }
 0x575   : > { %5844 = vmatprep.subr.mxu1 %v1248_v51  ;;  %5826 = vmatmul.mubr.msk.f32.vlgmr.msra.gmra.mxu0 %vm3222_vm2, %v3548_v33 }
 0x576   : > { %5836 = vmatpush3.msra.mxu0 %v1247_v60  ;;  %5845 = vmatpush3.msra.mxu1 %v1248_v51  ;;  %v1252_v60 = vld [vmem:[#allocation4 + $0x70] sm:$0xff] }
 0x577   : > { %v6267_v36 = vpop.eup %6266  ;;  %5837 = vmatprep.subr.mxu0 %v1246_v17  ;;  %5856 = vmatprep.subr.mxu1 %v1253_v22 }
 0x578   : > { %v6269_v21 = vpop.eup %6268  ;;  %5838 = vmatpush3.msra.mxu0 %v1246_v17  ;;  %v3553_v26 = vmul.f32 %v6267_v36, %v7917_v19  ;;  %v1250_v19 = vld [vmem:[#allocation4 + $0x60] sm:$0xff] }
 0x579   : > { %v6271_v23 = vpop.eup %6270  ;;  %5849 = vmatprep.subr.mxu0 %v1251_v35  ;;  %v3552_v31 = vmul.f32 %v6269_v21, %v7913_v0 }
 0x57a   : > { %5846 = vmatprep.mubr.msk.f32.mxu1 %vm3222_vm2, %v3553_v26  ;;  %v3551_v49 = vmul.f32 %v6271_v23, %v7921_v53  ;;  %v1255_v53 = vld [vmem:[#allocation4 + $0x88] sm:$0xff] }
 0x57b   : > { %5847 = vmatmul.mubr.msk.f32.vlgmr.msra.gmra.mxu1 %vm3222_vm2, %v3554_v38  ;;  %v1260_v38 = vld [vmem:[#allocation4 + $0xb0] sm:$0xff] }
 0x57c   : > { %5857 = vmatpush3.msra.mxu1 %v1253_v22  ;;  %5839 = vmatprep.mubr.msk.f32.mxu0 %vm3222_vm2, %v3551_v49 }
 0x57d   : > { %5858 = vmatprep.subr.mxu1 %v1252_v60  ;;  %5840 = vmatmul.mubr.msk.f32.vlgmr.msra.gmra.mxu0 %vm3222_vm2, %v3552_v31  ;;  %v1265_v31 = vld [vmem:[#allocation4 + $0xd8] sm:$0xff] }
 0x57e   : > { %5850 = vmatpush3.msra.mxu0 %v1251_v35  ;;  %5859 = vmatpush3.msra.mxu1 %v1252_v60 }
 0x57f   : > { %5851 = vmatprep.subr.mxu0 %v1250_v19  ;;  %5870 = vmatprep.subr.mxu1 %v8062_v63  ;;  %v3456_v32 = vpop.xlane.xlu0 %3455 }
 0x580   : > { %5852 = vmatpush3.msra.mxu0 %v1250_v19  ;;  %6272 = vrcp.f32 %v3456_v32 }
 0x581   : > { %5863 = vmatprep.subr.mxu0 %v1255_v53 }
 0x583   : > { %v3453_v0 = vpop.xlane.xlu0 %3452 }
 0x584   : > { %6274 = vrcp.f32 %v3453_v0 }
 0x587   : > { %v3468_v9 = vpop.xlane.xlu0 %3467 }
 0x588   : > { %6276 = vrcp.f32 %v3468_v9 }
 0x58b   : > { %v3465_v14 = vpop.xlane.xlu0 %3464 }
 0x58c   : > { %6278 = vrcp.f32 %v3465_v14 }
 0x58d   : > { %v6273_v16 = vpop.eup %6272 }
 0x58e   : > { %v3556_v4 = vmul.f32 %v6273_v16, %v7932_v52 }
 0x58f   : > { %v3480_v56 = vpop.xlane.xlu0 %3479 }
 0x590   : > { %6280 = vrcp.f32 %v3480_v56  ;;  %v1264_v56 = vld [vmem:[#allocation4 + $0xd0] sm:$0xff] }
 0x591   : > { %v6275_v39 = vpop.eup %6274 }
 0x592   : > { %v3555_v47 = vmul.f32 %v6275_v39, %v7937_v3 }
 0x593   : > { %v3477_v28 = vpop.xlane.xlu0 %3476 }
 0x594   : > { %6282 = vrcp.f32 %v3477_v28  ;;  %5853 = vmatprep.mubr.msk.f32.mxu0 %vm3222_vm2, %v3555_v47 }
 0x595   : > { %5854 = vmatmul.mubr.msk.f32.vlgmr.msra.gmra.mxu0 %vm3222_vm2, %v3556_v4  ;;  %v6277_v5 = vpop.eup %6276 }
 0x596   : > { %5864 = vmatpush3.msra.mxu0 %v1255_v53  ;;  %v3560_v52 = vmul.f32 %v6277_v5, %v7942_v2 }
 0x597   : > { %5865 = vmatprep.subr.mxu0 %v1254_v30  ;;  %v3462_v42 = vpop.xlane.xlu1 %3461 }
 0x598   : > { %5866 = vmatpush3.msra.mxu0 %v1254_v30  ;;  %6284 = vrcp.f32 %v3462_v42 }
 0x599   : > { %v6279_v54 = vpop.eup %6278  ;;  %5877 = vmatprep.subr.mxu0 %v1259_v41 }
 0x59a   : > { %v3559_v3 = vmul.f32 %v6279_v54, %v7947_v7 }
 0x59b   : > { %v3459_v18 = vpop.xlane.xlu1 %3458 }
 0x59c   : > { %6286 = vrcp.f32 %v3459_v18  ;;  %5867 = vmatprep.mubr.msk.f32.mxu0 %vm3222_vm2, %v3559_v3 }
 0x59d   : > { %5868 = vmatmul.mubr.msk.f32.vlgmr.msra.gmra.mxu0 %vm3222_vm2, %v3560_v52  ;;  %v6281_v57 = vpop.eup %6280 }
 0x59e   : > { %5878 = vmatpush3.msra.mxu0 %v1259_v41  ;;  %v3564_v2 = vmul.f32 %v6281_v57, %v7952_v37 }
 0x59f   : > { %5879 = vmatprep.subr.mxu0 %v1258_v45  ;;  %v3474_v10 = vpop.xlane.xlu1 %3473 }
 0x5a0   : > { %5880 = vmatpush3.msra.mxu0 %v1258_v45  ;;  %6288 = vrcp.f32 %v3474_v10 }
 0x5a1   : > { %v6283_v44 = vpop.eup %6282  ;;  %5891 = vmatprep.subr.mxu0 %v1263_v27 }
 0x5a2   : > { %v3563_v7 = vmul.f32 %v6283_v44, %v7957_v58 }
 0x5a3   : > { %v3471_v24 = vpop.xlane.xlu1 %3470 }
 0x5a4   : > { %6290 = vrcp.f32 %v3471_v24  ;;  %5881 = vmatprep.mubr.msk.f32.mxu0 %vm3222_vm2, %v3563_v7 }
 0x5a5   : > { %5882 = vmatmul.mubr.msk.f32.vlgmr.msra.gmra.mxu0 %vm3222_vm2, %v3564_v2  ;;  %v6285_v15 = vpop.eup %6284 }
 0x5a6   : > { %5892 = vmatpush3.msra.mxu0 %v1263_v27  ;;  %v3558_v51 = vmul.f32 %v6285_v15, %v7963_v46 }
 0x5a7   : > { %5893 = vmatprep.subr.mxu0 %v1262_v43  ;;  %v3486_v8 = vpop.xlane.xlu0 %3485 }
 0x5a8   : > { %5894 = vmatpush3.msra.mxu0 %v1262_v43  ;;  %6292 = vrcp.f32 %v3486_v8 }
 0x5a9   : > { %v6287_v11 = vpop.eup %6286  ;;  %5905 = vmatprep.subr.mxu0 %v8077_v12 }
 0x5aa   : > { %v3557_v58 = vmul.f32 %v6287_v11, %v7969_v1  ;;  %v1261_v1 = vld [vmem:[#allocation4 + $0xb8] sm:$0xff] }
 0x5ab   : > { %v3492_v33 = vpop.xlane.xlu0 %3491  ;;  %v3483_v37 = vpop.xlane.xlu1 %3482 }
 0x5ac   : > { %5860 = vmatprep.mubr.msk.f32.mxu1 %vm3222_vm2, %v3557_v58  ;;  %6294 = vrcp.f32 %v3483_v37  ;;  %v5013_v37 = vld [vmem:[#allocation15 + $0x18] sm:$0xff] }
 0x5ad   : > { %5861 = vmatmul.mubr.msk.f32.vlgmr.msra.gmra.mxu1 %vm3222_vm2, %v3558_v51  ;;  %6296 = vrcp.f32 %v3492_v33  ;;  %v6289_v22 = vpop.eup %6288  ;;  %v5012_v51 = vld [vmem:[#allocation15 + $0x10] sm:$0xff] }
 0x5ae   : > { %5871 = vmatpush3.msra.mxu1 %v8062_v63  ;;  %v3562_v26 = vmul.f32 %v6289_v22, %v7974_v48 }
 0x5af   : > { %5872 = vmatprep.subr.mxu1 %v1256_v59  ;;  %v3489_v17 = vpop.xlane.xlu0 %3488 }
 0x5b0   : > { %6298 = vrcp.f32 %v3489_v17  ;;  %5873 = vmatpush3.msra.mxu1 %v1256_v59  ;;  %v5011_v17 = vld [vmem:[#allocation15 + $0x8] sm:$0xff] }
 0x5b1   : > { %v6291_v36 = vpop.eup %6290  ;;  %5884 = vmatprep.subr.mxu1 %v1261_v1  ;;  %v3495_v21 = vpop.xlane.xlu1 %3494 }
 0x5b2   : > { %6300 = vrcp.f32 %v3495_v21  ;;  %v3561_v46 = vmul.f32 %v6291_v36, %v7980_v29 }
 0x5b3   : > { %v3498_v35 = vpop.xlane.xlu0 %3497 }
 0x5b4   : > { %6302 = vrcp.f32 %v3498_v35  ;;  %5874 = vmatprep.mubr.msk.f32.mxu1 %vm3222_vm2, %v3561_v46 }
 0x5b5   : > { %5875 = vmatmul.mubr.msk.f32.vlgmr.msra.gmra.mxu1 %vm3222_vm2, %v3562_v26  ;;  %v3504_v23 = vpop.xlane.xlu1 %3503  ;;  %v6293_v60 = vpop.eup %6292 }
 0x5b6   : > { %5885 = vmatpush3.msra.mxu1 %v1261_v1  ;;  %6304 = vrcp.f32 %v3504_v23  ;;  %v3566_v32 = vmul.f32 %v6293_v60, %v7985_v55  ;;  %v5010_v1 = vld [vmem:[#allocation15] sm:$0xff] }
 0x5b7   : > { %5886 = vmatprep.subr.mxu1 %v1260_v38  ;;  %v3501_v49 = vpop.xlane.xlu0 %3500 }
 0x5b8   : > { %6306 = vrcp.f32 %v3501_v49  ;;  %5887 = vmatpush3.msra.mxu1 %v1260_v38 }
 0x5b9   : > { %5898 = vmatprep.subr.mxu1 %v1265_v31  ;;  %v6295_v29 = vpop.eup %6294 }
 0x5ba   : > { %v3565_v48 = vmul.f32 %v6295_v29, %v7992_v6  ;;  %v6297_v63 = vpop.eup %6296 }
 0x5bb   : > { %v3510_v19 = vpop.xlane.xlu1 %3509  ;;  %v3568_v39 = vmul.f32 %v6297_v63, %v7989_v25 }
 0x5bc   : > { %6308 = vrcp.f32 %v3510_v19  ;;  %5888 = vmatprep.mubr.msk.f32.mxu1 %vm3222_vm2, %v3565_v48 }
 0x5bd   : > { %v6299_v53 = vpop.eup %6298  ;;  %v3507_v0 = vpop.xlane.xlu0 %3506  ;;  %5889 = vmatmul.mubr.msk.f32.vlgmr.msra.gmra.mxu1 %vm3222_vm2, %v3566_v32 }
 0x5be   : > { %6310 = vrcp.f32 %v3507_v0  ;;  %v3567_v9 = vmul.f32 %v6299_v53, %v7999_v20  ;;  %5899 = vmatpush3.msra.mxu1 %v1265_v31  ;;  %v1266_v20 = vld [vmem:[#allocation4 + $0xe0] sm:$0xff] }
 0x5bf   : > { %v6301_v14 = vpop.eup %6300  ;;  %v1156_v16 = vpop.permute.xlu1 %1155  ;;  %5900 = vmatprep.subr.mxu1 %v1264_v56 }
 0x5c0   : > { %1173 = vst.msk [vmem:[#allocation4 + $0xf8] sm:$0xff] %vm828_vm1, %v1156_v16  ;;  %5895 = vmatprep.mubr.msk.f32.mxu0 %vm3222_vm2, %v3567_v9  ;;  %v3569_v55 = vmul.f32 %v6301_v14, %v8007_v61  ;;  %5901 = vmatpush3.msra.mxu1 %v1264_v56 }
 0x5c1   : > { %v6303_v6 = vpop.eup %6302  ;;  %v1154_v47 = vpop.permute.xlu0 %1153  ;;  %5896 = vmatmul.mubr.msk.f32.vlgmr.msra.gmra.mxu0 %vm3222_vm2, %v3568_v39 }
 0x5c2   : > { %1172 = vst.msk [vmem:[#allocation4 + $0xf0] sm:$0xff] %vm828_vm1, %v1154_v47  ;;  %5906 = vmatpush3.msra.mxu0 %v8077_v12  ;;  %5902 = vmatprep.mubr.msk.f32.mxu1 %vm3222_vm2, %v3569_v55  ;;  %v3570_v25 = vmul.f32 %v6303_v6, %v8002_v50 }
 0x5c3   : > { %5907 = vmatprep.subr.mxu0 %v1266_v20  ;;  %v6305_v28 = vpop.eup %6304 }
 0x5c4   : > { %5908 = vmatpush3.msra.mxu0 %v1266_v20  ;;  %5903 = vmatmul.mubr.msk.f32.vlgmr.msra.gmra.mxu1 %vm3222_vm2, %v3570_v25  ;;  %v3572_v42 = vmul.f32 %v6305_v28, %v8012_v40 }
 0x5c5   : > { %v6307_v61 = vpop.eup %6306  ;;  %5919 = vmatprep.subr.mxu0 %v5013_v37 }
 0x5c6   : > { %v3571_v4 = vmul.f32 %v6307_v61, %v8016_v13 }
 0x5c7   : > { %v1269_v30 = vld [vmem:[#allocation4 + $0xf8] sm:$0xff] }
 0x5c8   : > { %5909 = vmatprep.mubr.msk.f32.mxu0 %vm3222_vm2, %v3571_v4  ;;  %5912 = vmatprep.subr.mxu1 %v1269_v30 }
 0x5c9   : > { %5910 = vmatmul.mubr.msk.f32.vlgmr.msra.gmra.mxu0 %vm3222_vm2, %v3572_v42  ;;  %5913 = vmatpush3.msra.mxu1 %v1269_v30  ;;  %v1268_v5 = vld [vmem:[#allocation4 + $0xf0] sm:$0xff]  ;;  %v6309_v41 = vpop.eup %6308 }
 0x5ca   : > { %5914 = vmatprep.subr.mxu1 %v1268_v5  ;;  %v3574_v3 = vmul.f32 %v6309_v41, %v8028_v62  ;;  %5920 = vmatpush3.msra.mxu0 %v5013_v37 }
 0x5cb   : > { %v6311_v50 = vpop.eup %6310  ;;  %5915 = vmatpush3.msra.mxu1 %v1268_v5  ;;  %5921 = vmatprep.subr.mxu0 %v5012_v51 }
 0x5cc   : > { %v3573_v54 = vmul.f32 %v6311_v50, %v8033_v34  ;;  %5922 = vmatpush3.msra.mxu0 %v5012_v51 }
 0x5cd   : > { %5923 = vmatprep.subr.mxu0 %v5011_v17 }
 0x5ce   : > { %5916 = vmatprep.mubr.msk.f32.mxu1 %vm3222_vm2, %v3573_v54  ;;  %5924 = vmatpush3.msra.mxu0 %v5011_v17 }
 0x5cf   : > { %5917 = vmatmul.mubr.msk.f32.vlgmr.msra.gmra.mxu1 %vm3222_vm2, %v3574_v3  ;;  %5925 = vmatprep.subr.mxu0 %v5010_v1 }
 0x5d0   : > { %5926 = vmatpush3.msra.mxu0 %v5010_v1 }
 0x5ef   : > { %v5813_v40 = vpop.f32.mrf.mxu0 }
 0x5f0   : > { %4872 = vst.msk [vmem:[#allocation5 + $0x8] sm:$0xff] %vm828_vm1, %v5813_v40 }
 0x5f1   : > { %v3647_v13 = vpop.f32.mrf.mxu0 }
 0x5f2   : > { %4871 = vst.msk [vmem:[#allocation5] sm:$0xff] %vm828_vm1, %v3647_v13 }
 0x62b   : > { %v5820_v18 = vpop.f32.mrf.mxu1 }
 0x62c   : > { %4874 = vst.msk [vmem:[#allocation5 + $0x18] sm:$0xff] %vm828_vm1, %v5820_v18 }
 0x62d   : > { %v3728_v52 = vpop.f32.mrf.mxu1 }
 0x62e   : > { %4873 = vst.msk [vmem:[#allocation5 + $0x10] sm:$0xff] %vm828_vm1, %v3728_v52 }
 0x633   : > { %v5834_v45 = vpop.f32.mrf.mxu1 }
 0x634   : > { %4878 = vst.msk [vmem:[#allocation5 + $0x38] sm:$0xff] %vm828_vm1, %v5834_v45  ;;  %v5440_v45 = vld [vmem:[%s8232_s9] ss:$0 sm:$0xff] }
 0x635   : > { %v5827_v62 = vpop.f32.mrf.mxu0  ;;  %v3890_v34 = vpop.f32.mrf.mxu1 }
 0x636   : > { %4876 = vst.msk [vmem:[#allocation5 + $0x28] sm:$0xff] %vm828_vm1, %v5827_v62  ;;  %4877 = vst.msk [vmem:[#allocation5 + $0x30] sm:$0xff] %vm828_vm1, %v3890_v34 }
 0x637   : > { %v3809_v10 = vpop.f32.mrf.mxu0 }
 0x638   : > { %4875 = vst.msk [vmem:[#allocation5 + $0x20] sm:$0xff] %vm828_vm1, %v3809_v10 }
 0x63b   : > { %v5848_v27 = vpop.f32.mrf.mxu1 }
 0x63d   : > { %v5841_v57 = vpop.f32.mrf.mxu0  ;;  %v4052_v7 = vpop.f32.mrf.mxu1 }
 0x63e   : > { %4889 = vrot.lane.b32.xlu0 %v5841_v57, %s6575_s29 }
 0x63f   : > { %v3971_v44 = vpop.f32.mrf.mxu0 }
 0x640   : > { %4887 = vrot.lane.b32.xlu1 %v3971_v44, %s6575_s29 }
 0x642   : > { %4893 = vrot.lane.b32.xlu0 %v5848_v27, %s6575_s29 }
 0x644   : > { %4891 = vrot.lane.b32.xlu1 %v4052_v7, %s6575_s29 }
 0x655   : > { %v5855_v24 = vpop.f32.mrf.mxu0 }
 0x656   : > { %4897 = vrot.lane.b32.xlu0 %v5855_v24, %s6575_s29 }
 0x657   : > { %v4133_v2 = vpop.f32.mrf.mxu0 }
 0x658   : > { %4895 = vrot.lane.b32.xlu1 %v4133_v2, %s6575_s29 }
 0x65d   : > { %v5869_v8 = vpop.f32.mrf.mxu0 }
 0x65f   : > { %v4295_v12 = vpop.f32.mrf.mxu0 }
 0x665   : > { %v5883_v58 = vpop.f32.mrf.mxu0 }
 0x667   : > { %v4457_v59 = vpop.f32.mrf.mxu0 }
 0x66d   : > { %v5862_v43 = vpop.f32.mrf.mxu1 }
 0x66e   : > { %4901 = vrot.lane.b32.xlu0 %v5862_v43, %s6575_s29 }
 0x66f   : > { %v4214_v15 = vpop.f32.mrf.mxu1 }
 0x670   : > { %4899 = vrot.lane.b32.xlu1 %v4214_v15, %s6575_s29 }
 0x672   : > { %4930 = vrot.lane.b32.xlu0 %v5869_v8, %s6576_s17 }
 0x674   : > { %4928 = vrot.lane.b32.xlu1 %v4295_v12, %s6576_s17 }
 0x675   : > { %v5876_v11 = vpop.f32.mrf.mxu1 }
 0x676   : > { %4934 = vrot.lane.b32.xlu0 %v5876_v11, %s6576_s17 }
 0x677   : > { %v4376_v33 = vpop.f32.mrf.mxu1 }
 0x678   : > { %4932 = vrot.lane.b32.xlu1 %v4376_v33, %s6576_s17 }
 0x67a   : > { %4938 = vrot.lane.b32.xlu0 %v5883_v58, %s6576_s17 }
 0x67c   : > { %4936 = vrot.lane.b32.xlu1 %v4457_v59, %s6576_s17 }
 0x67d   : > { %v5890_v22 = vpop.f32.mrf.mxu1 }
 0x67e   : > { %4942 = vrot.lane.b32.xlu0 %v5890_v22, %s6576_s17 }
 0x67f   : > { %v4538_v36 = vpop.f32.mrf.mxu1 }
 0x680   : > { %4940 = vrot.lane.b32.xlu1 %v4538_v36, %s6576_s17  ;;  %s6491_s17 = scalar_lea.vmem %s6490_s20, 2048 }
 0x681   : > { %v5897_v21 = vpop.f32.mrf.mxu0  ;;  %p6493_p9 = scmp.lt.s32.totalorder %s6491_s17, %s6485_s23 }
 0x682   : > { %4971 = vrot.lane.b32.xlu0 %v5897_v21, %s6577_s30 }
 0x683   : > { %v4619_v46 = vpop.f32.mrf.mxu0  ;;  %p6494_p1 = por %p6493_p9, %p6492_p5 }
 0x684   : > { %v5904_v35 = vpop.f32.mrf.mxu1  ;;  %4969 = vrot.lane.b32.xlu1 %v4619_v46, %s6577_s30 }
 0x685   : > { %p6495_p3 = pnand %p6494_p1, %p6488_p13 }
 0x686   : > { %v4700_v26 = vpop.f32.mrf.mxu1  ;;  %4975 = vrot.lane.b32.xlu0 %v5904_v35, %s6577_s30 }
 0x688   : > { %4973 = vrot.lane.b32.xlu1 %v4700_v26, %s6577_s30 }
 0x689   : > { %v5911_v23 = vpop.f32.mrf.mxu0 }
 0x68a   : > { %4979 = vrot.lane.b32.xlu0 %v5911_v23, %s6577_s30 }
 0x68b   : > { %v4781_v38 = vpop.f32.mrf.mxu0 }
 0x68c   : > { %4977 = vrot.lane.b32.xlu1 %v4781_v38, %s6577_s30 }
 0x68f   : > { %v5918_v49 = vpop.f32.mrf.mxu1 }
 0x690   : > { %4983 = vrot.lane.b32.xlu0 %v5918_v49, %s6577_s30 }
 0x691   : > { %v4862_v31 = vpop.f32.mrf.mxu1 }
 0x692   : > { %4981 = vrot.lane.b32.xlu1 %v4862_v31, %s6577_s30 }
 0x6b0   : > { %v4890_v60 = vpop.permute.xlu0 %4889 }
 0x6b1   : > { %4913 = vst.msk [vmem:[#allocation5 + $0x8] sm:$0xff] %vm4911_vm3, %v4890_v60 }
 0x6b2   : > { %v4888_v29 = vpop.permute.xlu1 %4887 }
 0x6b3   : > { %4912 = vst.msk [vmem:[#allocation5] sm:$0xff] %vm4911_vm3, %v4888_v29 }
 0x6b4   : > { %v4894_v19 = vpop.permute.xlu0 %4893 }
 0x6b5   : > { %4915 = vst.msk [vmem:[#allocation5 + $0x18] sm:$0xff] %vm4911_vm3, %v4894_v19 }
 0x6b6   : > { %v4892_v48 = vpop.permute.xlu1 %4891 }
 0x6b7   : > { %4914 = vst.msk [vmem:[#allocation5 + $0x10] sm:$0xff] %vm4911_vm3, %v4892_v48 }
 0x6c8   : > { %v4898_v63 = vpop.permute.xlu0 %4897 }
 0x6c9   : > { %4917 = vst.msk [vmem:[#allocation5 + $0x28] sm:$0xff] %vm4911_vm3, %v4898_v63 }
 0x6ca   : > { %v4896_v32 = vpop.permute.xlu1 %4895 }
 0x6cb   : > { %4916 = vst.msk [vmem:[#allocation5 + $0x20] sm:$0xff] %vm4911_vm3, %v4896_v32 }
 0x6e0   : > { %v4902_v53 = vpop.permute.xlu0 %4901 }
 0x6e1   : > { %4919 = vst.msk [vmem:[#allocation5 + $0x38] sm:$0xff] %vm4911_vm3, %v4902_v53 }
 0x6e2   : > { %v4900_v0 = vpop.permute.xlu1 %4899 }
 0x6e3   : > { %4918 = vst.msk [vmem:[#allocation5 + $0x30] sm:$0xff] %vm4911_vm3, %v4900_v0 }
 0x6e4   : > { %v4931_v9 = vpop.permute.xlu0 %4930 }
 0x6e5   : > { %4954 = vst.msk [vmem:[#allocation5 + $0x8] sm:$0xff] %vm4952_vm4, %v4931_v9 }
 0x6e6   : > { %v4929_v14 = vpop.permute.xlu1 %4928 }
 0x6e7   : > { %4953 = vst.msk [vmem:[#allocation5] sm:$0xff] %vm4952_vm4, %v4929_v14 }
 0x6e8   : > { %v4935_v56 = vpop.permute.xlu0 %4934 }
 0x6e9   : > { %4956 = vst.msk [vmem:[#allocation5 + $0x18] sm:$0xff] %vm4952_vm4, %v4935_v56 }
 0x6ea   : > { %v4933_v16 = vpop.permute.xlu1 %4932 }
 0x6eb   : > { %4955 = vst.msk [vmem:[#allocation5 + $0x10] sm:$0xff] %vm4952_vm4, %v4933_v16 }
 0x6ec   : > { %v4939_v39 = vpop.permute.xlu0 %4938 }
 0x6ed   : > { %4958 = vst.msk [vmem:[#allocation5 + $0x28] sm:$0xff] %vm4952_vm4, %v4939_v39 }
 0x6ee   : > { %v4937_v55 = vpop.permute.xlu1 %4936 }
 0x6ef   : > { %4957 = vst.msk [vmem:[#allocation5 + $0x20] sm:$0xff] %vm4952_vm4, %v4937_v55 }
 0x6f0   : > { %v4943_v6 = vpop.permute.xlu0 %4942 }
 0x6f1   : > { %4960 = vst.msk [vmem:[#allocation5 + $0x38] sm:$0xff] %vm4952_vm4, %v4943_v6 }
 0x6f2   : > { %v4941_v47 = vpop.permute.xlu1 %4940 }
 0x6f3   : > { %4959 = vst.msk [vmem:[#allocation5 + $0x30] sm:$0xff] %vm4952_vm4, %v4941_v47 }
 0x6f4   : > { %v4972_v20 = vpop.permute.xlu0 %4971 }
 0x6f5   : > { %4995 = vst.msk [vmem:[#allocation5 + $0x8] sm:$0xff] %vm4993_vm5, %v4972_v20 }
 0x6f6   : > { %v4970_v25 = vpop.permute.xlu1 %4969 }
 0x6f7   : > { %4994 = vst.msk [vmem:[#allocation5] sm:$0xff] %vm4993_vm5, %v4970_v25 }
 0x6f8   : > { %v4976_v28 = vpop.permute.xlu0 %4975 }
 0x6f9   : > { %4997 = vst.msk [vmem:[#allocation5 + $0x18] sm:$0xff] %vm4993_vm5, %v4976_v28 }
 0x6fa   : > { %v4974_v61 = vpop.permute.xlu1 %4973 }
 0x6fb   : > { %4996 = vst.msk [vmem:[#allocation5 + $0x10] sm:$0xff] %vm4993_vm5, %v4974_v61 }
 0x6fc   : > { %v4980_v4 = vpop.permute.xlu0 %4979  ;;  %v5003_v5 = vld [vmem:[#allocation5 + $0x8] sm:$0xff] }
 0x6fd   : > { %4999 = vst.msk [vmem:[#allocation5 + $0x28] sm:$0xff] %vm4993_vm5, %v4980_v4 }
 0x6fe   : > { %v4978_v30 = vpop.permute.xlu1 %4977  ;;  %v5002_v42 = vld [vmem:[#allocation5] sm:$0xff] }
 0x6ff   : > { %4998 = vst.msk [vmem:[#allocation5 + $0x20] sm:$0xff] %vm4993_vm5, %v4978_v30  ;;  %5927 = vmatprep.mubr.msk.f32.mxu0 %vm473_vm0, %v5002_v42 }
 0x700   : > { %5928 = vmatmul.mubr.msk.f32.vlgmr.msra.gmra.mxu0 %vm473_vm0, %v5003_v5  ;;  %v5005_v54 = vld [vmem:[#allocation5 + $0x18] sm:$0xff] }
 0x702   : > { %v4984_v41 = vpop.permute.xlu0 %4983  ;;  %v5004_v50 = vld [vmem:[#allocation5 + $0x10] sm:$0xff] }
 0x703   : > { %5001 = vst.msk [vmem:[#allocation5 + $0x38] sm:$0xff] %vm4993_vm5, %v4984_v41  ;;  %5930 = vmatprep.mubr.msk.f32.mxu0 %vm473_vm0, %v5004_v50 }
 0x704   : > { %v4982_v3 = vpop.permute.xlu1 %4981  ;;  %5931 = vmatmul.mubr.msk.f32.gmra.mxu0 %vm473_vm0, %v5005_v54  ;;  %v5007_v13 = vld [vmem:[#allocation5 + $0x28] sm:$0xff] }
 0x705   : > { %5000 = vst.msk [vmem:[#allocation5 + $0x30] sm:$0xff] %vm4993_vm5, %v4982_v3 }
 0x706   : > { %v5006_v40 = vld [vmem:[#allocation5 + $0x20] sm:$0xff] }
 0x707   : > { %5933 = vmatprep.mubr.msk.f32.mxu0 %vm473_vm0, %v5006_v40 }
 0x708   : > { %5934 = vmatmul.mubr.msk.f32.gmra.mxu0 %vm473_vm0, %v5007_v13 }
 0x70a   : > { %v5009_v52 = vld [vmem:[#allocation5 + $0x38] sm:$0xff] }
 0x70c   : > { %v5008_v18 = vld [vmem:[#allocation5 + $0x30] sm:$0xff] }
 0x70d   : > { %5936 = vmatprep.mubr.msk.f32.mxu0 %vm473_vm0, %v5008_v18 }
 0x70e   : > { %5937 = vmatmul.mubr.msk.f32.gmra.mxu0 %vm473_vm0, %v5009_v52 }
 0x7c0   : > { %v5929_v62 = vpop.f32.mrf.mxu0 }
 0x7c1   : > { %v5117_v34 = vadd.f32 %v5929_v62, %v5440_v45 }
 0x7c2   : > { %v5111_v10 = vpop.f32.mrf.mxu0 }
 0x7c3   : > { %5151 = vst.msk [vmem:[%s451_s25 + $0x8] sm:$0xff] %vm473_vm0, %v5117_v34  ;;  %v5112_v57 = vadd.f32 %v5440_v45, %v5111_v10 }
 0x7c4   : > { %v5932_v27 = vpop.f32.mrf.mxu0 }
 0x7c5   : > { %5150 = vst.msk [vmem:[%s451_s25] sm:$0xff] %vm473_vm0, %v5112_v57  ;;  %v5127_v44 = vadd.f32 %v5932_v27, %v5440_v45 }
 0x7c6   : > { %v5121_v7 = vpop.f32.mrf.mxu0 }
 0x7c7   : > { %5153 = vst.msk [vmem:[%s451_s25 + $0x18] sm:$0xff] %vm473_vm0, %v5127_v44  ;;  %v5122_v24 = vadd.f32 %v5440_v45, %v5121_v7 }
 0x7c8   : > { %v5935_v2 = vpop.f32.mrf.mxu0 }
 0x7c9   : > { %5152 = vst.msk [vmem:[%s451_s25 + $0x10] sm:$0xff] %vm473_vm0, %v5122_v24  ;;  %v5137_v43 = vadd.f32 %v5935_v2, %v5440_v45 }
 0x7ca   : > { %v5131_v8 = vpop.f32.mrf.mxu0 }
 0x7cb   : > { %5155 = vst.msk [vmem:[%s451_s25 + $0x28] sm:$0xff] %vm473_vm0, %v5137_v43  ;;  %v5132_v15 = vadd.f32 %v5440_v45, %v5131_v8 }
 0x7cd   : > { %5154 = vst.msk [vmem:[%s451_s25 + $0x20] sm:$0xff] %vm473_vm0, %v5132_v15 }
 0x7ce   : > { %v5938_v12 = vpop.f32.mrf.mxu0 }
 0x7cf   : > { %v5147_v11 = vadd.f32 %v5938_v12, %v5440_v45 }
 0x7d0   : > { %v5141_v58 = vpop.f32.mrf.mxu0 }
 0x7d1   : > { %5157 = vst.msk [vmem:[%s451_s25 + $0x38] sm:$0xff] %vm473_vm0, %v5147_v11  ;;  %v5142_v33 = vadd.f32 %v5440_v45, %v5141_v58 }
 0x7d3   : > { %5156 = vst.msk [vmem:[%s451_s25 + $0x30] sm:$0xff] %vm473_vm0, %v5142_v33 }
 0x7d4   : > { %6498 = shalt.err (!%p6495_p3)
}
 0x7d5   : > { %s6499_s30 = scalar_lea.hbm %s8175_s18, 1024  ;;  %s6503_s25 = scalar_lea.hbm %s8233_s10, 2048 }
 0x7d6   : > { %p6500_p4 = scmp.ne.s32.totalorder %s8175_s18, %s6499_s30  ;;  %p6504_p2 = scmp.lt.s32.totalorder %s8175_s18, %s8233_s10 }
 0x7d7   : > { %p6505_p7 = scmp.lt.s32.totalorder %s6503_s25, %s6499_s30 }
 0x7d8   : > { %p6501_p12 = pnand %p6500_p4, %p8283_p11 }
 0x7d9   : > { %p6506_p8 = por %p6505_p7, %p6504_p2 }
 0x7da   : > { %p6502_p6 = pneg %p6501_p12 }
 0x7dc   : > { %p6507_p10 = pnand %p6506_p8, %p6502_p6 }
 0x7de   : > { %6510 = shalt.err (!%p6507_p10)
}
 0x7df   : > { %s6579_s27 = smov 128  }
 0x7e0   : > { %5969 = dma.vmem_to_hbm [thread:$0]  (%p8283_p11), %s8178_s24, 1024, %s8175_s18, %s5159_s19, %s6579_s27, %s6579_s27, %s6575_s29  }
 0x7e1 PF: > { %s5188_s23 = sand.u32 1, %s6549_s13   ;;  %p8284_p0 = scmp.ne.s32.totalorder %s8259_s21, 0 }
 0x7e2   : > { %p8285_p13 = scmp.ge.s32.totalorder %s6561_s16, 2  ;;  %s5189_s1 = scalar_lea.sflag [#allocation8], %s5188_s23 }
 0x7e4   : > { %p5992_p5 = pnand %p8285_p13, %p8284_p0 }
 0x7e6   : > { %p5993_p9 = pneg %p5992_p5 }
 0x7e8   : > { %6544 = dma.done.wait (%p5993_p9), %s5189_s1, 1024  }
 0x7e9   : > { %6546 = vsyncadd (%p5993_p9), %s5189_s1, 4294966272  ;;  %p26_p1 = scmp.ge.s32.totalorder %s6746_s26, 4   ;;  %s8286_s13 = smov %s6553_s14 }
 0x7ea   : > { %s8287_s14 = smov %s6557_s15  ;;  %s8288_s15 = smov %s6758_s11 }
 0x7eb   : > { %s8289_s16 = smov %s6746_s26  ;;  %28 = sbr.rel (!%p26_p1) target bundleno = 13 (0xd), region = 134 }
 0x7f0   :  { %5194 = vsyncpa [#allocation7], 1 }
 0x7f1   :  { %5196 = vsyncpa [#allocation7 + $0x1], 1 }
 0x7f2   :  { %5197 = vsyncpa [#allocation10], 1 }
 0x7f3   :  { %5198 = vsyncpa [#allocation13], 1 }
 0x7f4   :  { %5199 = vsyncpa [#allocation16], 1 }
 0x7f5   :  { %5200 = vsyncpa [#allocation8], 1 }
 0x7f6   :  { %5202 = vsyncpa [#allocation8 + $0x1], 1 }

</bundles_post_ra>
